<compile_context>
chip_gen: v5e
topology: v5e:2x2
jax: 0.10.0
libtpu: 0.0.40
codegen_flags: <defaults>
</compile_context>

<pallas_src>
import math

import jax
import jax.numpy as jnp
from jax import lax
from jax.experimental import pallas as pl
from jax.experimental.pallas import tpu as pltpu

# ----------------------------- module configuration -----------------------------
PDIM = 4            # `dim` arg of PLKConv2d (= int(16 * 0.25) in the PLKSR config)
KSIZE = 7           # kernel_size
WITH_IDT = False    # with_idt
MXU_DTYPE = jnp.bfloat16        # MXU operand dtype; accumulation stays float32
TARGET_TILE_N = 16384           # desired lane-width of one spatial tile (multiple of 128)


def _pick_tile_rows(H, W, batch):
    """Rows per spatial tile.

    Constraints: tile_rows divides H, tile_rows*W is a multiple of 128 (lane-dense stores),
    tile_rows*W as close to TARGET_TILE_N as possible, and batch*n_tiles >= 2 when possible
    so both v7x TensorCores get work.  Falls back to a single full-image tile (block dim ==
    full array dim, still a valid BlockSpec) when no aligned divisor exists.
    """
    r_align = 128 // math.gcd(W, 128)           # tile_rows multiple of this => tile_n % 128 == 0
    cands = [r for r in range(r_align, H + 1, r_align) if H % r == 0]
    if not cands:
        return H                                # full-image fallback (never a 49x-expanded block)
    good = [r for r in cands if r * W <= TARGET_TILE_N]
    tr = max(good) if good else min(cands)
    if batch * (H // tr) < 2:                   # give the megacore at least 2 grid steps
        smaller = [r for r in cands if r < tr]
        if smaller:
            tr = max(smaller)
    return tr


# ----------------------------- Pallas kernel -----------------------------
def _make_kernel(pdim, ksize, width, tile_n, cover_c, with_idt):
    def kernel(slab_ref, w_ref, b_ref, m_ref, x_ref, o_ref, p_ref):
        # slab_ref : (1, 1, pdim, Lg)      bf16  vertically-padded halo rows, flattened (+3/+3 guards)
        # w_ref    : (pdim, pdim*k*k)      bf16  conv weight, (kh, kw, cin) contraction order
        # b_ref    : (pdim, 1)             f32   bias
        # m_ref    : (ksize, tile_n)       bf16  per-kw horizontal-boundary masks (resident)
        # x_ref    : (1, cover_c, tile_n)  f32   aliased input block (flattened H*W on lanes)
        # o_ref    : (1, cover_c, tile_n)  f32   aliased output block
        # p_ref    : (pdim*k*k, tile_n)    bf16  VMEM scratch: im2col patches (never in HBM)

        # Build the im2col patch matrix in VMEM from lane-shifted reads of the halo slab.
        # Output pixel n = r*W + w reads slab[n + kh*W + kw] (guards make all offsets >= 0);
        # taps that would wrap around a row edge are zeroed by the kw mask.
        for kh in range(ksize):
            for kw in range(ksize):
                off = kh * width + kw                                 # static lane offset
                t = kh * ksize + kw
                piece = slab_ref[0, 0, :, off:off + tile_n]           # (pdim, tile_n) bf16
                p_ref[t * pdim:(t + 1) * pdim, :] = piece * m_ref[kw:kw + 1, :]

        # One fused MXU matmul over K = pdim*k*k (no 49 tiny K=4 matmuls), f32 accumulation.
        acc = jnp.dot(w_ref[...], p_ref[...], preferred_element_type=jnp.float32)
        acc = acc + b_ref[...]                                        # lane-dense f32 epilogue
        if with_idt:
            acc = acc + x_ref[0, :pdim, :]
        o_ref[0, :pdim, :] = acc.astype(o_ref.dtype)
        if cover_c > pdim:                                            # pass-through channels inside
            o_ref[0, pdim:, :] = x_ref[0, pdim:, :]                   # the written block
    return kernel


# ----------------------------- wrapper -----------------------------
def plk_conv2d(x, w, b, *, pdim, ksize, with_idt=False):
    """PLKConv2d forward.  x: NCHW [B,C,H,W];  w: OIHW [pdim,pdim,k,k];  b: [pdim]."""
    B, C, H, W = x.shape
    assert C >= pdim, (C, pdim)
    assert ksize % 2 == 1, ksize
    pad = ksize // 2
    kdim = pdim * ksize * ksize
    N = H * W

    TR = _pick_tile_rows(H, W, B)               # rows per spatial tile (divides H)
    n_tiles = H // TR
    tile_n = TR * W
    Lg = (TR + 2 * pad) * W + 2 * pad           # flattened halo-slab length per tile

    # --- conv-channel halo slabs: vertical pad + overlapping row windows, flattened. ---
    # O(pdim*H*W) bytes of layout plumbing — the 49x im2col is built in VMEM by the kernel.
    x1 = x[:, :pdim]
    xv = jnp.pad(x1, ((0, 0), (0, 0), (pad, pad), (0, 0)))            # (B, pdim, H+2p, W)
    windows = jnp.stack([xv[:, :, i * TR:i * TR + TR + 2 * pad, :]
                         for i in range(n_tiles)], axis=1)            # (B, nt, pdim, TR+2p, W)
    slab = windows.reshape(B, n_tiles, pdim, (TR + 2 * pad) * W)
    slab = jnp.pad(slab, ((0, 0), (0, 0), (0, 0), (pad, pad))).astype(MXU_DTYPE)  # +guards -> Lg

    # --- per-kw horizontal-boundary masks (tile-invariant, fetched once, stays resident) ---
    col = jnp.arange(tile_n, dtype=jnp.int32) % W
    masks = jnp.stack([((col + (kw - pad) >= 0) & (col + (kw - pad) < W))
                       for kw in range(ksize)], axis=0).astype(MXU_DTYPE)         # (ksize, tile_n)

    # weight flattened to the kernel's (kh, kw, cin) contraction order
    wflat = jnp.transpose(w, (0, 2, 3, 1)).reshape(pdim, kdim).astype(MXU_DTYPE)  # (Cout, k*k*Cin)
    bcol = b.reshape(pdim, 1).astype(jnp.float32)

    x_lin = x.reshape(B, C, N)                  # free bitcast; aliased (in-place) output
    # channel coverage of the written block: pdim rounded up to 8 sublanes (rest untouched)
    cover_c = C if C <= 8 else ((pdim + 7) // 8) * 8

    kernel = _make_kernel(pdim, ksize, W, tile_n, cover_c, with_idt)

    grid_spec = pltpu.PrefetchScalarGridSpec(
        num_scalar_prefetch=0,
        grid=(B, n_tiles),
        in_specs=[
            pl.BlockSpec((1, 1, pdim, Lg), lambda bi, ti: (bi, ti, 0, 0)),   # halo slab
            pl.BlockSpec((pdim, kdim), lambda bi, ti: (0, 0)),               # weight (resident)
            pl.BlockSpec((pdim, 1), lambda bi, ti: (0, 0)),                  # bias (resident)
            pl.BlockSpec((ksize, tile_n), lambda bi, ti: (0, 0)),            # kw masks (resident)
            pl.BlockSpec((1, cover_c, tile_n), lambda bi, ti: (bi, 0, ti)),  # aliased x
        ],
        out_specs=pl.BlockSpec((1, cover_c, tile_n), lambda bi, ti: (bi, 0, ti)),
        scratch_shapes=[pltpu.VMEM((kdim, tile_n), MXU_DTYPE)],              # in-VMEM im2col
    )

    out = pl.pallas_call(
        kernel,
        out_shape=jax.ShapeDtypeStruct((B, C, N), x.dtype),
        grid_spec=grid_spec,
        input_output_aliases={4: 0},            # write conv channels in place, no concat
        compiler_params=pltpu.CompilerParams(
            dimension_semantics=("parallel", "parallel"),
            vmem_limit_bytes=32 * 1024 * 1024),
    )(slab, wflat, bcol, masks, x_lin)
    return out.reshape(B, C, H, W)


# donate x so the in-place alias is real (no hidden defensive copy)          [review #6]
plk_conv2d_jit = jax.jit(plk_conv2d, static_argnames=("pdim", "ksize", "with_idt"),
                         donate_argnums=(0,))


# ----------------------------- demo -----------------------------
if __name__ == "__main__":
    key = jax.random.PRNGKey(0)
    kx, kwt, kb = jax.random.split(key, 3)
    B, C, H, W = 2, 16, 16, 16
    x = jax.random.normal(kx, (B, C, H, W), jnp.float32)
    w = jax.random.normal(kwt, (PDIM, PDIM, KSIZE, KSIZE), jnp.float32) * 0.02  # ~trunc_normal_(0.02)
    b = jax.random.normal(kb, (PDIM,), jnp.float32) * 0.05

    # pure-JAX float32 reference (computed BEFORE the kernel call: x is donated below)
    conv = lax.conv_general_dilated(
        x[:, :PDIM], w, (1, 1), "SAME",
        dimension_numbers=("NCHW", "OIHW", "NCHW")) + b.reshape(1, PDIM, 1, 1)
    if WITH_IDT:
        conv = conv + x[:, :PDIM]
    y_ref = x.at[:, :PDIM].set(conv)
    jax.block_until_ready(y_ref)

    y = plk_conv2d_jit(x, w, b, pdim=PDIM, ksize=KSIZE, with_idt=WITH_IDT)
    jax.block_until_ready(y)
    assert y.shape == (B, C, H, W), y.shape

    assert bool(jnp.array_equal(y[:, PDIM:], y_ref[:, PDIM:])), "pass-through channels modified"
    err = float(jnp.max(jnp.abs(y - y_ref)))
    assert err < 1e-2, f"max |err| = {err}"
    print("KERNEL_OK")
</pallas_src>

<mosaic_0001>
module attributes {stable_mosaic.version = 11 : i64} {
  func.func @kernel(%arg0: i32, %arg1: i32, %arg2: memref<1x1x4x358xbf16, #tpu.memory_space<vmem>>, %arg3: memref<4x196xbf16, #tpu.memory_space<vmem>>, %arg4: memref<4x1xf32, #tpu.memory_space<vmem>>, %arg5: memref<7x256xbf16, #tpu.memory_space<vmem>>, %arg6: memref<1x8x256xf32, #tpu.memory_space<vmem>>, %arg7: memref<1x8x256xf32, #tpu.memory_space<vmem>>, %arg8: memref<196x256xbf16, #tpu.memory_space<vmem>>) attributes {dimension_semantics = [#tpu.dimension_semantics<parallel>, #tpu.dimension_semantics<parallel>], iteration_bounds = array<i64: 2, 1>, scalar_prefetch = 0 : i64, scratch_operands = 1 : i64, tpu.core_type = #tpu.core_type<tc>, window_params = [{transform_indices = @transform_0, window_bounds = array<i64: 1, 1, 4, 358>}, {pipeline_mode = #tpu.pipeline_mode<synchronous>, transform_indices = @transform_1, window_bounds = array<i64: 4, 196>}, {pipeline_mode = #tpu.pipeline_mode<synchronous>, transform_indices = @transform_2, window_bounds = array<i64: 4, 1>}, {pipeline_mode = #tpu.pipeline_mode<synchronous>, transform_indices = @transform_3, window_bounds = array<i64: 7, 256>}, {transform_indices = @transform_4, window_bounds = array<i64: 1, 8, 256>}, {transform_indices = @transform_5, window_bounds = array<i64: 1, 8, 256>}]} {
    %c0 = arith.constant 0 : index
    %c0_0 = arith.constant 0 : index
    %c0_1 = arith.constant 0 : index
    %c0_2 = arith.constant 0 : index
    %0 = vector.load %arg2[%c0, %c0_0, %c0_1, %c0_2] : memref<1x1x4x358xbf16, #tpu.memory_space<vmem>>, vector<1x1x4x256xbf16>
    %1 = vector.shape_cast %0 : vector<1x1x4x256xbf16> to vector<4x256xbf16>
    %c0_3 = arith.constant 0 : index
    %c0_4 = arith.constant 0 : index
    %2 = vector.load %arg5[%c0_3, %c0_4] : memref<7x256xbf16, #tpu.memory_space<vmem>>, vector<1x256xbf16>
    %3 = vector.broadcast %2 : vector<1x256xbf16> to vector<4x256xbf16>
    %4 = arith.mulf %1, %3 : vector<4x256xbf16>
    %c0_5 = arith.constant 0 : index
    %c0_6 = arith.constant 0 : index
    %5 = vector.load %arg8[%c0_5, %c0_6] : memref<196x256xbf16, #tpu.memory_space<vmem>>, vector<4x256xbf16>
    tpu.vector_store %arg8[%c0_5, %c0_6], %4 {strides = array<i32>} : memref<196x256xbf16, #tpu.memory_space<vmem>>, vector<4x256xbf16>,
    %c0_7 = arith.constant 0 : index
    %c0_8 = arith.constant 0 : index
    %c0_9 = arith.constant 0 : index
    %c1 = arith.constant 1 : index
    %6 = vector.load %arg2[%c0_7, %c0_8, %c0_9, %c1] : memref<1x1x4x358xbf16, #tpu.memory_space<vmem>>, vector<1x1x4x256xbf16>
    %7 = vector.shape_cast %6 : vector<1x1x4x256xbf16> to vector<4x256xbf16>
    %c1_10 = arith.constant 1 : index
    %c0_11 = arith.constant 0 : index
    %8 = vector.load %arg5[%c1_10, %c0_11] : memref<7x256xbf16, #tpu.memory_space<vmem>>, vector<1x256xbf16>
    %9 = vector.broadcast %8 : vector<1x256xbf16> to vector<4x256xbf16>
    %10 = arith.mulf %7, %9 : vector<4x256xbf16>
    %c4 = arith.constant 4 : index
    %c0_12 = arith.constant 0 : index
    %11 = vector.load %arg8[%c4, %c0_12] : memref<196x256xbf16, #tpu.memory_space<vmem>>, vector<4x256xbf16>
    tpu.vector_store %arg8[%c4, %c0_12], %10 {strides = array<i32>} : memref<196x256xbf16, #tpu.memory_space<vmem>>, vector<4x256xbf16>,
    %c0_13 = arith.constant 0 : index
    %c0_14 = arith.constant 0 : index
    %c0_15 = arith.constant 0 : index
    %c2 = arith.constant 2 : index
    %12 = vector.load %arg2[%c0_13, %c0_14, %c0_15, %c2] : memref<1x1x4x358xbf16, #tpu.memory_space<vmem>>, vector<1x1x4x256xbf16>
    %13 = vector.shape_cast %12 : vector<1x1x4x256xbf16> to vector<4x256xbf16>
    %c2_16 = arith.constant 2 : index
    %c0_17 = arith.constant 0 : index
    %14 = vector.load %arg5[%c2_16, %c0_17] : memref<7x256xbf16, #tpu.memory_space<vmem>>, vector<1x256xbf16>
    %15 = vector.broadcast %14 : vector<1x256xbf16> to vector<4x256xbf16>
    %16 = arith.mulf %13, %15 : vector<4x256xbf16>
    %c8 = arith.constant 8 : index
    %c0_18 = arith.constant 0 : index
    %17 = vector.load %arg8[%c8, %c0_18] : memref<196x256xbf16, #tpu.memory_space<vmem>>, vector<4x256xbf16>
    tpu.vector_store %arg8[%c8, %c0_18], %16 {strides = array<i32>} : memref<196x256xbf16, #tpu.memory_space<vmem>>, vector<4x256xbf16>,
    %c0_19 = arith.constant 0 : index
    %c0_20 = arith.constant 0 : index
    %c0_21 = arith.constant 0 : index
    %c3 = arith.constant 3 : index
    %18 = vector.load %arg2[%c0_19, %c0_20, %c0_21, %c3] : memref<1x1x4x358xbf16, #tpu.memory_space<vmem>>, vector<1x1x4x256xbf16>
    %19 = vector.shape_cast %18 : vector<1x1x4x256xbf16> to vector<4x256xbf16>
    %c3_22 = arith.constant 3 : index
    %c0_23 = arith.constant 0 : index
    %20 = vector.load %arg5[%c3_22, %c0_23] : memref<7x256xbf16, #tpu.memory_space<vmem>>, vector<1x256xbf16>
    %21 = vector.broadcast %20 : vector<1x256xbf16> to vector<4x256xbf16>
    %22 = arith.mulf %19, %21 : vector<4x256xbf16>
    %c12 = arith.constant 12 : index
    %c0_24 = arith.constant 0 : index
    %23 = vector.load %arg8[%c12, %c0_24] : memref<196x256xbf16, #tpu.memory_space<vmem>>, vector<4x256xbf16>
    tpu.vector_store %arg8[%c12, %c0_24], %22 {strides = array<i32>} : memref<196x256xbf16, #tpu.memory_space<vmem>>, vector<4x256xbf16>,
    %c0_25 = arith.constant 0 : index
    %c0_26 = arith.constant 0 : index
    %c0_27 = arith.constant 0 : index
    %c4_28 = arith.constant 4 : index
    %24 = vector.load %arg2[%c0_25, %c0_26, %c0_27, %c4_28] : memref<1x1x4x358xbf16, #tpu.memory_space<vmem>>, vector<1x1x4x256xbf16>
    %25 = vector.shape_cast %24 : vector<1x1x4x256xbf16> to vector<4x256xbf16>
    %c4_29 = arith.constant 4 : index
    %c0_30 = arith.constant 0 : index
    %26 = vector.load %arg5[%c4_29, %c0_30] : memref<7x256xbf16, #tpu.memory_space<vmem>>, vector<1x256xbf16>
    %27 = vector.broadcast %26 : vector<1x256xbf16> to vector<4x256xbf16>
    %28 = arith.mulf %25, %27 : vector<4x256xbf16>
    %c16 = arith.constant 16 : index
    %c0_31 = arith.constant 0 : index
    %29 = vector.load %arg8[%c16, %c0_31] : memref<196x256xbf16, #tpu.memory_space<vmem>>, vector<4x256xbf16>
    tpu.vector_store %arg8[%c16, %c0_31], %28 {strides = array<i32>} : memref<196x256xbf16, #tpu.memory_space<vmem>>, vector<4x256xbf16>,
    %c0_32 = arith.constant 0 : index
    %c0_33 = arith.constant 0 : index
    %c0_34 = arith.constant 0 : index
    %c5 = arith.constant 5 : index
    %30 = vector.load %arg2[%c0_32, %c0_33, %c0_34, %c5] : memref<1x1x4x358xbf16, #tpu.memory_space<vmem>>, vector<1x1x4x256xbf16>
    %31 = vector.shape_cast %30 : vector<1x1x4x256xbf16> to vector<4x256xbf16>
    %c5_35 = arith.constant 5 : index
    %c0_36 = arith.constant 0 : index
    %32 = vector.load %arg5[%c5_35, %c0_36] : memref<7x256xbf16, #tpu.memory_space<vmem>>, vector<1x256xbf16>
    %33 = vector.broadcast %32 : vector<1x256xbf16> to vector<4x256xbf16>
    %34 = arith.mulf %31, %33 : vector<4x256xbf16>
    %c20 = arith.constant 20 : index
    %c0_37 = arith.constant 0 : index
    %35 = vector.load %arg8[%c20, %c0_37] : memref<196x256xbf16, #tpu.memory_space<vmem>>, vector<4x256xbf16>
    tpu.vector_store %arg8[%c20, %c0_37], %34 {strides = array<i32>} : memref<196x256xbf16, #tpu.memory_space<vmem>>, vector<4x256xbf16>,
    %c0_38 = arith.constant 0 : index
    %c0_39 = arith.constant 0 : index
    %c0_40 = arith.constant 0 : index
    %c6 = arith.constant 6 : index
    %36 = vector.load %arg2[%c0_38, %c0_39, %c0_40, %c6] : memref<1x1x4x358xbf16, #tpu.memory_space<vmem>>, vector<1x1x4x256xbf16>
    %37 = vector.shape_cast %36 : vector<1x1x4x256xbf16> to vector<4x256xbf16>
    %c6_41 = arith.constant 6 : index
    %c0_42 = arith.constant 0 : index
    %38 = vector.load %arg5[%c6_41, %c0_42] : memref<7x256xbf16, #tpu.memory_space<vmem>>, vector<1x256xbf16>
    %39 = vector.broadcast %38 : vector<1x256xbf16> to vector<4x256xbf16>
    %40 = arith.mulf %37, %39 : vector<4x256xbf16>
    %c24 = arith.constant 24 : index
    %c0_43 = arith.constant 0 : index
    %41 = vector.load %arg8[%c24, %c0_43] : memref<196x256xbf16, #tpu.memory_space<vmem>>, vector<4x256xbf16>
    tpu.vector_store %arg8[%c24, %c0_43], %40 {strides = array<i32>} : memref<196x256xbf16, #tpu.memory_space<vmem>>, vector<4x256xbf16>,
    %c0_44 = arith.constant 0 : index
    %c0_45 = arith.constant 0 : index
    %c0_46 = arith.constant 0 : index
    %c16_47 = arith.constant 16 : index
    %42 = vector.load %arg2[%c0_44, %c0_45, %c0_46, %c16_47] : memref<1x1x4x358xbf16, #tpu.memory_space<vmem>>, vector<1x1x4x256xbf16>
    %43 = vector.shape_cast %42 : vector<1x1x4x256xbf16> to vector<4x256xbf16>
    %c0_48 = arith.constant 0 : index
    %c0_49 = arith.constant 0 : index
    %44 = vector.load %arg5[%c0_48, %c0_49] : memref<7x256xbf16, #tpu.memory_space<vmem>>, vector<1x256xbf16>
    %45 = vector.broadcast %44 : vector<1x256xbf16> to vector<4x256xbf16>
    %46 = arith.mulf %43, %45 : vector<4x256xbf16>
    %c28 = arith.constant 28 : index
    %c0_50 = arith.constant 0 : index
    %47 = vector.load %arg8[%c28, %c0_50] : memref<196x256xbf16, #tpu.memory_space<vmem>>, vector<4x256xbf16>
    tpu.vector_store %arg8[%c28, %c0_50], %46 {strides = array<i32>} : memref<196x256xbf16, #tpu.memory_space<vmem>>, vector<4x256xbf16>,
    %c0_51 = arith.constant 0 : index
    %c0_52 = arith.constant 0 : index
    %c0_53 = arith.constant 0 : index
    %c17 = arith.constant 17 : index
    %48 = vector.load %arg2[%c0_51, %c0_52, %c0_53, %c17] : memref<1x1x4x358xbf16, #tpu.memory_space<vmem>>, vector<1x1x4x256xbf16>
    %49 = vector.shape_cast %48 : vector<1x1x4x256xbf16> to vector<4x256xbf16>
    %c1_54 = arith.constant 1 : index
    %c0_55 = arith.constant 0 : index
    %50 = vector.load %arg5[%c1_54, %c0_55] : memref<7x256xbf16, #tpu.memory_space<vmem>>, vector<1x256xbf16>
    %51 = vector.broadcast %50 : vector<1x256xbf16> to vector<4x256xbf16>
    %52 = arith.mulf %49, %51 : vector<4x256xbf16>
    %c32 = arith.constant 32 : index
    %c0_56 = arith.constant 0 : index
    %53 = vector.load %arg8[%c32, %c0_56] : memref<196x256xbf16, #tpu.memory_space<vmem>>, vector<4x256xbf16>
    tpu.vector_store %arg8[%c32, %c0_56], %52 {strides = array<i32>} : memref<196x256xbf16, #tpu.memory_space<vmem>>, vector<4x256xbf16>,
    %c0_57 = arith.constant 0 : index
    %c0_58 = arith.constant 0 : index
    %c0_59 = arith.constant 0 : index
    %c18 = arith.constant 18 : index
    %54 = vector.load %arg2[%c0_57, %c0_58, %c0_59, %c18] : memref<1x1x4x358xbf16, #tpu.memory_space<vmem>>, vector<1x1x4x256xbf16>
    %55 = vector.shape_cast %54 : vector<1x1x4x256xbf16> to vector<4x256xbf16>
    %c2_60 = arith.constant 2 : index
    %c0_61 = arith.constant 0 : index
    %56 = vector.load %arg5[%c2_60, %c0_61] : memref<7x256xbf16, #tpu.memory_space<vmem>>, vector<1x256xbf16>
    %57 = vector.broadcast %56 : vector<1x256xbf16> to vector<4x256xbf16>
    %58 = arith.mulf %55, %57 : vector<4x256xbf16>
    %c36 = arith.constant 36 : index
    %c0_62 = arith.constant 0 : index
    %59 = vector.load %arg8[%c36, %c0_62] : memref<196x256xbf16, #tpu.memory_space<vmem>>, vector<4x256xbf16>
    tpu.vector_store %arg8[%c36, %c0_62], %58 {strides = array<i32>} : memref<196x256xbf16, #tpu.memory_space<vmem>>, vector<4x256xbf16>,
    %c0_63 = arith.constant 0 : index
    %c0_64 = arith.constant 0 : index
    %c0_65 = arith.constant 0 : index
    %c19 = arith.constant 19 : index
    %60 = vector.load %arg2[%c0_63, %c0_64, %c0_65, %c19] : memref<1x1x4x358xbf16, #tpu.memory_space<vmem>>, vector<1x1x4x256xbf16>
    %61 = vector.shape_cast %60 : vector<1x1x4x256xbf16> to vector<4x256xbf16>
    %c3_66 = arith.constant 3 : index
    %c0_67 = arith.constant 0 : index
    %62 = vector.load %arg5[%c3_66, %c0_67] : memref<7x256xbf16, #tpu.memory_space<vmem>>, vector<1x256xbf16>
    %63 = vector.broadcast %62 : vector<1x256xbf16> to vector<4x256xbf16>
    %64 = arith.mulf %61, %63 : vector<4x256xbf16>
    %c40 = arith.constant 40 : index
    %c0_68 = arith.constant 0 : index
    %65 = vector.load %arg8[%c40, %c0_68] : memref<196x256xbf16, #tpu.memory_space<vmem>>, vector<4x256xbf16>
    tpu.vector_store %arg8[%c40, %c0_68], %64 {strides = array<i32>} : memref<196x256xbf16, #tpu.memory_space<vmem>>, vector<4x256xbf16>,
    %c0_69 = arith.constant 0 : index
    %c0_70 = arith.constant 0 : index
    %c0_71 = arith.constant 0 : index
    %c20_72 = arith.constant 20 : index
    %66 = vector.load %arg2[%c0_69, %c0_70, %c0_71, %c20_72] : memref<1x1x4x358xbf16, #tpu.memory_space<vmem>>, vector<1x1x4x256xbf16>
    %67 = vector.shape_cast %66 : vector<1x1x4x256xbf16> to vector<4x256xbf16>
    %c4_73 = arith.constant 4 : index
    %c0_74 = arith.constant 0 : index
    %68 = vector.load %arg5[%c4_73, %c0_74] : memref<7x256xbf16, #tpu.memory_space<vmem>>, vector<1x256xbf16>
    %69 = vector.broadcast %68 : vector<1x256xbf16> to vector<4x256xbf16>
    %70 = arith.mulf %67, %69 : vector<4x256xbf16>
    %c44 = arith.constant 44 : index
    %c0_75 = arith.constant 0 : index
    %71 = vector.load %arg8[%c44, %c0_75] : memref<196x256xbf16, #tpu.memory_space<vmem>>, vector<4x256xbf16>
    tpu.vector_store %arg8[%c44, %c0_75], %70 {strides = array<i32>} : memref<196x256xbf16, #tpu.memory_space<vmem>>, vector<4x256xbf16>,
    %c0_76 = arith.constant 0 : index
    %c0_77 = arith.constant 0 : index
    %c0_78 = arith.constant 0 : index
    %c21 = arith.constant 21 : index
    %72 = vector.load %arg2[%c0_76, %c0_77, %c0_78, %c21] : memref<1x1x4x358xbf16, #tpu.memory_space<vmem>>, vector<1x1x4x256xbf16>
    %73 = vector.shape_cast %72 : vector<1x1x4x256xbf16> to vector<4x256xbf16>
    %c5_79 = arith.constant 5 : index
    %c0_80 = arith.constant 0 : index
    %74 = vector.load %arg5[%c5_79, %c0_80] : memref<7x256xbf16, #tpu.memory_space<vmem>>, vector<1x256xbf16>
    %75 = vector.broadcast %74 : vector<1x256xbf16> to vector<4x256xbf16>
    %76 = arith.mulf %73, %75 : vector<4x256xbf16>
    %c48 = arith.constant 48 : index
    %c0_81 = arith.constant 0 : index
    %77 = vector.load %arg8[%c48, %c0_81] : memref<196x256xbf16, #tpu.memory_space<vmem>>, vector<4x256xbf16>
    tpu.vector_store %arg8[%c48, %c0_81], %76 {strides = array<i32>} : memref<196x256xbf16, #tpu.memory_space<vmem>>, vector<4x256xbf16>,
    %c0_82 = arith.constant 0 : index
    %c0_83 = arith.constant 0 : index
    %c0_84 = arith.constant 0 : index
    %c22 = arith.constant 22 : index
    %78 = vector.load %arg2[%c0_82, %c0_83, %c0_84, %c22] : memref<1x1x4x358xbf16, #tpu.memory_space<vmem>>, vector<1x1x4x256xbf16>
    %79 = vector.shape_cast %78 : vector<1x1x4x256xbf16> to vector<4x256xbf16>
    %c6_85 = arith.constant 6 : index
    %c0_86 = arith.constant 0 : index
    %80 = vector.load %arg5[%c6_85, %c0_86] : memref<7x256xbf16, #tpu.memory_space<vmem>>, vector<1x256xbf16>
    %81 = vector.broadcast %80 : vector<1x256xbf16> to vector<4x256xbf16>
    %82 = arith.mulf %79, %81 : vector<4x256xbf16>
    %c52 = arith.constant 52 : index
    %c0_87 = arith.constant 0 : index
    %83 = vector.load %arg8[%c52, %c0_87] : memref<196x256xbf16, #tpu.memory_space<vmem>>, vector<4x256xbf16>
    tpu.vector_store %arg8[%c52, %c0_87], %82 {strides = array<i32>} : memref<196x256xbf16, #tpu.memory_space<vmem>>, vector<4x256xbf16>,
    %c0_88 = arith.constant 0 : index
    %c0_89 = arith.constant 0 : index
    %c0_90 = arith.constant 0 : index
    %c32_91 = arith.constant 32 : index
    %84 = vector.load %arg2[%c0_88, %c0_89, %c0_90, %c32_91] : memref<1x1x4x358xbf16, #tpu.memory_space<vmem>>, vector<1x1x4x256xbf16>
    %85 = vector.shape_cast %84 : vector<1x1x4x256xbf16> to vector<4x256xbf16>
    %c0_92 = arith.constant 0 : index
    %c0_93 = arith.constant 0 : index
    %86 = vector.load %arg5[%c0_92, %c0_93] : memref<7x256xbf16, #tpu.memory_space<vmem>>, vector<1x256xbf16>
    %87 = vector.broadcast %86 : vector<1x256xbf16> to vector<4x256xbf16>
    %88 = arith.mulf %85, %87 : vector<4x256xbf16>
    %c56 = arith.constant 56 : index
    %c0_94 = arith.constant 0 : index
    %89 = vector.load %arg8[%c56, %c0_94] : memref<196x256xbf16, #tpu.memory_space<vmem>>, vector<4x256xbf16>
    tpu.vector_store %arg8[%c56, %c0_94], %88 {strides = array<i32>} : memref<196x256xbf16, #tpu.memory_space<vmem>>, vector<4x256xbf16>,
    %c0_95 = arith.constant 0 : index
    %c0_96 = arith.constant 0 : index
    %c0_97 = arith.constant 0 : index
    %c33 = arith.constant 33 : index
    %90 = vector.load %arg2[%c0_95, %c0_96, %c0_97, %c33] : memref<1x1x4x358xbf16, #tpu.memory_space<vmem>>, vector<1x1x4x256xbf16>
    %91 = vector.shape_cast %90 : vector<1x1x4x256xbf16> to vector<4x256xbf16>
    %c1_98 = arith.constant 1 : index
    %c0_99 = arith.constant 0 : index
    %92 = vector.load %arg5[%c1_98, %c0_99] : memref<7x256xbf16, #tpu.memory_space<vmem>>, vector<1x256xbf16>
    %93 = vector.broadcast %92 : vector<1x256xbf16> to vector<4x256xbf16>
    %94 = arith.mulf %91, %93 : vector<4x256xbf16>
    %c60 = arith.constant 60 : index
    %c0_100 = arith.constant 0 : index
    %95 = vector.load %arg8[%c60, %c0_100] : memref<196x256xbf16, #tpu.memory_space<vmem>>, vector<4x256xbf16>
    tpu.vector_store %arg8[%c60, %c0_100], %94 {strides = array<i32>} : memref<196x256xbf16, #tpu.memory_space<vmem>>, vector<4x256xbf16>,
    %c0_101 = arith.constant 0 : index
    %c0_102 = arith.constant 0 : index
    %c0_103 = arith.constant 0 : index
    %c34 = arith.constant 34 : index
    %96 = vector.load %arg2[%c0_101, %c0_102, %c0_103, %c34] : memref<1x1x4x358xbf16, #tpu.memory_space<vmem>>, vector<1x1x4x256xbf16>
    %97 = vector.shape_cast %96 : vector<1x1x4x256xbf16> to vector<4x256xbf16>
    %c2_104 = arith.constant 2 : index
    %c0_105 = arith.constant 0 : index
    %98 = vector.load %arg5[%c2_104, %c0_105] : memref<7x256xbf16, #tpu.memory_space<vmem>>, vector<1x256xbf16>
    %99 = vector.broadcast %98 : vector<1x256xbf16> to vector<4x256xbf16>
    %100 = arith.mulf %97, %99 : vector<4x256xbf16>
    %c64 = arith.constant 64 : index
    %c0_106 = arith.constant 0 : index
    %101 = vector.load %arg8[%c64, %c0_106] : memref<196x256xbf16, #tpu.memory_space<vmem>>, vector<4x256xbf16>
    tpu.vector_store %arg8[%c64, %c0_106], %100 {strides = array<i32>} : memref<196x256xbf16, #tpu.memory_space<vmem>>, vector<4x256xbf16>,
    %c0_107 = arith.constant 0 : index
    %c0_108 = arith.constant 0 : index
    %c0_109 = arith.constant 0 : index
    %c35 = arith.constant 35 : index
    %102 = vector.load %arg2[%c0_107, %c0_108, %c0_109, %c35] : memref<1x1x4x358xbf16, #tpu.memory_space<vmem>>, vector<1x1x4x256xbf16>
    %103 = vector.shape_cast %102 : vector<1x1x4x256xbf16> to vector<4x256xbf16>
    %c3_110 = arith.constant 3 : index
    %c0_111 = arith.constant 0 : index
    %104 = vector.load %arg5[%c3_110, %c0_111] : memref<7x256xbf16, #tpu.memory_space<vmem>>, vector<1x256xbf16>
    %105 = vector.broadcast %104 : vector<1x256xbf16> to vector<4x256xbf16>
    %106 = arith.mulf %103, %105 : vector<4x256xbf16>
    %c68 = arith.constant 68 : index
    %c0_112 = arith.constant 0 : index
    %107 = vector.load %arg8[%c68, %c0_112] : memref<196x256xbf16, #tpu.memory_space<vmem>>, vector<4x256xbf16>
    tpu.vector_store %arg8[%c68, %c0_112], %106 {strides = array<i32>} : memref<196x256xbf16, #tpu.memory_space<vmem>>, vector<4x256xbf16>,
    %c0_113 = arith.constant 0 : index
    %c0_114 = arith.constant 0 : index
    %c0_115 = arith.constant 0 : index
    %c36_116 = arith.constant 36 : index
    %108 = vector.load %arg2[%c0_113, %c0_114, %c0_115, %c36_116] : memref<1x1x4x358xbf16, #tpu.memory_space<vmem>>, vector<1x1x4x256xbf16>
    %109 = vector.shape_cast %108 : vector<1x1x4x256xbf16> to vector<4x256xbf16>
    %c4_117 = arith.constant 4 : index
    %c0_118 = arith.constant 0 : index
    %110 = vector.load %arg5[%c4_117, %c0_118] : memref<7x256xbf16, #tpu.memory_space<vmem>>, vector<1x256xbf16>
    %111 = vector.broadcast %110 : vector<1x256xbf16> to vector<4x256xbf16>
    %112 = arith.mulf %109, %111 : vector<4x256xbf16>
    %c72 = arith.constant 72 : index
    %c0_119 = arith.constant 0 : index
    %113 = vector.load %arg8[%c72, %c0_119] : memref<196x256xbf16, #tpu.memory_space<vmem>>, vector<4x256xbf16>
    tpu.vector_store %arg8[%c72, %c0_119], %112 {strides = array<i32>} : memref<196x256xbf16, #tpu.memory_space<vmem>>, vector<4x256xbf16>,
    %c0_120 = arith.constant 0 : index
    %c0_121 = arith.constant 0 : index
    %c0_122 = arith.constant 0 : index
    %c37 = arith.constant 37 : index
    %114 = vector.load %arg2[%c0_120, %c0_121, %c0_122, %c37] : memref<1x1x4x358xbf16, #tpu.memory_space<vmem>>, vector<1x1x4x256xbf16>
    %115 = vector.shape_cast %114 : vector<1x1x4x256xbf16> to vector<4x256xbf16>
    %c5_123 = arith.constant 5 : index
    %c0_124 = arith.constant 0 : index
    %116 = vector.load %arg5[%c5_123, %c0_124] : memref<7x256xbf16, #tpu.memory_space<vmem>>, vector<1x256xbf16>
    %117 = vector.broadcast %116 : vector<1x256xbf16> to vector<4x256xbf16>
    %118 = arith.mulf %115, %117 : vector<4x256xbf16>
    %c76 = arith.constant 76 : index
    %c0_125 = arith.constant 0 : index
    %119 = vector.load %arg8[%c76, %c0_125] : memref<196x256xbf16, #tpu.memory_space<vmem>>, vector<4x256xbf16>
    tpu.vector_store %arg8[%c76, %c0_125], %118 {strides = array<i32>} : memref<196x256xbf16, #tpu.memory_space<vmem>>, vector<4x256xbf16>,
    %c0_126 = arith.constant 0 : index
    %c0_127 = arith.constant 0 : index
    %c0_128 = arith.constant 0 : index
    %c38 = arith.constant 38 : index
    %120 = vector.load %arg2[%c0_126, %c0_127, %c0_128, %c38] : memref<1x1x4x358xbf16, #tpu.memory_space<vmem>>, vector<1x1x4x256xbf16>
    %121 = vector.shape_cast %120 : vector<1x1x4x256xbf16> to vector<4x256xbf16>
    %c6_129 = arith.constant 6 : index
    %c0_130 = arith.constant 0 : index
    %122 = vector.load %arg5[%c6_129, %c0_130] : memref<7x256xbf16, #tpu.memory_space<vmem>>, vector<1x256xbf16>
    %123 = vector.broadcast %122 : vector<1x256xbf16> to vector<4x256xbf16>
    %124 = arith.mulf %121, %123 : vector<4x256xbf16>
    %c80 = arith.constant 80 : index
    %c0_131 = arith.constant 0 : index
    %125 = vector.load %arg8[%c80, %c0_131] : memref<196x256xbf16, #tpu.memory_space<vmem>>, vector<4x256xbf16>
    tpu.vector_store %arg8[%c80, %c0_131], %124 {strides = array<i32>} : memref<196x256xbf16, #tpu.memory_space<vmem>>, vector<4x256xbf16>,
    %c0_132 = arith.constant 0 : index
    %c0_133 = arith.constant 0 : index
    %c0_134 = arith.constant 0 : index
    %c48_135 = arith.constant 48 : index
    %126 = vector.load %arg2[%c0_132, %c0_133, %c0_134, %c48_135] : memref<1x1x4x358xbf16, #tpu.memory_space<vmem>>, vector<1x1x4x256xbf16>
    %127 = vector.shape_cast %126 : vector<1x1x4x256xbf16> to vector<4x256xbf16>
    %c0_136 = arith.constant 0 : index
    %c0_137 = arith.constant 0 : index
    %128 = vector.load %arg5[%c0_136, %c0_137] : memref<7x256xbf16, #tpu.memory_space<vmem>>, vector<1x256xbf16>
    %129 = vector.broadcast %128 : vector<1x256xbf16> to vector<4x256xbf16>
    %130 = arith.mulf %127, %129 : vector<4x256xbf16>
    %c84 = arith.constant 84 : index
    %c0_138 = arith.constant 0 : index
    %131 = vector.load %arg8[%c84, %c0_138] : memref<196x256xbf16, #tpu.memory_space<vmem>>, vector<4x256xbf16>
    tpu.vector_store %arg8[%c84, %c0_138], %130 {strides = array<i32>} : memref<196x256xbf16, #tpu.memory_space<vmem>>, vector<4x256xbf16>,
    %c0_139 = arith.constant 0 : index
    %c0_140 = arith.constant 0 : index
    %c0_141 = arith.constant 0 : index
    %c49 = arith.constant 49 : index
    %132 = vector.load %arg2[%c0_139, %c0_140, %c0_141, %c49] : memref<1x1x4x358xbf16, #tpu.memory_space<vmem>>, vector<1x1x4x256xbf16>
    %133 = vector.shape_cast %132 : vector<1x1x4x256xbf16> to vector<4x256xbf16>
    %c1_142 = arith.constant 1 : index
    %c0_143 = arith.constant 0 : index
    %134 = vector.load %arg5[%c1_142, %c0_143] : memref<7x256xbf16, #tpu.memory_space<vmem>>, vector<1x256xbf16>
    %135 = vector.broadcast %134 : vector<1x256xbf16> to vector<4x256xbf16>
    %136 = arith.mulf %133, %135 : vector<4x256xbf16>
    %c88 = arith.constant 88 : index
    %c0_144 = arith.constant 0 : index
    %137 = vector.load %arg8[%c88, %c0_144] : memref<196x256xbf16, #tpu.memory_space<vmem>>, vector<4x256xbf16>
    tpu.vector_store %arg8[%c88, %c0_144], %136 {strides = array<i32>} : memref<196x256xbf16, #tpu.memory_space<vmem>>, vector<4x256xbf16>,
    %c0_145 = arith.constant 0 : index
    %c0_146 = arith.constant 0 : index
    %c0_147 = arith.constant 0 : index
    %c50 = arith.constant 50 : index
    %138 = vector.load %arg2[%c0_145, %c0_146, %c0_147, %c50] : memref<1x1x4x358xbf16, #tpu.memory_space<vmem>>, vector<1x1x4x256xbf16>
    %139 = vector.shape_cast %138 : vector<1x1x4x256xbf16> to vector<4x256xbf16>
    %c2_148 = arith.constant 2 : index
    %c0_149 = arith.constant 0 : index
    %140 = vector.load %arg5[%c2_148, %c0_149] : memref<7x256xbf16, #tpu.memory_space<vmem>>, vector<1x256xbf16>
    %141 = vector.broadcast %140 : vector<1x256xbf16> to vector<4x256xbf16>
    %142 = arith.mulf %139, %141 : vector<4x256xbf16>
    %c92 = arith.constant 92 : index
    %c0_150 = arith.constant 0 : index
    %143 = vector.load %arg8[%c92, %c0_150] : memref<196x256xbf16, #tpu.memory_space<vmem>>, vector<4x256xbf16>
    tpu.vector_store %arg8[%c92, %c0_150], %142 {strides = array<i32>} : memref<196x256xbf16, #tpu.memory_space<vmem>>, vector<4x256xbf16>,
    %c0_151 = arith.constant 0 : index
    %c0_152 = arith.constant 0 : index
    %c0_153 = arith.constant 0 : index
    %c51 = arith.constant 51 : index
    %144 = vector.load %arg2[%c0_151, %c0_152, %c0_153, %c51] : memref<1x1x4x358xbf16, #tpu.memory_space<vmem>>, vector<1x1x4x256xbf16>
    %145 = vector.shape_cast %144 : vector<1x1x4x256xbf16> to vector<4x256xbf16>
    %c3_154 = arith.constant 3 : index
    %c0_155 = arith.constant 0 : index
    %146 = vector.load %arg5[%c3_154, %c0_155] : memref<7x256xbf16, #tpu.memory_space<vmem>>, vector<1x256xbf16>
    %147 = vector.broadcast %146 : vector<1x256xbf16> to vector<4x256xbf16>
    %148 = arith.mulf %145, %147 : vector<4x256xbf16>
    %c96 = arith.constant 96 : index
    %c0_156 = arith.constant 0 : index
    %149 = vector.load %arg8[%c96, %c0_156] : memref<196x256xbf16, #tpu.memory_space<vmem>>, vector<4x256xbf16>
    tpu.vector_store %arg8[%c96, %c0_156], %148 {strides = array<i32>} : memref<196x256xbf16, #tpu.memory_space<vmem>>, vector<4x256xbf16>,
    %c0_157 = arith.constant 0 : index
    %c0_158 = arith.constant 0 : index
    %c0_159 = arith.constant 0 : index
    %c52_160 = arith.constant 52 : index
    %150 = vector.load %arg2[%c0_157, %c0_158, %c0_159, %c52_160] : memref<1x1x4x358xbf16, #tpu.memory_space<vmem>>, vector<1x1x4x256xbf16>
    %151 = vector.shape_cast %150 : vector<1x1x4x256xbf16> to vector<4x256xbf16>
    %c4_161 = arith.constant 4 : index
    %c0_162 = arith.constant 0 : index
    %152 = vector.load %arg5[%c4_161, %c0_162] : memref<7x256xbf16, #tpu.memory_space<vmem>>, vector<1x256xbf16>
    %153 = vector.broadcast %152 : vector<1x256xbf16> to vector<4x256xbf16>
    %154 = arith.mulf %151, %153 : vector<4x256xbf16>
    %c100 = arith.constant 100 : index
    %c0_163 = arith.constant 0 : index
    %155 = vector.load %arg8[%c100, %c0_163] : memref<196x256xbf16, #tpu.memory_space<vmem>>, vector<4x256xbf16>
    tpu.vector_store %arg8[%c100, %c0_163], %154 {strides = array<i32>} : memref<196x256xbf16, #tpu.memory_space<vmem>>, vector<4x256xbf16>,
    %c0_164 = arith.constant 0 : index
    %c0_165 = arith.constant 0 : index
    %c0_166 = arith.constant 0 : index
    %c53 = arith.constant 53 : index
    %156 = vector.load %arg2[%c0_164, %c0_165, %c0_166, %c53] : memref<1x1x4x358xbf16, #tpu.memory_space<vmem>>, vector<1x1x4x256xbf16>
    %157 = vector.shape_cast %156 : vector<1x1x4x256xbf16> to vector<4x256xbf16>
    %c5_167 = arith.constant 5 : index
    %c0_168 = arith.constant 0 : index
    %158 = vector.load %arg5[%c5_167, %c0_168] : memref<7x256xbf16, #tpu.memory_space<vmem>>, vector<1x256xbf16>
    %159 = vector.broadcast %158 : vector<1x256xbf16> to vector<4x256xbf16>
    %160 = arith.mulf %157, %159 : vector<4x256xbf16>
    %c104 = arith.constant 104 : index
    %c0_169 = arith.constant 0 : index
    %161 = vector.load %arg8[%c104, %c0_169] : memref<196x256xbf16, #tpu.memory_space<vmem>>, vector<4x256xbf16>
    tpu.vector_store %arg8[%c104, %c0_169], %160 {strides = array<i32>} : memref<196x256xbf16, #tpu.memory_space<vmem>>, vector<4x256xbf16>,
    %c0_170 = arith.constant 0 : index
    %c0_171 = arith.constant 0 : index
    %c0_172 = arith.constant 0 : index
    %c54 = arith.constant 54 : index
    %162 = vector.load %arg2[%c0_170, %c0_171, %c0_172, %c54] : memref<1x1x4x358xbf16, #tpu.memory_space<vmem>>, vector<1x1x4x256xbf16>
    %163 = vector.shape_cast %162 : vector<1x1x4x256xbf16> to vector<4x256xbf16>
    %c6_173 = arith.constant 6 : index
    %c0_174 = arith.constant 0 : index
    %164 = vector.load %arg5[%c6_173, %c0_174] : memref<7x256xbf16, #tpu.memory_space<vmem>>, vector<1x256xbf16>
    %165 = vector.broadcast %164 : vector<1x256xbf16> to vector<4x256xbf16>
    %166 = arith.mulf %163, %165 : vector<4x256xbf16>
    %c108 = arith.constant 108 : index
    %c0_175 = arith.constant 0 : index
    %167 = vector.load %arg8[%c108, %c0_175] : memref<196x256xbf16, #tpu.memory_space<vmem>>, vector<4x256xbf16>
    tpu.vector_store %arg8[%c108, %c0_175], %166 {strides = array<i32>} : memref<196x256xbf16, #tpu.memory_space<vmem>>, vector<4x256xbf16>,
    %c0_176 = arith.constant 0 : index
    %c0_177 = arith.constant 0 : index
    %c0_178 = arith.constant 0 : index
    %c64_179 = arith.constant 64 : index
    %168 = vector.load %arg2[%c0_176, %c0_177, %c0_178, %c64_179] : memref<1x1x4x358xbf16, #tpu.memory_space<vmem>>, vector<1x1x4x256xbf16>
    %169 = vector.shape_cast %168 : vector<1x1x4x256xbf16> to vector<4x256xbf16>
    %c0_180 = arith.constant 0 : index
    %c0_181 = arith.constant 0 : index
    %170 = vector.load %arg5[%c0_180, %c0_181] : memref<7x256xbf16, #tpu.memory_space<vmem>>, vector<1x256xbf16>
    %171 = vector.broadcast %170 : vector<1x256xbf16> to vector<4x256xbf16>
    %172 = arith.mulf %169, %171 : vector<4x256xbf16>
    %c112 = arith.constant 112 : index
    %c0_182 = arith.constant 0 : index
    %173 = vector.load %arg8[%c112, %c0_182] : memref<196x256xbf16, #tpu.memory_space<vmem>>, vector<4x256xbf16>
    tpu.vector_store %arg8[%c112, %c0_182], %172 {strides = array<i32>} : memref<196x256xbf16, #tpu.memory_space<vmem>>, vector<4x256xbf16>,
    %c0_183 = arith.constant 0 : index
    %c0_184 = arith.constant 0 : index
    %c0_185 = arith.constant 0 : index
    %c65 = arith.constant 65 : index
    %174 = vector.load %arg2[%c0_183, %c0_184, %c0_185, %c65] : memref<1x1x4x358xbf16, #tpu.memory_space<vmem>>, vector<1x1x4x256xbf16>
    %175 = vector.shape_cast %174 : vector<1x1x4x256xbf16> to vector<4x256xbf16>
    %c1_186 = arith.constant 1 : index
    %c0_187 = arith.constant 0 : index
    %176 = vector.load %arg5[%c1_186, %c0_187] : memref<7x256xbf16, #tpu.memory_space<vmem>>, vector<1x256xbf16>
    %177 = vector.broadcast %176 : vector<1x256xbf16> to vector<4x256xbf16>
    %178 = arith.mulf %175, %177 : vector<4x256xbf16>
    %c116 = arith.constant 116 : index
    %c0_188 = arith.constant 0 : index
    %179 = vector.load %arg8[%c116, %c0_188] : memref<196x256xbf16, #tpu.memory_space<vmem>>, vector<4x256xbf16>
    tpu.vector_store %arg8[%c116, %c0_188], %178 {strides = array<i32>} : memref<196x256xbf16, #tpu.memory_space<vmem>>, vector<4x256xbf16>,
    %c0_189 = arith.constant 0 : index
    %c0_190 = arith.constant 0 : index
    %c0_191 = arith.constant 0 : index
    %c66 = arith.constant 66 : index
    %180 = vector.load %arg2[%c0_189, %c0_190, %c0_191, %c66] : memref<1x1x4x358xbf16, #tpu.memory_space<vmem>>, vector<1x1x4x256xbf16>
    %181 = vector.shape_cast %180 : vector<1x1x4x256xbf16> to vector<4x256xbf16>
    %c2_192 = arith.constant 2 : index
    %c0_193 = arith.constant 0 : index
    %182 = vector.load %arg5[%c2_192, %c0_193] : memref<7x256xbf16, #tpu.memory_space<vmem>>, vector<1x256xbf16>
    %183 = vector.broadcast %182 : vector<1x256xbf16> to vector<4x256xbf16>
    %184 = arith.mulf %181, %183 : vector<4x256xbf16>
    %c120 = arith.constant 120 : index
    %c0_194 = arith.constant 0 : index
    %185 = vector.load %arg8[%c120, %c0_194] : memref<196x256xbf16, #tpu.memory_space<vmem>>, vector<4x256xbf16>
    tpu.vector_store %arg8[%c120, %c0_194], %184 {strides = array<i32>} : memref<196x256xbf16, #tpu.memory_space<vmem>>, vector<4x256xbf16>,
    %c0_195 = arith.constant 0 : index
    %c0_196 = arith.constant 0 : index
    %c0_197 = arith.constant 0 : index
    %c67 = arith.constant 67 : index
    %186 = vector.load %arg2[%c0_195, %c0_196, %c0_197, %c67] : memref<1x1x4x358xbf16, #tpu.memory_space<vmem>>, vector<1x1x4x256xbf16>
    %187 = vector.shape_cast %186 : vector<1x1x4x256xbf16> to vector<4x256xbf16>
    %c3_198 = arith.constant 3 : index
    %c0_199 = arith.constant 0 : index
    %188 = vector.load %arg5[%c3_198, %c0_199] : memref<7x256xbf16, #tpu.memory_space<vmem>>, vector<1x256xbf16>
    %189 = vector.broadcast %188 : vector<1x256xbf16> to vector<4x256xbf16>
    %190 = arith.mulf %187, %189 : vector<4x256xbf16>
    %c124 = arith.constant 124 : index
    %c0_200 = arith.constant 0 : index
    %191 = vector.load %arg8[%c124, %c0_200] : memref<196x256xbf16, #tpu.memory_space<vmem>>, vector<4x256xbf16>
    tpu.vector_store %arg8[%c124, %c0_200], %190 {strides = array<i32>} : memref<196x256xbf16, #tpu.memory_space<vmem>>, vector<4x256xbf16>,
    %c0_201 = arith.constant 0 : index
    %c0_202 = arith.constant 0 : index
    %c0_203 = arith.constant 0 : index
    %c68_204 = arith.constant 68 : index
    %192 = vector.load %arg2[%c0_201, %c0_202, %c0_203, %c68_204] : memref<1x1x4x358xbf16, #tpu.memory_space<vmem>>, vector<1x1x4x256xbf16>
    %193 = vector.shape_cast %192 : vector<1x1x4x256xbf16> to vector<4x256xbf16>
    %c4_205 = arith.constant 4 : index
    %c0_206 = arith.constant 0 : index
    %194 = vector.load %arg5[%c4_205, %c0_206] : memref<7x256xbf16, #tpu.memory_space<vmem>>, vector<1x256xbf16>
    %195 = vector.broadcast %194 : vector<1x256xbf16> to vector<4x256xbf16>
    %196 = arith.mulf %193, %195 : vector<4x256xbf16>
    %c128 = arith.constant 128 : index
    %c0_207 = arith.constant 0 : index
    %197 = vector.load %arg8[%c128, %c0_207] : memref<196x256xbf16, #tpu.memory_space<vmem>>, vector<4x256xbf16>
    tpu.vector_store %arg8[%c128, %c0_207], %196 {strides = array<i32>} : memref<196x256xbf16, #tpu.memory_space<vmem>>, vector<4x256xbf16>,
    %c0_208 = arith.constant 0 : index
    %c0_209 = arith.constant 0 : index
    %c0_210 = arith.constant 0 : index
    %c69 = arith.constant 69 : index
    %198 = vector.load %arg2[%c0_208, %c0_209, %c0_210, %c69] : memref<1x1x4x358xbf16, #tpu.memory_space<vmem>>, vector<1x1x4x256xbf16>
    %199 = vector.shape_cast %198 : vector<1x1x4x256xbf16> to vector<4x256xbf16>
    %c5_211 = arith.constant 5 : index
    %c0_212 = arith.constant 0 : index
    %200 = vector.load %arg5[%c5_211, %c0_212] : memref<7x256xbf16, #tpu.memory_space<vmem>>, vector<1x256xbf16>
    %201 = vector.broadcast %200 : vector<1x256xbf16> to vector<4x256xbf16>
    %202 = arith.mulf %199, %201 : vector<4x256xbf16>
    %c132 = arith.constant 132 : index
    %c0_213 = arith.constant 0 : index
    %203 = vector.load %arg8[%c132, %c0_213] : memref<196x256xbf16, #tpu.memory_space<vmem>>, vector<4x256xbf16>
    tpu.vector_store %arg8[%c132, %c0_213], %202 {strides = array<i32>} : memref<196x256xbf16, #tpu.memory_space<vmem>>, vector<4x256xbf16>,
    %c0_214 = arith.constant 0 : index
    %c0_215 = arith.constant 0 : index
    %c0_216 = arith.constant 0 : index
    %c70 = arith.constant 70 : index
    %204 = vector.load %arg2[%c0_214, %c0_215, %c0_216, %c70] : memref<1x1x4x358xbf16, #tpu.memory_space<vmem>>, vector<1x1x4x256xbf16>
    %205 = vector.shape_cast %204 : vector<1x1x4x256xbf16> to vector<4x256xbf16>
    %c6_217 = arith.constant 6 : index
    %c0_218 = arith.constant 0 : index
    %206 = vector.load %arg5[%c6_217, %c0_218] : memref<7x256xbf16, #tpu.memory_space<vmem>>, vector<1x256xbf16>
    %207 = vector.broadcast %206 : vector<1x256xbf16> to vector<4x256xbf16>
    %208 = arith.mulf %205, %207 : vector<4x256xbf16>
    %c136 = arith.constant 136 : index
    %c0_219 = arith.constant 0 : index
    %209 = vector.load %arg8[%c136, %c0_219] : memref<196x256xbf16, #tpu.memory_space<vmem>>, vector<4x256xbf16>
    tpu.vector_store %arg8[%c136, %c0_219], %208 {strides = array<i32>} : memref<196x256xbf16, #tpu.memory_space<vmem>>, vector<4x256xbf16>,
    %c0_220 = arith.constant 0 : index
    %c0_221 = arith.constant 0 : index
    %c0_222 = arith.constant 0 : index
    %c80_223 = arith.constant 80 : index
    %210 = vector.load %arg2[%c0_220, %c0_221, %c0_222, %c80_223] : memref<1x1x4x358xbf16, #tpu.memory_space<vmem>>, vector<1x1x4x256xbf16>
    %211 = vector.shape_cast %210 : vector<1x1x4x256xbf16> to vector<4x256xbf16>
    %c0_224 = arith.constant 0 : index
    %c0_225 = arith.constant 0 : index
    %212 = vector.load %arg5[%c0_224, %c0_225] : memref<7x256xbf16, #tpu.memory_space<vmem>>, vector<1x256xbf16>
    %213 = vector.broadcast %212 : vector<1x256xbf16> to vector<4x256xbf16>
    %214 = arith.mulf %211, %213 : vector<4x256xbf16>
    %c140 = arith.constant 140 : index
    %c0_226 = arith.constant 0 : index
    %215 = vector.load %arg8[%c140, %c0_226] : memref<196x256xbf16, #tpu.memory_space<vmem>>, vector<4x256xbf16>
    tpu.vector_store %arg8[%c140, %c0_226], %214 {strides = array<i32>} : memref<196x256xbf16, #tpu.memory_space<vmem>>, vector<4x256xbf16>,
    %c0_227 = arith.constant 0 : index
    %c0_228 = arith.constant 0 : index
    %c0_229 = arith.constant 0 : index
    %c81 = arith.constant 81 : index
    %216 = vector.load %arg2[%c0_227, %c0_228, %c0_229, %c81] : memref<1x1x4x358xbf16, #tpu.memory_space<vmem>>, vector<1x1x4x256xbf16>
    %217 = vector.shape_cast %216 : vector<1x1x4x256xbf16> to vector<4x256xbf16>
    %c1_230 = arith.constant 1 : index
    %c0_231 = arith.constant 0 : index
    %218 = vector.load %arg5[%c1_230, %c0_231] : memref<7x256xbf16, #tpu.memory_space<vmem>>, vector<1x256xbf16>
    %219 = vector.broadcast %218 : vector<1x256xbf16> to vector<4x256xbf16>
    %220 = arith.mulf %217, %219 : vector<4x256xbf16>
    %c144 = arith.constant 144 : index
    %c0_232 = arith.constant 0 : index
    %221 = vector.load %arg8[%c144, %c0_232] : memref<196x256xbf16, #tpu.memory_space<vmem>>, vector<4x256xbf16>
    tpu.vector_store %arg8[%c144, %c0_232], %220 {strides = array<i32>} : memref<196x256xbf16, #tpu.memory_space<vmem>>, vector<4x256xbf16>,
    %c0_233 = arith.constant 0 : index
    %c0_234 = arith.constant 0 : index
    %c0_235 = arith.constant 0 : index
    %c82 = arith.constant 82 : index
    %222 = vector.load %arg2[%c0_233, %c0_234, %c0_235, %c82] : memref<1x1x4x358xbf16, #tpu.memory_space<vmem>>, vector<1x1x4x256xbf16>
    %223 = vector.shape_cast %222 : vector<1x1x4x256xbf16> to vector<4x256xbf16>
    %c2_236 = arith.constant 2 : index
    %c0_237 = arith.constant 0 : index
    %224 = vector.load %arg5[%c2_236, %c0_237] : memref<7x256xbf16, #tpu.memory_space<vmem>>, vector<1x256xbf16>
    %225 = vector.broadcast %224 : vector<1x256xbf16> to vector<4x256xbf16>
    %226 = arith.mulf %223, %225 : vector<4x256xbf16>
    %c148 = arith.constant 148 : index
    %c0_238 = arith.constant 0 : index
    %227 = vector.load %arg8[%c148, %c0_238] : memref<196x256xbf16, #tpu.memory_space<vmem>>, vector<4x256xbf16>
    tpu.vector_store %arg8[%c148, %c0_238], %226 {strides = array<i32>} : memref<196x256xbf16, #tpu.memory_space<vmem>>, vector<4x256xbf16>,
    %c0_239 = arith.constant 0 : index
    %c0_240 = arith.constant 0 : index
    %c0_241 = arith.constant 0 : index
    %c83 = arith.constant 83 : index
    %228 = vector.load %arg2[%c0_239, %c0_240, %c0_241, %c83] : memref<1x1x4x358xbf16, #tpu.memory_space<vmem>>, vector<1x1x4x256xbf16>
    %229 = vector.shape_cast %228 : vector<1x1x4x256xbf16> to vector<4x256xbf16>
    %c3_242 = arith.constant 3 : index
    %c0_243 = arith.constant 0 : index
    %230 = vector.load %arg5[%c3_242, %c0_243] : memref<7x256xbf16, #tpu.memory_space<vmem>>, vector<1x256xbf16>
    %231 = vector.broadcast %230 : vector<1x256xbf16> to vector<4x256xbf16>
    %232 = arith.mulf %229, %231 : vector<4x256xbf16>
    %c152 = arith.constant 152 : index
    %c0_244 = arith.constant 0 : index
    %233 = vector.load %arg8[%c152, %c0_244] : memref<196x256xbf16, #tpu.memory_space<vmem>>, vector<4x256xbf16>
    tpu.vector_store %arg8[%c152, %c0_244], %232 {strides = array<i32>} : memref<196x256xbf16, #tpu.memory_space<vmem>>, vector<4x256xbf16>,
    %c0_245 = arith.constant 0 : index
    %c0_246 = arith.constant 0 : index
    %c0_247 = arith.constant 0 : index
    %c84_248 = arith.constant 84 : index
    %234 = vector.load %arg2[%c0_245, %c0_246, %c0_247, %c84_248] : memref<1x1x4x358xbf16, #tpu.memory_space<vmem>>, vector<1x1x4x256xbf16>
    %235 = vector.shape_cast %234 : vector<1x1x4x256xbf16> to vector<4x256xbf16>
    %c4_249 = arith.constant 4 : index
    %c0_250 = arith.constant 0 : index
    %236 = vector.load %arg5[%c4_249, %c0_250] : memref<7x256xbf16, #tpu.memory_space<vmem>>, vector<1x256xbf16>
    %237 = vector.broadcast %236 : vector<1x256xbf16> to vector<4x256xbf16>
    %238 = arith.mulf %235, %237 : vector<4x256xbf16>
    %c156 = arith.constant 156 : index
    %c0_251 = arith.constant 0 : index
    %239 = vector.load %arg8[%c156, %c0_251] : memref<196x256xbf16, #tpu.memory_space<vmem>>, vector<4x256xbf16>
    tpu.vector_store %arg8[%c156, %c0_251], %238 {strides = array<i32>} : memref<196x256xbf16, #tpu.memory_space<vmem>>, vector<4x256xbf16>,
    %c0_252 = arith.constant 0 : index
    %c0_253 = arith.constant 0 : index
    %c0_254 = arith.constant 0 : index
    %c85 = arith.constant 85 : index
    %240 = vector.load %arg2[%c0_252, %c0_253, %c0_254, %c85] : memref<1x1x4x358xbf16, #tpu.memory_space<vmem>>, vector<1x1x4x256xbf16>
    %241 = vector.shape_cast %240 : vector<1x1x4x256xbf16> to vector<4x256xbf16>
    %c5_255 = arith.constant 5 : index
    %c0_256 = arith.constant 0 : index
    %242 = vector.load %arg5[%c5_255, %c0_256] : memref<7x256xbf16, #tpu.memory_space<vmem>>, vector<1x256xbf16>
    %243 = vector.broadcast %242 : vector<1x256xbf16> to vector<4x256xbf16>
    %244 = arith.mulf %241, %243 : vector<4x256xbf16>
    %c160 = arith.constant 160 : index
    %c0_257 = arith.constant 0 : index
    %245 = vector.load %arg8[%c160, %c0_257] : memref<196x256xbf16, #tpu.memory_space<vmem>>, vector<4x256xbf16>
    tpu.vector_store %arg8[%c160, %c0_257], %244 {strides = array<i32>} : memref<196x256xbf16, #tpu.memory_space<vmem>>, vector<4x256xbf16>,
    %c0_258 = arith.constant 0 : index
    %c0_259 = arith.constant 0 : index
    %c0_260 = arith.constant 0 : index
    %c86 = arith.constant 86 : index
    %246 = vector.load %arg2[%c0_258, %c0_259, %c0_260, %c86] : memref<1x1x4x358xbf16, #tpu.memory_space<vmem>>, vector<1x1x4x256xbf16>
    %247 = vector.shape_cast %246 : vector<1x1x4x256xbf16> to vector<4x256xbf16>
    %c6_261 = arith.constant 6 : index
    %c0_262 = arith.constant 0 : index
    %248 = vector.load %arg5[%c6_261, %c0_262] : memref<7x256xbf16, #tpu.memory_space<vmem>>, vector<1x256xbf16>
    %249 = vector.broadcast %248 : vector<1x256xbf16> to vector<4x256xbf16>
    %250 = arith.mulf %247, %249 : vector<4x256xbf16>
    %c164 = arith.constant 164 : index
    %c0_263 = arith.constant 0 : index
    %251 = vector.load %arg8[%c164, %c0_263] : memref<196x256xbf16, #tpu.memory_space<vmem>>, vector<4x256xbf16>
    tpu.vector_store %arg8[%c164, %c0_263], %250 {strides = array<i32>} : memref<196x256xbf16, #tpu.memory_space<vmem>>, vector<4x256xbf16>,
    %c0_264 = arith.constant 0 : index
    %c0_265 = arith.constant 0 : index
    %c0_266 = arith.constant 0 : index
    %c96_267 = arith.constant 96 : index
    %252 = vector.load %arg2[%c0_264, %c0_265, %c0_266, %c96_267] : memref<1x1x4x358xbf16, #tpu.memory_space<vmem>>, vector<1x1x4x256xbf16>
    %253 = vector.shape_cast %252 : vector<1x1x4x256xbf16> to vector<4x256xbf16>
    %c0_268 = arith.constant 0 : index
    %c0_269 = arith.constant 0 : index
    %254 = vector.load %arg5[%c0_268, %c0_269] : memref<7x256xbf16, #tpu.memory_space<vmem>>, vector<1x256xbf16>
    %255 = vector.broadcast %254 : vector<1x256xbf16> to vector<4x256xbf16>
    %256 = arith.mulf %253, %255 : vector<4x256xbf16>
    %c168 = arith.constant 168 : index
    %c0_270 = arith.constant 0 : index
    %257 = vector.load %arg8[%c168, %c0_270] : memref<196x256xbf16, #tpu.memory_space<vmem>>, vector<4x256xbf16>
    tpu.vector_store %arg8[%c168, %c0_270], %256 {strides = array<i32>} : memref<196x256xbf16, #tpu.memory_space<vmem>>, vector<4x256xbf16>,
    %c0_271 = arith.constant 0 : index
    %c0_272 = arith.constant 0 : index
    %c0_273 = arith.constant 0 : index
    %c97 = arith.constant 97 : index
    %258 = vector.load %arg2[%c0_271, %c0_272, %c0_273, %c97] : memref<1x1x4x358xbf16, #tpu.memory_space<vmem>>, vector<1x1x4x256xbf16>
    %259 = vector.shape_cast %258 : vector<1x1x4x256xbf16> to vector<4x256xbf16>
    %c1_274 = arith.constant 1 : index
    %c0_275 = arith.constant 0 : index
    %260 = vector.load %arg5[%c1_274, %c0_275] : memref<7x256xbf16, #tpu.memory_space<vmem>>, vector<1x256xbf16>
    %261 = vector.broadcast %260 : vector<1x256xbf16> to vector<4x256xbf16>
    %262 = arith.mulf %259, %261 : vector<4x256xbf16>
    %c172 = arith.constant 172 : index
    %c0_276 = arith.constant 0 : index
    %263 = vector.load %arg8[%c172, %c0_276] : memref<196x256xbf16, #tpu.memory_space<vmem>>, vector<4x256xbf16>
    tpu.vector_store %arg8[%c172, %c0_276], %262 {strides = array<i32>} : memref<196x256xbf16, #tpu.memory_space<vmem>>, vector<4x256xbf16>,
    %c0_277 = arith.constant 0 : index
    %c0_278 = arith.constant 0 : index
    %c0_279 = arith.constant 0 : index
    %c98 = arith.constant 98 : index
    %264 = vector.load %arg2[%c0_277, %c0_278, %c0_279, %c98] : memref<1x1x4x358xbf16, #tpu.memory_space<vmem>>, vector<1x1x4x256xbf16>
    %265 = vector.shape_cast %264 : vector<1x1x4x256xbf16> to vector<4x256xbf16>
    %c2_280 = arith.constant 2 : index
    %c0_281 = arith.constant 0 : index
    %266 = vector.load %arg5[%c2_280, %c0_281] : memref<7x256xbf16, #tpu.memory_space<vmem>>, vector<1x256xbf16>
    %267 = vector.broadcast %266 : vector<1x256xbf16> to vector<4x256xbf16>
    %268 = arith.mulf %265, %267 : vector<4x256xbf16>
    %c176 = arith.constant 176 : index
    %c0_282 = arith.constant 0 : index
    %269 = vector.load %arg8[%c176, %c0_282] : memref<196x256xbf16, #tpu.memory_space<vmem>>, vector<4x256xbf16>
    tpu.vector_store %arg8[%c176, %c0_282], %268 {strides = array<i32>} : memref<196x256xbf16, #tpu.memory_space<vmem>>, vector<4x256xbf16>,
    %c0_283 = arith.constant 0 : index
    %c0_284 = arith.constant 0 : index
    %c0_285 = arith.constant 0 : index
    %c99 = arith.constant 99 : index
    %270 = vector.load %arg2[%c0_283, %c0_284, %c0_285, %c99] : memref<1x1x4x358xbf16, #tpu.memory_space<vmem>>, vector<1x1x4x256xbf16>
    %271 = vector.shape_cast %270 : vector<1x1x4x256xbf16> to vector<4x256xbf16>
    %c3_286 = arith.constant 3 : index
    %c0_287 = arith.constant 0 : index
    %272 = vector.load %arg5[%c3_286, %c0_287] : memref<7x256xbf16, #tpu.memory_space<vmem>>, vector<1x256xbf16>
    %273 = vector.broadcast %272 : vector<1x256xbf16> to vector<4x256xbf16>
    %274 = arith.mulf %271, %273 : vector<4x256xbf16>
    %c180 = arith.constant 180 : index
    %c0_288 = arith.constant 0 : index
    %275 = vector.load %arg8[%c180, %c0_288] : memref<196x256xbf16, #tpu.memory_space<vmem>>, vector<4x256xbf16>
    tpu.vector_store %arg8[%c180, %c0_288], %274 {strides = array<i32>} : memref<196x256xbf16, #tpu.memory_space<vmem>>, vector<4x256xbf16>,
    %c0_289 = arith.constant 0 : index
    %c0_290 = arith.constant 0 : index
    %c0_291 = arith.constant 0 : index
    %c100_292 = arith.constant 100 : index
    %276 = vector.load %arg2[%c0_289, %c0_290, %c0_291, %c100_292] : memref<1x1x4x358xbf16, #tpu.memory_space<vmem>>, vector<1x1x4x256xbf16>
    %277 = vector.shape_cast %276 : vector<1x1x4x256xbf16> to vector<4x256xbf16>
    %c4_293 = arith.constant 4 : index
    %c0_294 = arith.constant 0 : index
    %278 = vector.load %arg5[%c4_293, %c0_294] : memref<7x256xbf16, #tpu.memory_space<vmem>>, vector<1x256xbf16>
    %279 = vector.broadcast %278 : vector<1x256xbf16> to vector<4x256xbf16>
    %280 = arith.mulf %277, %279 : vector<4x256xbf16>
    %c184 = arith.constant 184 : index
    %c0_295 = arith.constant 0 : index
    %281 = vector.load %arg8[%c184, %c0_295] : memref<196x256xbf16, #tpu.memory_space<vmem>>, vector<4x256xbf16>
    tpu.vector_store %arg8[%c184, %c0_295], %280 {strides = array<i32>} : memref<196x256xbf16, #tpu.memory_space<vmem>>, vector<4x256xbf16>,
    %c0_296 = arith.constant 0 : index
    %c0_297 = arith.constant 0 : index
    %c0_298 = arith.constant 0 : index
    %c101 = arith.constant 101 : index
    %282 = vector.load %arg2[%c0_296, %c0_297, %c0_298, %c101] : memref<1x1x4x358xbf16, #tpu.memory_space<vmem>>, vector<1x1x4x256xbf16>
    %283 = vector.shape_cast %282 : vector<1x1x4x256xbf16> to vector<4x256xbf16>
    %c5_299 = arith.constant 5 : index
    %c0_300 = arith.constant 0 : index
    %284 = vector.load %arg5[%c5_299, %c0_300] : memref<7x256xbf16, #tpu.memory_space<vmem>>, vector<1x256xbf16>
    %285 = vector.broadcast %284 : vector<1x256xbf16> to vector<4x256xbf16>
    %286 = arith.mulf %283, %285 : vector<4x256xbf16>
    %c188 = arith.constant 188 : index
    %c0_301 = arith.constant 0 : index
    %287 = vector.load %arg8[%c188, %c0_301] : memref<196x256xbf16, #tpu.memory_space<vmem>>, vector<4x256xbf16>
    tpu.vector_store %arg8[%c188, %c0_301], %286 {strides = array<i32>} : memref<196x256xbf16, #tpu.memory_space<vmem>>, vector<4x256xbf16>,
    %c0_302 = arith.constant 0 : index
    %c0_303 = arith.constant 0 : index
    %c0_304 = arith.constant 0 : index
    %c102 = arith.constant 102 : index
    %288 = vector.load %arg2[%c0_302, %c0_303, %c0_304, %c102] : memref<1x1x4x358xbf16, #tpu.memory_space<vmem>>, vector<1x1x4x256xbf16>
    %289 = vector.shape_cast %288 : vector<1x1x4x256xbf16> to vector<4x256xbf16>
    %c6_305 = arith.constant 6 : index
    %c0_306 = arith.constant 0 : index
    %290 = vector.load %arg5[%c6_305, %c0_306] : memref<7x256xbf16, #tpu.memory_space<vmem>>, vector<1x256xbf16>
    %291 = vector.broadcast %290 : vector<1x256xbf16> to vector<4x256xbf16>
    %292 = arith.mulf %289, %291 : vector<4x256xbf16>
    %c192 = arith.constant 192 : index
    %c0_307 = arith.constant 0 : index
    %293 = vector.load %arg8[%c192, %c0_307] : memref<196x256xbf16, #tpu.memory_space<vmem>>, vector<4x256xbf16>
    tpu.vector_store %arg8[%c192, %c0_307], %292 {strides = array<i32>} : memref<196x256xbf16, #tpu.memory_space<vmem>>, vector<4x256xbf16>,
    %c0_308 = arith.constant 0 : index
    %c0_309 = arith.constant 0 : index
    %294 = vector.load %arg3[%c0_308, %c0_309] : memref<4x196xbf16, #tpu.memory_space<vmem>>, vector<4x196xbf16>
    %c0_310 = arith.constant 0 : index
    %c0_311 = arith.constant 0 : index
    %295 = vector.load %arg8[%c0_310, %c0_311] : memref<196x256xbf16, #tpu.memory_space<vmem>>, vector<196x256xbf16>
    %cst = arith.constant dense<0.000000e+00> : vector<4x256xf32>
    %296 = tpu.matmul %294, %295, %cst {dimension_numbers = #tpu.dot_dimension_numbers<[1], [0], [0], [1], [0, 0, 1, 1], [], []>} : vector<4x196xbf16>, vector<196x256xbf16>, vector<4x256xf32> -> vector<4x256xf32>
    %c0_312 = arith.constant 0 : index
    %c0_313 = arith.constant 0 : index
    %297 = vector.load %arg4[%c0_312, %c0_313] : memref<4x1xf32, #tpu.memory_space<vmem>>, vector<4x1xf32>
    %298 = vector.broadcast %297 : vector<4x1xf32> to vector<4x256xf32>
    %299 = arith.addf %296, %298 : vector<4x256xf32>
    %c0_314 = arith.constant 0 : index
    %c0_315 = arith.constant 0 : index
    %c0_316 = arith.constant 0 : index
    %300 = vector.load %arg7[%c0_314, %c0_315, %c0_316] : memref<1x8x256xf32, #tpu.memory_space<vmem>>, vector<1x4x256xf32>
    %301 = vector.shape_cast %300 : vector<1x4x256xf32> to vector<4x256xf32>
    %302 = vector.shape_cast %299 : vector<4x256xf32> to vector<1x4x256xf32>
    tpu.vector_store %arg7[%c0_314, %c0_315, %c0_316], %302 {strides = array<i32>} : memref<1x8x256xf32, #tpu.memory_space<vmem>>, vector<1x4x256xf32>,
    %c0_317 = arith.constant 0 : index
    %c4_318 = arith.constant 4 : index
    %c0_319 = arith.constant 0 : index
    %303 = vector.load %arg6[%c0_317, %c4_318, %c0_319] : memref<1x8x256xf32, #tpu.memory_space<vmem>>, vector<1x4x256xf32>
    %304 = vector.shape_cast %303 : vector<1x4x256xf32> to vector<4x256xf32>
    %c0_320 = arith.constant 0 : index
    %c4_321 = arith.constant 4 : index
    %c0_322 = arith.constant 0 : index
    %305 = vector.load %arg7[%c0_320, %c4_321, %c0_322] : memref<1x8x256xf32, #tpu.memory_space<vmem>>, vector<1x4x256xf32>
    %306 = vector.shape_cast %305 : vector<1x4x256xf32> to vector<4x256xf32>
    %307 = vector.shape_cast %304 : vector<4x256xf32> to vector<1x4x256xf32>
    tpu.vector_store %arg7[%c0_320, %c4_321, %c0_322], %307 {strides = array<i32>} : memref<1x8x256xf32, #tpu.memory_space<vmem>>, vector<1x4x256xf32>,
    return
  }
  func.func @transform_0(%arg0: i32, %arg1: i32) -> (i32, i32, i32, i32) {
    %c0_i32 = arith.constant 0 : i32
    %c0_i32_0 = arith.constant 0 : i32
    %c0_i32_1 = arith.constant 0 : i32
    return %arg0, %arg1, %c0_i32, %c0_i32_0 : i32, i32, i32, i32
  }
  func.func @transform_1(%arg0: i32, %arg1: i32) -> (i32, i32) {
    %c0_i32 = arith.constant 0 : i32
    %c0_i32_0 = arith.constant 0 : i32
    %c0_i32_1 = arith.constant 0 : i32
    return %c0_i32, %c0_i32_0 : i32, i32
  }
  func.func @transform_2(%arg0: i32, %arg1: i32) -> (i32, i32) {
    %c0_i32 = arith.constant 0 : i32
    %c0_i32_0 = arith.constant 0 : i32
    %c0_i32_1 = arith.constant 0 : i32
    return %c0_i32, %c0_i32_0 : i32, i32
  }
  func.func @transform_3(%arg0: i32, %arg1: i32) -> (i32, i32) {
    %c0_i32 = arith.constant 0 : i32
    %c0_i32_0 = arith.constant 0 : i32
    %c0_i32_1 = arith.constant 0 : i32
    return %c0_i32, %c0_i32_0 : i32, i32
  }
  func.func @transform_4(%arg0: i32, %arg1: i32) -> (i32, i32, i32) {
    %c0_i32 = arith.constant 0 : i32
    %c0_i32_0 = arith.constant 0 : i32
    return %arg0, %c0_i32, %arg1 : i32, i32, i32
  }
  func.func @transform_5(%arg0: i32, %arg1: i32) -> (i32, i32, i32) {
    %c0_i32 = arith.constant 0 : i32
    %c0_i32_0 = arith.constant 0 : i32
    return %arg0, %c0_i32, %arg1 : i32, i32, i32
  }
}

</mosaic_0001>

<bundles_post_ra>
// kernel: plk_conv2d.1
= control target key start
LH: loop header
LB: loop body
LE: loop exit
PB: predicated region body
PF: predicated region fallthrough
CT: control target
= control target key end

     0   :  { %s3944_s18 = smov 0   ;;  %s3946_s19 = smov 0   ;;  %s4802_s0 = inlined_call_operand.vmem [shape: bf16[2,1,4,358], index: 0, kind: input, shape index: {}]   ;;  %s4803_s1 = inlined_call_operand.vmem [shape: bf16[4,196], index: 1, kind: input, shape index: {}]   ;;  %s4804_s2 = inlined_call_operand.vmem [shape: f32[4,1], index: 2, kind: input, shape index: {}]   ;;  %s4805_s3 = inlined_call_operand.vmem [shape: bf16[7,256], index: 3, kind: input, shape index: {}]   ;;  %s4806_s4 = inlined_call_operand.vmem [shape: f32[2,16,256], index: 4, kind: input, shape index: {}, may-alias: {4,5}]   ;;  %s4807_s5 = inlined_call_operand.vmem [shape: f32[2,16,256], index: 5, kind: output, shape index: {}, may-alias: {4,5}]  }
   0x1   :  { %s3948_s20 = smov 0  }
   0x2 LB: > { %s27_s21 = sadd.s32 1, %s3816_s19  ;;  %p3548_p0 = scmp.ge.s32.totalorder %s3820_s20, 1  ;;  %s3820_s20 = sphi %s3948_s20, %s15_s20   ;;  %s3816_s19 = sphi %s3946_s19, %s4828_s19   ;;  %s3812_s18 = sphi %s3944_s18, %s4827_s18  }
   0x3   : > { %p29_p1 = scmp.ge.s32.totalorder %s27_s21, 2  ;;  %p224_p2 = scmp.lt.s32.totalorder %s3820_s20, 3 }
   0x5   : > { %s4830_s21 = smov (%p29_p1, %s27_s21), 0  ;;  %p225_p3 = pnand %p3548_p0, %p224_p2 }
   0x7   : > { %228 = sbr.rel (%p225_p3) target bundleno = 877 (0x36d), region = 40 }
   0xc   : > { %v333_v0 = vld [vmem:[%s4805_s3] sm:$0x11]  ;;  %v574_v1 = vld [vmem:[%s4805_s3] sm:$0x44]  ;;  %v396_v6 = vld [vmem:[%s4805_s3] sm:$0x22] }
   0xd   : > { %v335_v2 = vunpack.c.l.b16 %v333_v0  ;;  %v336_v3 = vunpack.c.h.b16 %v333_v0  ;;  %v576_v4 = vunpack.c.l.b16 %v574_v1  ;;  %v577_v5 = vunpack.c.h.b16 %v574_v1  ;;  %v636_v7 = vld [vmem:[%s4805_s3] sm:$0x88]  ;;  %v454_v40 = vld [vmem:[%s4805_s3] sm:$0x22]  ;;  %v694_v45 = vld [vmem:[%s4805_s3] sm:$0x11] }
   0xe   : > { %v398_v8 = vunpack.c.l.b16 %v396_v6  ;;  %v399_v9 = vunpack.c.h.b16 %v396_v6  ;;  %v638_v10 = vunpack.c.l.b16 %v636_v7  ;;  %v639_v11 = vunpack.c.h.b16 %v636_v7  ;;  %v814_v58 = vld [vmem:[%s4805_s3] sm:$0x22]  ;;  %v516_v63 = vld [vmem:[%s4805_s3] sm:$0x44]  ;;  %s3822_s13 = smov 1   ;;  %s3823_s14 = smov 5  }
   0xf   : > { %v337_v12 = vpack.c.b16 %v335_v2, %v335_v2  ;;  %v338_v13 = vpack.c.b16 %v336_v3, %v336_v3  ;;  %v578_v14 = vpack.c.b16 %v576_v4, %v576_v4  ;;  %v579_v15 = vpack.c.b16 %v577_v5, %v577_v5  ;;  %s3824_s17 = smov 2   ;;  %s3825_s22 = smov 6  }
  0x10   : > { %vm320_vm0 = vcmask 1043456   ;;  %v400_v16 = vpack.c.b16 %v398_v8, %v398_v8  ;;  %v401_v17 = vpack.c.b16 %v399_v9, %v399_v9  ;;  %v640_v18 = vpack.c.b16 %v638_v10, %v638_v10  ;;  %s3826_s27 = smov 3   ;;  %s3827_s30 = smov 16  }
  0x11   : > { %v641_v19 = vpack.c.b16 %v639_v11, %v639_v11  ;;  %v340_v20 = vshrl.u32 %v337_v12, 16  ;;  %v345_v21 = vshrl.u32 %v338_v13, 16  ;;  %v581_v22 = vshrl.u32 %v578_v14, 16  ;;  %s3828_s6 = smov 18   ;;  %s3829_s9 = smov 4  }
  0x12   : > { %v586_v23 = vshrl.u32 %v579_v15, 16  ;;  %v403_v24 = vpack.i.b16 %v400_v16, %v400_v16  ;;  %v407_v25 = vpack.i.b16 %v401_v17, %v401_v17  ;;  %v643_v26 = vpack.i.b16 %v640_v18, %v640_v18  ;;  %s3831_s15 = smov 21   ;;  %s3832_s24 = smov 17  }
  0x13   : > { %v647_v27 = vpack.i.b16 %v641_v19, %v641_v19  ;;  %v341_v28 = vpack.i.b16 %v340_v20, %v340_v20  ;;  %v346_v29 = vpack.i.b16 %v345_v21, %v345_v21  ;;  %v582_v30 = vpack.i.b16 %v581_v22, %v581_v22  ;;  %s3833_s25 = smov 22   ;;  %s3834_s28 = smov 33  }
  0x14   : > { %v587_v31 = vpack.i.b16 %v586_v23, %v586_v23  ;;  %v405_v32 = vperm.slane %v403_v24, 1  ;;  %v409_v33 = vperm.slane %v407_v25, 1  ;;  %v645_v34 = vperm.slane %v643_v26, 3  ;;  %s3837_s12 = smov 36   ;;  %s3839_s16 = smov 32  }
  0x15   : > { %v649_v35 = vperm.slane %v647_v27, 3  ;;  %v343_v36 = vperm.slane %v341_v28, 0  ;;  %v348_v37 = vperm.slane %v346_v29, 0  ;;  %v584_v38 = vperm.slane %v582_v30, 2  ;;  %v874_v28 = vld [vmem:[%s4805_s3] sm:$0x22] }
  0x16   : > { %v589_v39 = vperm.slane %v587_v31, 2  ;;  %v412_v41 = vunpack.c.l.bf16 %v405_v32  ;;  %v413_v42 = vunpack.c.l.bf16 %v409_v33  ;;  %v652_v43 = vunpack.c.l.bf16 %v645_v34  ;;  %s3840_s23 = smov 48   ;;  %s3841_s26 = smov 49  }
  0x17   : > { %v653_v44 = vunpack.c.l.bf16 %v649_v35  ;;  %v351_v46 = vunpack.c.l.bf16 %v343_v36  ;;  %v352_v47 = vunpack.c.l.bf16 %v348_v37  ;;  %v592_v48 = vunpack.c.l.bf16 %v584_v38  ;;  %s3850_s11 = smov 67   ;;  %s3855_s29 = smov 81  }
  0x18   : > { %v593_v49 = vunpack.c.l.bf16 %v589_v39  ;;  %v416_v50 = vrot.slane %v413_v42, 4  ;;  %v456_v52 = vunpack.c.l.b16 %v454_v40  ;;  %v457_v53 = vunpack.c.h.b16 %v454_v40  ;;  %p269_p4 = scmp.lt.s32.totalorder %s3812_s18, 1  ;;  %s3860_s7 = smov 85  }
  0x19   : > { %v656_v51 = vrot.slane %v653_v44, 4  ;;  %v355_v54 = vrot.slane %v352_v47, 4  ;;  %v696_v56 = vunpack.c.l.b16 %v694_v45  ;;  %v697_v57 = vunpack.c.h.b16 %v694_v45  ;;  %s3861_s8 = smov 96   ;;  %s3866_s10 = smov 86  }
  0x1a   : > { %v596_v55 = vrot.slane %v593_v49, 4  ;;  %v417_v59 = vsel %vm320_vm0, %v412_v41, %v416_v50  ;;  %v458_v61 = vpack.c.b16 %v456_v52, %v456_v52  ;;  %v459_v62 = vpack.c.b16 %v457_v53, %v457_v53  ;;  %v994_v41 = vld [vmem:[%s4805_s3] sm:$0x44]  ;;  %s4832_s18 = smov (!%p269_p4, %s3812_s18), 1 }
  0x1b   : > { %v657_v60 = vsel %vm320_vm0, %v652_v43, %v656_v51  ;;  %v356_v0 = vsel %vm320_vm0, %v351_v46, %v355_v54  ;;  %v698_v2 = vpack.c.b16 %v696_v56, %v696_v56  ;;  %v699_v3 = vpack.c.b16 %v697_v57, %v697_v57  ;;  %v1054_v46 = vld [vmem:[%s4805_s3] sm:$0x88] }
  0x1c   : > { %v597_v1 = vsel %vm320_vm0, %v592_v48, %v596_v55  ;;  %357 = vrot.lane.b32.xlu0 %v356_v0, %s3822_s13  ;;  %v461_v4 = vshrl.u32 %v458_v61, 16  ;;  %v466_v5 = vshrl.u32 %v459_v62, 16  ;;  %v816_v6 = vunpack.c.l.b16 %v814_v58  ;;  %s3845_s13 = smov 38  }
  0x1d   : > { %598 = vrot.lane.b32.xlu2 %v597_v1, %s3823_s14  ;;  %v817_v7 = vunpack.c.h.b16 %v814_v58  ;;  %v701_v8 = vpack.i.b16 %v698_v2, %v698_v2  ;;  %v705_v9 = vpack.i.b16 %v699_v3, %v699_v3  ;;  %v518_v10 = vunpack.c.l.b16 %v516_v63  ;;  %s3830_s14 = smov 19  }
  0x1e   : > { %v519_v11 = vunpack.c.h.b16 %v516_v63  ;;  %v462_v12 = vpack.i.b16 %v461_v4, %v461_v4  ;;  %v467_v13 = vpack.i.b16 %v466_v5, %v466_v5  ;;  %v818_v14 = vpack.c.b16 %v816_v6, %v816_v6 }
  0x1f   : > { %v819_v15 = vpack.c.b16 %v817_v7, %v817_v7  ;;  %v703_v16 = vperm.slane %v701_v8, 0  ;;  %v707_v17 = vperm.slane %v705_v9, 0  ;;  %v520_v18 = vpack.c.b16 %v518_v10, %v518_v10 }
  0x20   : > { %v521_v19 = vpack.c.b16 %v519_v11, %v519_v11  ;;  %v464_v20 = vperm.slane %v462_v12, 1  ;;  %v469_v21 = vperm.slane %v467_v13, 1  ;;  %v821_v22 = vpack.i.b16 %v818_v14, %v818_v14 }
  0x21   : > { %v825_v23 = vpack.i.b16 %v819_v15, %v819_v15  ;;  %v710_v24 = vunpack.c.l.bf16 %v703_v16  ;;  %v711_v25 = vunpack.c.l.bf16 %v707_v17  ;;  %v523_v26 = vpack.i.b16 %v520_v18, %v520_v18 }
  0x22   : > { %v527_v27 = vpack.i.b16 %v521_v19, %v521_v19  ;;  %v472_v29 = vunpack.c.l.bf16 %v464_v20  ;;  %v473_v30 = vunpack.c.l.bf16 %v469_v21  ;;  %v823_v31 = vperm.slane %v821_v22, 1  ;;  %v1172_v20 = vld [vmem:[%s4805_s3] sm:$0x11] }
  0x23   : > { %v827_v32 = vperm.slane %v825_v23, 1  ;;  %v714_v33 = vrot.slane %v711_v25, 4  ;;  %v525_v34 = vperm.slane %v523_v26, 2  ;;  %v876_v36 = vunpack.c.l.b16 %v874_v28 }
  0x24   : > { %v529_v35 = vperm.slane %v527_v27, 2  ;;  %418 = vrot.lane.b32.xlu0 %v417_v59, %s3824_s17  ;;  %v476_v37 = vrot.slane %v473_v30, 4  ;;  %v830_v38 = vunpack.c.l.bf16 %v823_v31  ;;  %v877_v40 = vunpack.c.h.b16 %v874_v28  ;;  %v754_v59 = vld [vmem:[%s4805_s3] sm:$0x11]  ;;  %s3680_s17 = smul.u32 6, %s4832_s18 }
  0x25   : > { %658 = vrot.lane.b32.xlu2 %v657_v60, %s3825_s22  ;;  %v831_v39 = vunpack.c.l.bf16 %v827_v32  ;;  %v715_v42 = vsel %vm320_vm0, %v710_v24, %v714_v33  ;;  %v532_v43 = vunpack.c.l.bf16 %v525_v34  ;;  %v878_v45 = vpack.c.b16 %v876_v36, %v876_v36  ;;  %v1234_v33 = vld [vmem:[%s4805_s3] sm:$0x22]  ;;  %s3873_s22 = smov 124  }
  0x26   : > { %v533_v44 = vunpack.c.l.bf16 %v529_v35  ;;  %v477_v47 = vsel %vm320_vm0, %v472_v29, %v476_v37  ;;  %v879_v49 = vpack.c.b16 %v877_v40, %v877_v40  ;;  %v996_v50 = vunpack.c.l.b16 %v994_v41 }
  0x27   : > { %v834_v48 = vrot.slane %v831_v39, 4  ;;  %478 = vrot.lane.b32.xlu1 %v477_v47, %s3826_s27  ;;  %v881_v52 = vshrl.u32 %v878_v45, 16  ;;  %v997_v53 = vunpack.c.h.b16 %v994_v41  ;;  %v1056_v54 = vunpack.c.l.b16 %v1054_v46  ;;  %s3876_s27 = smov 112  }
  0x28   : > { %v536_v51 = vrot.slane %v533_v44, 4  ;;  %v886_v56 = vshrl.u32 %v879_v49, 16  ;;  %v998_v57 = vpack.c.b16 %v996_v50, %v996_v50  ;;  %v1057_v58 = vunpack.c.h.b16 %v1054_v46 }
  0x29   : > { %v835_v55 = vsel %vm320_vm0, %v830_v38, %v834_v48  ;;  %v882_v61 = vpack.i.b16 %v881_v52, %v881_v52  ;;  %v999_v62 = vpack.c.b16 %v997_v53, %v997_v53  ;;  %v1058_v63 = vpack.c.b16 %v1056_v54, %v1056_v54 }
  0x2a   : > { %v537_v60 = vsel %vm320_vm0, %v532_v43, %v536_v51  ;;  %v887_v0 = vpack.i.b16 %v886_v56, %v886_v56  ;;  %v1001_v1 = vshrl.u32 %v998_v57, 16  ;;  %v1059_v2 = vpack.c.b16 %v1057_v58, %v1057_v58 }
  0x2b   : > { %v756_v3 = vunpack.c.l.b16 %v754_v59  ;;  %v884_v4 = vperm.slane %v882_v61, 1  ;;  %v1006_v5 = vshrl.u32 %v999_v62, 16  ;;  %v1061_v6 = vpack.i.b16 %v1058_v63, %v1058_v63 }
  0x2c   : > { %v757_v7 = vunpack.c.h.b16 %v754_v59  ;;  %716 = vrot.lane.b32.xlu0 %v715_v42, %s3827_s30  ;;  %v889_v8 = vperm.slane %v887_v0, 1  ;;  %v1002_v9 = vpack.i.b16 %v1001_v1, %v1001_v1  ;;  %v1065_v10 = vpack.i.b16 %v1059_v2, %v1059_v2  ;;  %v934_v42 = vld [vmem:[%s4805_s3] sm:$0x44]  ;;  %s4144_s30 = scalar_lea.vmem %s4802_s0, %s3680_s17  ;;  %s3863_s17 = smov 83  }
  0x2d   : > { %836 = vrot.lane.b32.xlu2 %v835_v55, %s3828_s6  ;;  %v758_v11 = vpack.c.b16 %v756_v3, %v756_v3  ;;  %v892_v12 = vunpack.c.l.bf16 %v884_v4  ;;  %v1007_v13 = vpack.i.b16 %v1006_v5, %v1006_v5  ;;  %v1063_v14 = vperm.slane %v1061_v6, 3  ;;  %v1354_v55 = vld [vmem:[%s4805_s3] sm:$0x44]  ;;  %s3835_s6 = smov 20  }
  0x2e   : > { %v759_v15 = vpack.c.b16 %v757_v7, %v757_v7  ;;  %v893_v16 = vunpack.c.l.bf16 %v889_v8  ;;  %v1004_v17 = vperm.slane %v1002_v9, 2  ;;  %v1067_v18 = vperm.slane %v1065_v10, 3  ;;  %v1412_v4 = vld [vmem:[%s4805_s3] sm:$0x44] }
  0x2f   : > { %v761_v19 = vshrl.u32 %v758_v11, 16  ;;  %538 = vrot.lane.b32.xlu1 %v537_v60, %s3829_s9  ;;  %v1009_v21 = vperm.slane %v1007_v13, 2  ;;  %v1070_v22 = vunpack.c.l.bf16 %v1063_v14  ;;  %v1174_v24 = vunpack.c.l.b16 %v1172_v20  ;;  %s3836_s9 = smov 34  }
  0x30   : > { %v766_v23 = vshrl.u32 %v759_v15, 16  ;;  %v896_v25 = vrot.slane %v893_v16, 4  ;;  %v1012_v26 = vunpack.c.l.bf16 %v1004_v17  ;;  %v1071_v27 = vunpack.c.l.bf16 %v1067_v18 }
  0x31   : > { %v762_v28 = vpack.i.b16 %v761_v19, %v761_v19  ;;  %v1013_v29 = vunpack.c.l.bf16 %v1009_v21  ;;  %v1175_v31 = vunpack.c.h.b16 %v1172_v20  ;;  %v1176_v32 = vpack.c.b16 %v1174_v24, %v1174_v24 }
  0x32   : > { %v767_v30 = vpack.i.b16 %v766_v23, %v766_v23  ;;  %v897_v34 = vsel %vm320_vm0, %v892_v12, %v896_v25  ;;  %v1074_v35 = vrot.slane %v1071_v27, 4  ;;  %v1236_v37 = vunpack.c.l.b16 %v1234_v33  ;;  %v1114_v25 = vld [vmem:[%s4805_s3] sm:$0x11] }
  0x33   : > { %v764_v36 = vperm.slane %v762_v28, 0  ;;  %v1016_v38 = vrot.slane %v1013_v29, 4  ;;  %v1177_v40 = vpack.c.b16 %v1175_v31, %v1175_v31  ;;  %v1179_v41 = vshrl.u32 %v1176_v32, 16 }
  0x34   : > { %v769_v39 = vperm.slane %v767_v30, 0  ;;  %898 = vrot.lane.b32.xlu0 %v897_v34, %s3830_s14  ;;  %v1075_v43 = vsel %vm320_vm0, %v1070_v22, %v1074_v35  ;;  %v1237_v45 = vunpack.c.h.b16 %v1234_v33  ;;  %v1238_v46 = vpack.c.b16 %v1236_v37, %v1236_v37  ;;  %v1532_v34 = vld [vmem:[%s4805_s3] sm:$0x11]  ;;  %s3870_s14 = smov 97  }
  0x35   : > { %v772_v44 = vunpack.c.l.bf16 %v764_v36  ;;  %v1017_v47 = vsel %vm320_vm0, %v1012_v26, %v1016_v38  ;;  %v1180_v49 = vpack.i.b16 %v1179_v41, %v1179_v41  ;;  %v1184_v50 = vshrl.u32 %v1177_v40, 16 }
  0x36   : > { %v773_v48 = vunpack.c.l.bf16 %v769_v39  ;;  %1018 = vrot.lane.b32.xlu2 %v1017_v47, %s3831_s15  ;;  %v1239_v51 = vpack.c.b16 %v1237_v45, %v1237_v45  ;;  %v1241_v52 = vpack.i.b16 %v1238_v46, %v1238_v46  ;;  %v936_v53 = vunpack.c.l.b16 %v934_v42  ;;  %v1592_v47 = vld [vmem:[%s4805_s3] sm:$0x11]  ;;  %s3838_s15 = smov 37  }
  0x37   : > { %v937_v54 = vunpack.c.h.b16 %v934_v42  ;;  %v1182_v57 = vperm.slane %v1180_v49, 0  ;;  %v1185_v58 = vpack.i.b16 %v1184_v50, %v1184_v50  ;;  %v1356_v59 = vunpack.c.l.b16 %v1354_v55 }
  0x38   : > { %v776_v56 = vrot.slane %v773_v48, 4  ;;  %v1243_v60 = vperm.slane %v1241_v52, 1  ;;  %v1245_v61 = vpack.i.b16 %v1239_v51, %v1239_v51  ;;  %v938_v62 = vpack.c.b16 %v936_v53, %v936_v53 }
  0x39   : > { %v939_v63 = vpack.c.b16 %v937_v54, %v937_v54  ;;  %v1187_v1 = vperm.slane %v1185_v58, 0  ;;  %v1190_v2 = vunpack.c.l.bf16 %v1182_v57  ;;  %v1357_v3 = vunpack.c.h.b16 %v1354_v55 }
  0x3a   : > { %v777_v0 = vsel %vm320_vm0, %v772_v44, %v776_v56  ;;  %v1247_v5 = vperm.slane %v1245_v61, 1  ;;  %v1250_v6 = vunpack.c.l.bf16 %v1243_v60  ;;  %v941_v7 = vpack.i.b16 %v938_v62, %v938_v62  ;;  %v1292_v60 = vld [vmem:[%s4805_s3] sm:$0x22] }
  0x3b   : > { %778 = vrot.lane.b32.xlu1 %v777_v0, %s3832_s24  ;;  %v945_v8 = vpack.i.b16 %v939_v63, %v939_v63  ;;  %v1191_v9 = vunpack.c.l.bf16 %v1187_v1  ;;  %v1358_v10 = vpack.c.b16 %v1356_v59, %v1356_v59  ;;  %v1359_v11 = vpack.c.b16 %v1357_v3, %v1357_v3  ;;  %s3846_s24 = smov 54  }
  0x3c   : > { %v1414_v12 = vunpack.c.l.b16 %v1412_v4  ;;  %1076 = vrot.lane.b32.xlu0 %v1075_v43, %s3833_s25  ;;  %v1251_v13 = vunpack.c.l.bf16 %v1247_v5  ;;  %v943_v14 = vperm.slane %v941_v7, 2  ;;  %v1415_v16 = vunpack.c.h.b16 %v1412_v4  ;;  %s3847_s25 = smov 64  }
  0x3d   : > { %v947_v15 = vperm.slane %v945_v8, 2  ;;  %v1194_v17 = vrot.slane %v1191_v9, 4  ;;  %v1361_v18 = vpack.i.b16 %v1358_v10, %v1358_v10  ;;  %v1365_v19 = vpack.i.b16 %v1359_v11, %v1359_v11  ;;  %v1712_v9 = vld [vmem:[%s4805_s3] sm:$0x22] }
  0x3e   : > { %v1416_v20 = vpack.c.b16 %v1414_v12, %v1414_v12  ;;  %v1254_v21 = vrot.slane %v1251_v13, 4  ;;  %v950_v22 = vunpack.c.l.bf16 %v943_v14  ;;  %v1417_v24 = vpack.c.b16 %v1415_v16, %v1415_v16 }
  0x3f   : > { %v951_v23 = vunpack.c.l.bf16 %v947_v15  ;;  %v1195_v26 = vsel %vm320_vm0, %v1190_v2, %v1194_v17  ;;  %v1363_v27 = vperm.slane %v1361_v18, 2  ;;  %v1367_v28 = vperm.slane %v1365_v19, 2 }
  0x40   : > { %v1419_v29 = vshrl.u32 %v1416_v20, 16  ;;  %1196 = vrot.lane.b32.xlu2 %v1195_v26, %s3834_s28  ;;  %v1255_v30 = vsel %vm320_vm0, %v1250_v6, %v1254_v21  ;;  %v1424_v32 = vshrl.u32 %v1417_v24, 16  ;;  %v1116_v33 = vunpack.c.l.b16 %v1114_v25  ;;  %s3848_s28 = smov 50  }
  0x41   : > { %v954_v31 = vrot.slane %v951_v23, 4  ;;  %v1370_v35 = vunpack.c.l.bf16 %v1363_v27  ;;  %v1371_v36 = vunpack.c.l.bf16 %v1367_v28  ;;  %v1117_v38 = vunpack.c.h.b16 %v1114_v25 }
  0x42   : > { %v1420_v37 = vpack.i.b16 %v1419_v29, %v1419_v29  ;;  %v1425_v40 = vpack.i.b16 %v1424_v32, %v1424_v32  ;;  %v1118_v41 = vpack.c.b16 %v1116_v33, %v1116_v33  ;;  %v1534_v42 = vunpack.c.l.b16 %v1532_v34 }
  0x43   : > { %v955_v39 = vsel %vm320_vm0, %v950_v22, %v954_v31  ;;  %v1374_v43 = vrot.slane %v1371_v36, 4  ;;  %v1119_v45 = vpack.c.b16 %v1117_v38, %v1117_v38  ;;  %v1535_v46 = vunpack.c.h.b16 %v1532_v34 }
  0x44   : > { %956 = vrot.lane.b32.xlu1 %v955_v39, %s3835_s6  ;;  %v1422_v44 = vperm.slane %v1420_v37, 2  ;;  %1256 = vrot.lane.b32.xlu0 %v1255_v30, %s3836_s9  ;;  %v1427_v48 = vperm.slane %v1425_v40, 2  ;;  %v1121_v49 = vpack.i.b16 %v1118_v41, %v1118_v41  ;;  %v1536_v50 = vpack.c.b16 %v1534_v42, %v1534_v42  ;;  %v1772_v30 = vld [vmem:[%s4805_s3] sm:$0x44]  ;;  %v1474_v39 = vld [vmem:[%s4805_s3] sm:$0x88] }
  0x45   : > { %v1594_v51 = vunpack.c.l.b16 %v1592_v47  ;;  %v1375_v52 = vsel %vm320_vm0, %v1370_v35, %v1374_v43  ;;  %v1125_v54 = vpack.i.b16 %v1119_v45, %v1119_v45  ;;  %v1537_v55 = vpack.c.b16 %v1535_v46, %v1535_v46  ;;  %s3842_s6 = smov 35   ;;  %s3843_s9 = smov 51  }
  0x46   : > { %v1430_v53 = vunpack.c.l.bf16 %v1422_v44  ;;  %v1431_v56 = vunpack.c.l.bf16 %v1427_v48  ;;  %v1123_v57 = vperm.slane %v1121_v49, 0  ;;  %v1539_v58 = vpack.i.b16 %v1536_v50, %v1536_v50 }
  0x47   : > { %v1595_v59 = vunpack.c.h.b16 %v1592_v47  ;;  %v1127_v61 = vperm.slane %v1125_v54, 0  ;;  %v1543_v62 = vpack.i.b16 %v1537_v55, %v1537_v55  ;;  %v1596_v63 = vpack.c.b16 %v1594_v51, %v1594_v51 }
  0x48   : > { %v1294_v0 = vunpack.c.l.b16 %v1292_v60  ;;  %1376 = vrot.lane.b32.xlu2 %v1375_v52, %s3837_s12  ;;  %v1434_v1 = vrot.slane %v1431_v56, 4  ;;  %v1130_v2 = vunpack.c.l.bf16 %v1123_v57  ;;  %v1541_v3 = vperm.slane %v1539_v58, 0  ;;  %s3844_s12 = smov 52  }
  0x49   : > { %v1597_v4 = vpack.c.b16 %v1595_v59, %v1595_v59  ;;  %v1131_v5 = vunpack.c.l.bf16 %v1127_v61  ;;  %v1545_v6 = vperm.slane %v1543_v62, 0  ;;  %v1599_v7 = vshrl.u32 %v1596_v63, 16 }
  0x4a   : > { %v1295_v8 = vunpack.c.h.b16 %v1292_v60  ;;  %v1435_v10 = vsel %vm320_vm0, %v1430_v53, %v1434_v1  ;;  %v1548_v11 = vunpack.c.l.bf16 %v1541_v3  ;;  %v1296_v13 = vpack.c.b16 %v1294_v0, %v1294_v0  ;;  %v1892_v60 = vld [vmem:[%s4805_s3] sm:$0x88]  ;;  %v1952_v1 = vld [vmem:[%s4805_s3] sm:$0x11] }
  0x4b   : > { %v1604_v12 = vshrl.u32 %v1597_v4, 16  ;;  %v1134_v14 = vrot.slane %v1131_v5, 4  ;;  %v1549_v15 = vunpack.c.l.bf16 %v1545_v6  ;;  %v1600_v16 = vpack.i.b16 %v1599_v7, %v1599_v7 }
  0x4c   : > { %v1297_v17 = vpack.c.b16 %v1295_v8, %v1295_v8  ;;  %1436 = vrot.lane.b32.xlu0 %v1435_v10, %s3838_s15  ;;  %v1299_v19 = vshrl.u32 %v1296_v13, 16  ;;  %v1714_v20 = vunpack.c.l.b16 %v1712_v9  ;;  %v1715_v21 = vunpack.c.h.b16 %v1712_v9  ;;  %s3852_s15 = smov 69  }
  0x4d   : > { %v1605_v18 = vpack.i.b16 %v1604_v12, %v1604_v12  ;;  %v1135_v22 = vsel %vm320_vm0, %v1130_v2, %v1134_v14  ;;  %v1552_v23 = vrot.slane %v1549_v15, 4  ;;  %v1602_v24 = vperm.slane %v1600_v16, 0  ;;  %v1652_v14 = vld [vmem:[%s4805_s3] sm:$0x22] }
  0x4e   : > { %v1304_v25 = vshrl.u32 %v1297_v17, 16  ;;  %1136 = vrot.lane.b32.xlu1 %v1135_v22, %s3839_s16  ;;  %v1300_v27 = vpack.i.b16 %v1299_v19, %v1299_v19  ;;  %v1716_v28 = vpack.c.b16 %v1714_v20, %v1714_v20  ;;  %v1717_v29 = vpack.c.b16 %v1715_v21, %v1715_v21 }
  0x4f   : > { %v1607_v26 = vperm.slane %v1605_v18, 0  ;;  %v1553_v31 = vsel %vm320_vm0, %v1548_v11, %v1552_v23  ;;  %v1610_v32 = vunpack.c.l.bf16 %v1602_v24  ;;  %v1774_v34 = vunpack.c.l.b16 %v1772_v30 }
  0x50   : > { %v1305_v33 = vpack.i.b16 %v1304_v25, %v1304_v25  ;;  %1554 = vrot.lane.b32.xlu2 %v1553_v31, %s3840_s23  ;;  %v1302_v36 = vperm.slane %v1300_v27, 1  ;;  %v1719_v37 = vshrl.u32 %v1716_v28, 16  ;;  %v1724_v38 = vshrl.u32 %v1717_v29, 16  ;;  %v2072_v31 = vld [vmem:[%s4805_s3] sm:$0x22] }
  0x51   : > { %v1611_v35 = vunpack.c.l.bf16 %v1607_v26  ;;  %v1775_v41 = vunpack.c.h.b16 %v1772_v30  ;;  %v1776_v42 = vpack.c.b16 %v1774_v34, %v1774_v34  ;;  %v1476_v43 = vunpack.c.l.b16 %v1474_v39 }
  0x52   : > { %v1307_v40 = vperm.slane %v1305_v33, 1  ;;  %v1310_v45 = vunpack.c.l.bf16 %v1302_v36  ;;  %v1720_v46 = vpack.i.b16 %v1719_v37, %v1719_v37  ;;  %v1725_v47 = vpack.i.b16 %v1724_v38, %v1724_v38 }
  0x53   : > { %v1614_v44 = vrot.slane %v1611_v35, 4  ;;  %v1777_v49 = vpack.c.b16 %v1775_v41, %v1775_v41  ;;  %v1779_v50 = vpack.i.b16 %v1776_v42, %v1776_v42  ;;  %v1477_v51 = vunpack.c.h.b16 %v1474_v39 }
  0x54   : > { %v1311_v48 = vunpack.c.l.bf16 %v1307_v40  ;;  %v1722_v53 = vperm.slane %v1720_v46, 1  ;;  %v1727_v54 = vperm.slane %v1725_v47, 1  ;;  %v1478_v55 = vpack.c.b16 %v1476_v43, %v1476_v43 }
  0x55   : > { %v1615_v52 = vsel %vm320_vm0, %v1610_v32, %v1614_v44  ;;  %v1781_v57 = vperm.slane %v1779_v50, 2  ;;  %v1783_v58 = vpack.i.b16 %v1777_v49, %v1777_v49  ;;  %v1479_v59 = vpack.c.b16 %v1477_v51, %v1477_v51  ;;  %v2130_v44 = vld [vmem:[%s4805_s3] sm:$0x22] }
  0x56   : > { %1616 = vrot.lane.b32.xlu0 %v1615_v52, %s3841_s26  ;;  %v1314_v56 = vrot.slane %v1311_v48, 4  ;;  %v1730_v61 = vunpack.c.l.bf16 %v1722_v53  ;;  %v1731_v62 = vunpack.c.l.bf16 %v1727_v54  ;;  %v1481_v63 = vpack.i.b16 %v1478_v55, %v1478_v55  ;;  %s3864_s26 = smov 101  }
  0x57   : > { %v1894_v0 = vunpack.c.l.b16 %v1892_v60  ;;  %v1785_v3 = vperm.slane %v1783_v58, 2  ;;  %v1788_v4 = vunpack.c.l.bf16 %v1781_v57  ;;  %v1485_v5 = vpack.i.b16 %v1479_v59, %v1479_v59  ;;  %v1832_v57 = vld [vmem:[%s4805_s3] sm:$0x44] }
  0x58   : > { %v1315_v2 = vsel %vm320_vm0, %v1310_v45, %v1314_v56  ;;  %v1734_v6 = vrot.slane %v1731_v62, 4  ;;  %v1483_v7 = vperm.slane %v1481_v63, 3  ;;  %v1895_v8 = vunpack.c.h.b16 %v1892_v60 }
  0x59   : > { %1316 = vrot.lane.b32.xlu1 %v1315_v2, %s3842_s6  ;;  %v1896_v9 = vpack.c.b16 %v1894_v0, %v1894_v0  ;;  %v1789_v10 = vunpack.c.l.bf16 %v1785_v3  ;;  %v1487_v11 = vperm.slane %v1485_v5, 3  ;;  %v1954_v12 = vunpack.c.l.b16 %v1952_v1  ;;  %s3849_s6 = smov 66  }
  0x5a   : > { %v1955_v13 = vunpack.c.h.b16 %v1952_v1  ;;  %v1735_v15 = vsel %vm320_vm0, %v1730_v61, %v1734_v6  ;;  %v1490_v16 = vunpack.c.l.bf16 %v1483_v7  ;;  %v1897_v17 = vpack.c.b16 %v1895_v8, %v1895_v8  ;;  %v2250_v6 = vld [vmem:[%s4805_s3] sm:$0x44] }
  0x5b   : > { %v1899_v18 = vpack.i.b16 %v1896_v9, %v1896_v9  ;;  %1736 = vrot.lane.b32.xlu2 %v1735_v15, %s3843_s9  ;;  %v1792_v19 = vrot.slane %v1789_v10, 4  ;;  %v1491_v20 = vunpack.c.l.bf16 %v1487_v11  ;;  %v1956_v21 = vpack.c.b16 %v1954_v12, %v1954_v12  ;;  %s3865_s9 = smov 99  }
  0x5c   : > { %v1957_v22 = vpack.c.b16 %v1955_v13, %v1955_v13  ;;  %v1903_v24 = vpack.i.b16 %v1897_v17, %v1897_v17  ;;  %v1654_v25 = vunpack.c.l.b16 %v1652_v14  ;;  %v1655_v26 = vunpack.c.h.b16 %v1652_v14 }
  0x5d   : > { %v1901_v23 = vperm.slane %v1899_v18, 3  ;;  %v1793_v27 = vsel %vm320_vm0, %v1788_v4, %v1792_v19  ;;  %v1494_v28 = vrot.slane %v1491_v20, 4  ;;  %v1959_v29 = vpack.i.b16 %v1956_v21, %v1956_v21  ;;  %v2312_v19 = vld [vmem:[%s4805_s3] sm:$0x88] }
  0x5e   : > { %v1963_v30 = vpack.i.b16 %v1957_v22, %v1957_v22  ;;  %1794 = vrot.lane.b32.xlu0 %v1793_v27, %s3844_s12  ;;  %v1905_v32 = vperm.slane %v1903_v24, 3  ;;  %v1656_v34 = vpack.c.b16 %v1654_v25, %v1654_v25  ;;  %v1657_v35 = vpack.c.b16 %v1655_v26, %v1655_v26  ;;  %s3851_s12 = smov 53  }
  0x5f   : > { %v1908_v33 = vunpack.c.l.bf16 %v1901_v23  ;;  %v1495_v36 = vsel %vm320_vm0, %v1490_v16, %v1494_v28  ;;  %v1961_v37 = vperm.slane %v1959_v29, 0  ;;  %v2074_v39 = vunpack.c.l.b16 %v2072_v31 }
  0x60   : > { %v1965_v38 = vperm.slane %v1963_v30, 0  ;;  %v1909_v40 = vunpack.c.l.bf16 %v1905_v32  ;;  %v1659_v41 = vpack.i.b16 %v1656_v34, %v1656_v34  ;;  %v1663_v42 = vpack.i.b16 %v1657_v35, %v1657_v35 }
  0x61   : > { %1496 = vrot.lane.b32.xlu1 %v1495_v36, %s3845_s13  ;;  %v2075_v43 = vunpack.c.h.b16 %v2072_v31  ;;  %v1968_v45 = vunpack.c.l.bf16 %v1961_v37  ;;  %v2076_v47 = vpack.c.b16 %v2074_v39, %v2074_v39  ;;  %v2132_v48 = vunpack.c.l.b16 %v2130_v44  ;;  %v2010_v36 = vld [vmem:[%s4805_s3] sm:$0x11]  ;;  %s3858_s13 = smov 84  }
  0x62   : > { %v1969_v46 = vunpack.c.l.bf16 %v1965_v38  ;;  %v1912_v49 = vrot.slane %v1909_v40, 4  ;;  %v1661_v50 = vperm.slane %v1659_v41, 1  ;;  %v1665_v51 = vperm.slane %v1663_v42, 1 }
  0x63   : > { %v2077_v52 = vpack.c.b16 %v2075_v43, %v2075_v43  ;;  %v2079_v54 = vpack.i.b16 %v2076_v47, %v2076_v47  ;;  %v2133_v55 = vunpack.c.h.b16 %v2130_v44  ;;  %v2134_v56 = vpack.c.b16 %v2132_v48, %v2132_v48 }
  0x64   : > { %v1972_v53 = vrot.slane %v1969_v46, 4  ;;  %v1913_v58 = vsel %vm320_vm0, %v1908_v33, %v1912_v49  ;;  %v1668_v59 = vunpack.c.l.bf16 %v1661_v50  ;;  %v1669_v60 = vunpack.c.l.bf16 %v1665_v51  ;;  %v2430_v49 = vld [vmem:[%s4805_s3] sm:$0x11] }
  0x65   : > { %v2083_v61 = vpack.i.b16 %v2077_v52, %v2077_v52  ;;  %1914 = vrot.lane.b32.xlu2 %v1913_v58, %s3846_s24  ;;  %v2081_v63 = vperm.slane %v2079_v54, 1  ;;  %v2135_v0 = vpack.c.b16 %v2133_v55, %v2133_v55  ;;  %v2137_v1 = vshrl.u32 %v2134_v56, 16  ;;  %s3853_s24 = smov 70  }
  0x66   : > { %v1973_v62 = vsel %vm320_vm0, %v1968_v45, %v1972_v53  ;;  %v1672_v2 = vrot.slane %v1669_v60, 4  ;;  %v1834_v4 = vunpack.c.l.b16 %v1832_v57  ;;  %v1835_v5 = vunpack.c.h.b16 %v1832_v57 }
  0x67   : > { %1974 = vrot.lane.b32.xlu0 %v1973_v62, %s3847_s25  ;;  %v2085_v3 = vperm.slane %v2083_v61, 1  ;;  %v2088_v7 = vunpack.c.l.bf16 %v2081_v63  ;;  %v2138_v8 = vpack.i.b16 %v2137_v1, %v2137_v1  ;;  %v2142_v9 = vshrl.u32 %v2135_v0, 16 }
  0x68   : > { %v2252_v10 = vunpack.c.l.b16 %v2250_v6  ;;  %v1673_v11 = vsel %vm320_vm0, %v1668_v59, %v1672_v2  ;;  %v1836_v13 = vpack.c.b16 %v1834_v4, %v1834_v4  ;;  %v1837_v14 = vpack.c.b16 %v1835_v5, %v1835_v5 }
  0x69   : > { %v2089_v12 = vunpack.c.l.bf16 %v2085_v3  ;;  %1674 = vrot.lane.b32.xlu1 %v1673_v11, %s3848_s28  ;;  %v2140_v15 = vperm.slane %v2138_v8, 1  ;;  %v2143_v16 = vpack.i.b16 %v2142_v9, %v2142_v9  ;;  %v2253_v17 = vunpack.c.h.b16 %v2250_v6  ;;  %v2490_v8 = vld [vmem:[%s4805_s3] sm:$0x22]  ;;  %s3854_s28 = smov 65  }
  0x6a   : > { %v2254_v18 = vpack.c.b16 %v2252_v10, %v2252_v10  ;;  %v1839_v21 = vshrl.u32 %v1836_v13, 16  ;;  %v1844_v22 = vshrl.u32 %v1837_v14, 16  ;;  %v2314_v23 = vunpack.c.l.b16 %v2312_v19 }
  0x6b   : > { %v2092_v20 = vrot.slane %v2089_v12, 4  ;;  %v2145_v24 = vperm.slane %v2143_v16, 1  ;;  %v2148_v25 = vunpack.c.l.bf16 %v2140_v15  ;;  %v2255_v26 = vpack.c.b16 %v2253_v17, %v2253_v17 }
  0x6c   : > { %v2257_v27 = vshrl.u32 %v2254_v18, 16  ;;  %v1840_v29 = vpack.i.b16 %v1839_v21, %v1839_v21  ;;  %v1845_v30 = vpack.i.b16 %v1844_v22, %v1844_v22  ;;  %v2315_v31 = vunpack.c.h.b16 %v2312_v19  ;;  %v2192_v19 = vld [vmem:[%s4805_s3] sm:$0x44] }
  0x6d   : > { %v2093_v28 = vsel %vm320_vm0, %v2088_v7, %v2092_v20  ;;  %v2149_v32 = vunpack.c.l.bf16 %v2145_v24  ;;  %v2262_v34 = vshrl.u32 %v2255_v26, 16  ;;  %v2316_v35 = vpack.c.b16 %v2314_v23, %v2314_v23 }
  0x6e   : > { %2094 = vrot.lane.b32.xlu2 %v2093_v28, %s3849_s6  ;;  %v2258_v33 = vpack.i.b16 %v2257_v27, %v2257_v27  ;;  %v1842_v37 = vperm.slane %v1840_v29, 2  ;;  %v1847_v38 = vperm.slane %v1845_v30, 2  ;;  %v2317_v39 = vpack.c.b16 %v2315_v31, %v2315_v31  ;;  %v2610_v29 = vld [vmem:[%s4805_s3] sm:$0x44]  ;;  %s3859_s6 = smov 80  }
  0x6f   : > { %v2012_v40 = vunpack.c.l.b16 %v2010_v36  ;;  %v2152_v41 = vrot.slane %v2149_v32, 4  ;;  %v2263_v43 = vpack.i.b16 %v2262_v34, %v2262_v34  ;;  %v2319_v44 = vpack.i.b16 %v2316_v35, %v2316_v35 }
  0x70   : > { %v2260_v42 = vperm.slane %v2258_v33, 2  ;;  %v1850_v45 = vunpack.c.l.bf16 %v1842_v37  ;;  %v1851_v46 = vunpack.c.l.bf16 %v1847_v38  ;;  %v2323_v47 = vpack.i.b16 %v2317_v39, %v2317_v39 }
  0x71   : > { %v2013_v48 = vunpack.c.h.b16 %v2010_v36  ;;  %v2153_v50 = vsel %vm320_vm0, %v2148_v25, %v2152_v41  ;;  %v2265_v51 = vperm.slane %v2263_v43, 2  ;;  %v2321_v53 = vperm.slane %v2319_v44, 3 }
  0x72   : > { %v2268_v52 = vunpack.c.l.bf16 %v2260_v42  ;;  %2154 = vrot.lane.b32.xlu0 %v2153_v50, %s3850_s11  ;;  %v1854_v54 = vrot.slane %v1851_v46, 4  ;;  %v2325_v55 = vperm.slane %v2323_v47, 3  ;;  %v2014_v56 = vpack.c.b16 %v2012_v40, %v2012_v40  ;;  %s3856_s11 = smov 82  }
  0x73   : > { %v2015_v57 = vpack.c.b16 %v2013_v48, %v2013_v48  ;;  %v2269_v58 = vunpack.c.l.bf16 %v2265_v51  ;;  %v2328_v59 = vunpack.c.l.bf16 %v2321_v53  ;;  %v2432_v60 = vunpack.c.l.b16 %v2430_v49 }
  0x74   : > { %v2433_v61 = vunpack.c.h.b16 %v2430_v49  ;;  %v1855_v62 = vsel %vm320_vm0, %v1850_v45, %v1854_v54  ;;  %v2329_v63 = vunpack.c.l.bf16 %v2325_v55  ;;  %v2017_v0 = vshrl.u32 %v2014_v56, 16  ;;  %v2670_v54 = vld [vmem:[%s4805_s3] sm:$0x44] }
  0x75   : > { %v2022_v1 = vshrl.u32 %v2015_v57, 16  ;;  %1856 = vrot.lane.b32.xlu1 %v1855_v62, %s3851_s12  ;;  %v2272_v2 = vrot.slane %v2269_v58, 4  ;;  %v2434_v3 = vpack.c.b16 %v2432_v60, %v2432_v60  ;;  %v2492_v17 = vunpack.c.l.b16 %v2490_v8  ;;  %s3857_s12 = smov 68  }
  0x76   : > { %v2435_v4 = vpack.c.b16 %v2433_v61, %v2433_v61  ;;  %v2332_v5 = vrot.slane %v2329_v63, 4  ;;  %v2018_v6 = vpack.i.b16 %v2017_v0, %v2017_v0  ;;  %v2493_v18 = vunpack.c.h.b16 %v2490_v8  ;;  %v2790_v61 = vld [vmem:[%s4805_s3] sm:$0x11] }
  0x77   : > { %v2023_v7 = vpack.i.b16 %v2022_v1, %v2022_v1  ;;  %v2273_v9 = vsel %vm320_vm0, %v2268_v52, %v2272_v2  ;;  %v2437_v10 = vshrl.u32 %v2434_v3, 16  ;;  %v2494_v24 = vpack.c.b16 %v2492_v17, %v2492_v17 }
  0x78   : > { %v2442_v11 = vshrl.u32 %v2435_v4, 16  ;;  %2274 = vrot.lane.b32.xlu2 %v2273_v9, %s3852_s15  ;;  %v2333_v12 = vsel %vm320_vm0, %v2328_v59, %v2332_v5  ;;  %v2020_v13 = vperm.slane %v2018_v6, 0  ;;  %v2495_v26 = vpack.c.b16 %v2493_v18, %v2493_v18  ;;  %v2370_v59 = vld [vmem:[%s4805_s3] sm:$0x11]  ;;  %s3871_s15 = smov 126  }
  0x79   : > { %v2025_v14 = vperm.slane %v2023_v7, 0  ;;  %v2438_v15 = vpack.i.b16 %v2437_v10, %v2437_v10  ;;  %v2194_v27 = vunpack.c.l.b16 %v2192_v19  ;;  %v2195_v28 = vunpack.c.h.b16 %v2192_v19 }
  0x7a   : > { %v2443_v16 = vpack.i.b16 %v2442_v11, %v2442_v11  ;;  %2334 = vrot.lane.b32.xlu0 %v2333_v12, %s3853_s24  ;;  %v2028_v20 = vunpack.c.l.bf16 %v2020_v13  ;;  %v2497_v32 = vpack.i.b16 %v2494_v24, %v2494_v24  ;;  %v2612_v33 = vunpack.c.l.b16 %v2610_v29  ;;  %s3874_s24 = smov 123  }
  0x7b   : > { %v2029_v21 = vunpack.c.l.bf16 %v2025_v14  ;;  %v2440_v22 = vperm.slane %v2438_v15, 0  ;;  %v2501_v35 = vpack.i.b16 %v2495_v26, %v2495_v26  ;;  %v2196_v36 = vpack.c.b16 %v2194_v27, %v2194_v27 }
  0x7c   : > { %v2445_v23 = vperm.slane %v2443_v16, 0  ;;  %v2197_v37 = vpack.c.b16 %v2195_v28, %v2195_v28  ;;  %v2499_v39 = vperm.slane %v2497_v32, 1  ;;  %v2613_v40 = vunpack.c.h.b16 %v2610_v29 }
  0x7d   : > { %v2032_v25 = vrot.slane %v2029_v21, 4  ;;  %v2448_v30 = vunpack.c.l.bf16 %v2440_v22  ;;  %v2614_v41 = vpack.c.b16 %v2612_v33, %v2612_v33  ;;  %v2503_v42 = vperm.slane %v2501_v35, 1 }
  0x7e   : > { %v2449_v31 = vunpack.c.l.bf16 %v2445_v23  ;;  %v2199_v43 = vpack.i.b16 %v2196_v36, %v2196_v36  ;;  %v2203_v44 = vpack.i.b16 %v2197_v37, %v2197_v37  ;;  %v2615_v46 = vpack.c.b16 %v2613_v40, %v2613_v40 }
  0x7f   : > { %v2033_v34 = vsel %vm320_vm0, %v2028_v20, %v2032_v25  ;;  %v2617_v47 = vpack.i.b16 %v2614_v41, %v2614_v41  ;;  %v2506_v48 = vunpack.c.l.bf16 %v2499_v39  ;;  %v2507_v49 = vunpack.c.l.bf16 %v2503_v42 }
  0x80   : > { %2034 = vrot.lane.b32.xlu1 %v2033_v34, %s3854_s28  ;;  %v2452_v38 = vrot.slane %v2449_v31, 4  ;;  %v2201_v50 = vperm.slane %v2199_v43, 2  ;;  %v2205_v51 = vperm.slane %v2203_v44, 2  ;;  %v2621_v53 = vpack.i.b16 %v2615_v46, %v2615_v46  ;;  %s3877_s28 = smov 111  }
  0x81   : > { %v2619_v52 = vperm.slane %v2617_v47, 2  ;;  %v2510_v55 = vrot.slane %v2507_v49, 4  ;;  %v2672_v58 = vunpack.c.l.b16 %v2670_v54  ;;  %v2673_v1 = vunpack.c.h.b16 %v2670_v54 }
  0x82   : > { %v2453_v45 = vsel %vm320_vm0, %v2448_v30, %v2452_v38  ;;  %v2208_v56 = vunpack.c.l.bf16 %v2201_v50  ;;  %v2209_v57 = vunpack.c.l.bf16 %v2205_v51  ;;  %v2623_v60 = vperm.slane %v2621_v53, 2  ;;  %v2910_v30 = vld [vmem:[%s4805_s3] sm:$0x22] }
  0x83   : > { %2454 = vrot.lane.b32.xlu2 %v2453_v45, %s3855_s29  ;;  %v2511_v62 = vsel %vm320_vm0, %v2506_v48, %v2510_v55  ;;  %v2626_v0 = vunpack.c.l.bf16 %v2619_v52  ;;  %v2674_v3 = vpack.c.b16 %v2672_v58, %v2672_v58  ;;  %v2372_v4 = vunpack.c.l.b16 %v2370_v59  ;;  %v2550_v38 = vld [vmem:[%s4805_s3] sm:$0x22]  ;;  %v300_v45 = vld [vmem:[%s4805_s3] sm:$0x11]  ;;  %s3878_s29 = smov 110  }
  0x84   : > { %v2212_v63 = vrot.slane %v2209_v57, 4  ;;  %2512 = vrot.lane.b32.xlu0 %v2511_v62, %s3856_s11  ;;  %v2627_v2 = vunpack.c.l.bf16 %v2623_v60  ;;  %v2373_v5 = vunpack.c.h.b16 %v2370_v59  ;;  %v2675_v7 = vpack.c.b16 %v2673_v1, %v2673_v1  ;;  %v4153_v58 = vld [vmem:[%s4144_s30] sm:$0x3f]  ;;  %s3867_s11 = smov 102  }
  0x85   : > { %v2792_v8 = vunpack.c.l.b16 %v2790_v61  ;;  %v2793_v9 = vunpack.c.h.b16 %v2790_v61  ;;  %v2677_v11 = vshrl.u32 %v2674_v3, 16  ;;  %v2374_v12 = vpack.c.b16 %v2372_v4, %v2372_v4  ;;  %v4155_v61 = vpop.permute.xlu2 %598 }
  0x86   : > { %v2213_v6 = vsel %vm320_vm0, %v2208_v56, %v2212_v63  ;;  %v2630_v10 = vrot.slane %v2627_v2, 4  ;;  %v2375_v13 = vpack.c.b16 %v2373_v5, %v2373_v5  ;;  %v2682_v14 = vshrl.u32 %v2675_v7, 16 }
  0x87   : > { %v2794_v15 = vpack.c.b16 %v2792_v8, %v2792_v8  ;;  %v2795_v16 = vpack.c.b16 %v2793_v9, %v2793_v9  ;;  %v2678_v18 = vpack.i.b16 %v2677_v11, %v2677_v11  ;;  %v2377_v19 = vpack.i.b16 %v2374_v12, %v2374_v12 }
  0x88   : > { %2214 = vrot.lane.b32.xlu1 %v2213_v6, %s3857_s12  ;;  %v2631_v17 = vsel %vm320_vm0, %v2626_v0, %v2630_v10  ;;  %v2381_v20 = vpack.i.b16 %v2375_v13, %v2375_v13  ;;  %v2683_v21 = vpack.i.b16 %v2682_v14, %v2682_v14  ;;  %v2912_v33 = vunpack.c.l.b16 %v2910_v30  ;;  %v3088_v10 = vld [vmem:[%s4805_s3] sm:$0x44]  ;;  %s3868_s12 = smov 127  }
  0x89   : > { %v2797_v22 = vpack.i.b16 %v2794_v15, %v2794_v15  ;;  %v2801_v23 = vpack.i.b16 %v2795_v16, %v2795_v16  ;;  %v2680_v24 = vperm.slane %v2678_v18, 2  ;;  %v2379_v25 = vperm.slane %v2377_v19, 0  ;;  %v299_v16 = vld [vmem:[%s4144_s30] sm:$0xf] }
  0x8a   : > { %v2383_v26 = vperm.slane %v2381_v20, 0  ;;  %v2685_v27 = vperm.slane %v2683_v21, 2  ;;  %v2913_v40 = vunpack.c.h.b16 %v2910_v30  ;;  %v2914_v43 = vpack.c.b16 %v2912_v33, %v2912_v33 }
  0x8b   : > { %2632 = vrot.lane.b32.xlu2 %v2631_v17, %s3858_s13  ;;  %v2799_v28 = vperm.slane %v2797_v22, 0  ;;  %v2803_v29 = vperm.slane %v2801_v23, 0  ;;  %v2386_v31 = vunpack.c.l.bf16 %v2379_v25  ;;  %v2688_v34 = vunpack.c.l.bf16 %v2680_v24  ;;  %s3862_s13 = smov 98  }
  0x8c   : > { %v2387_v32 = vunpack.c.l.bf16 %v2383_v26  ;;  %v2689_v35 = vunpack.c.l.bf16 %v2685_v27  ;;  %v2552_v44 = vunpack.c.l.b16 %v2550_v38  ;;  %v2915_v47 = vpack.c.b16 %v2913_v40, %v2913_v40  ;;  %v2968_v26 = vld [vmem:[%s4805_s3] sm:$0x22] }
  0x8d   : > { %v2806_v36 = vunpack.c.l.bf16 %v2799_v28  ;;  %v2807_v37 = vunpack.c.l.bf16 %v2803_v29  ;;  %v2553_v48 = vunpack.c.h.b16 %v2550_v38  ;;  %v2917_v51 = vpack.i.b16 %v2914_v43, %v2914_v43  ;;  %v4172_v38 = vpop.permute.xlu2 %658 }
  0x8e   : > { %v2390_v39 = vrot.slane %v2387_v32, 4  ;;  %v2692_v41 = vrot.slane %v2689_v35, 4  ;;  %v2554_v52 = vpack.c.b16 %v2552_v44, %v2552_v44  ;;  %v2921_v53 = vpack.i.b16 %v2915_v47, %v2915_v47  ;;  %v4150_v55 = vpop.permute.xlu0 %357 }
  0x8f   : > { %v2810_v42 = vrot.slane %v2807_v37, 4  ;;  %v2555_v54 = vpack.c.b16 %v2553_v48, %v2553_v48  ;;  %v302_v56 = vunpack.c.l.b16 %v300_v45  ;;  %v303_v57 = vunpack.c.h.b16 %v300_v45  ;;  %v4177_v48 = vld [vmem:[%s4144_s30] sm:$0x3f] }
  0x90   : > { %v2391_v46 = vsel %vm320_vm0, %v2386_v31, %v2390_v39  ;;  %v2693_v49 = vsel %vm320_vm0, %v2688_v34, %v2692_v41  ;;  %v2919_v59 = vperm.slane %v2917_v51, 1  ;;  %v2557_v60 = vshrl.u32 %v2554_v52, 16 }
  0x91   : > { %2392 = vrot.lane.b32.xlu1 %v2391_v46, %s3859_s6  ;;  %v2811_v50 = vsel %vm320_vm0, %v2806_v36, %v2810_v42  ;;  %2694 = vrot.lane.b32.xlu0 %v2693_v49, %s3860_s7  ;;  %v2923_v62 = vperm.slane %v2921_v53, 1  ;;  %v2562_v63 = vshrl.u32 %v2555_v54, 16  ;;  %v304_v0 = vpack.c.b16 %v302_v56, %v302_v56  ;;  %v2730_v36 = vld [vmem:[%s4805_s3] sm:$0x88]  ;;  %s3879_s7 = smov 109  }
  0x92   : > { %v305_v1 = vpack.c.b16 %v303_v57, %v303_v57  ;;  %v2926_v2 = vunpack.c.l.bf16 %v2919_v59  ;;  %v2558_v3 = vpack.i.b16 %v2557_v60, %v2557_v60  ;;  %v350_v4 = vunpack.c.h.bf16 %v4153_v58  ;;  %v3150_v59 = vld [vmem:[%s4805_s3] sm:$0x88] }
  0x93   : > { %2812 = vrot.lane.b32.xlu2 %v2811_v50, %s3861_s8  ;;  %v359_v5 = vrot.slane %v4150_v55, 4  ;;  %v2927_v6 = vunpack.c.l.bf16 %v2923_v62  ;;  %v2563_v7 = vpack.i.b16 %v2562_v63, %v2562_v63  ;;  %v307_v8 = vpack.i.b16 %v304_v0, %v304_v0 }
  0x94   : > { %v311_v9 = vpack.i.b16 %v305_v1, %v305_v1  ;;  %v2560_v11 = vperm.slane %v2558_v3, 1  ;;  %v3090_v13 = vunpack.c.l.b16 %v3088_v10  ;;  %v3091_v20 = vunpack.c.h.b16 %v3088_v10 }
  0x95   : > { %v365_v12 = vmul.f32 %v359_v5, %v350_v4  ;;  %v2930_v14 = vrot.slane %v2927_v6, 4  ;;  %v2565_v15 = vperm.slane %v2563_v7, 1  ;;  %v309_v17 = vperm.slane %v307_v8, 0 }
  0x96   : > { %v313_v18 = vperm.slane %v311_v9, 0  ;;  %v2568_v19 = vunpack.c.l.bf16 %v2560_v11  ;;  %v3092_v21 = vpack.c.b16 %v3090_v13, %v3090_v13  ;;  %v314_v27 = vunpack.c.l.bf16 %v299_v16  ;;  %v4170_v37 = vpop.permute.xlu0 %418 }
  0x97   : > { %370 = vst [vmem:[#allocation1 + $0x10] ss:$2 sm:$0xff] %v365_v12  ;;  %v2931_v22 = vsel %vm320_vm0, %v2926_v2, %v2930_v14  ;;  %v2569_v23 = vunpack.c.l.bf16 %v2565_v15  ;;  %v315_v24 = vunpack.c.l.bf16 %v309_v17  ;;  %v3093_v28 = vpack.c.b16 %v3091_v20, %v3091_v20  ;;  %v4193_v17 = vpop.permute.xlu2 %836 }
  0x98   : > { %v316_v25 = vunpack.c.l.bf16 %v313_v18  ;;  %v3095_v29 = vshrl.u32 %v3092_v21, 16  ;;  %v2970_v34 = vunpack.c.l.b16 %v2968_v26  ;;  %v2971_v35 = vunpack.c.h.b16 %v2968_v26 }
  0x99   : > { %2932 = vrot.lane.b32.xlu0 %v2931_v22, %s3862_s13  ;;  %v2572_v30 = vrot.slane %v2569_v23, 4  ;;  %v3100_v33 = vshrl.u32 %v3093_v28, 16  ;;  %vm360_vm1 = vcmask 7168   ;;  %v2732_v46 = vunpack.c.l.b16 %v2730_v36  ;;  %v4188_v12 = vpop.permute.xlu1 %478  ;;  %s3869_s13 = smov 100  }
  0x9a   : > { %v319_v31 = vrot.slane %v316_v25, 4  ;;  %v3096_v32 = vpack.i.b16 %v3095_v29, %v3095_v29  ;;  %v2972_v44 = vpack.c.b16 %v2970_v34, %v2970_v34  ;;  %v2973_v45 = vpack.c.b16 %v2971_v35, %v2971_v35 }
  0x9b   : > { %v2573_v39 = vsel %vm320_vm0, %v2568_v19, %v2572_v30  ;;  %v3101_v43 = vpack.i.b16 %v3100_v33, %v3100_v33  ;;  %v2733_v47 = vunpack.c.h.b16 %v2730_v36  ;;  %v349_v49 = vunpack.c.l.bf16 %v4153_v58  ;;  %v453_v30 = vld [vmem:[%s4144_s30] sm:$0x3f] }
  0x9c   : > { %v321_v40 = vsel %vm320_vm0, %v315_v24, %v319_v31  ;;  %2574 = vrot.lane.b32.xlu1 %v2573_v39, %s3863_s17  ;;  %v3098_v42 = vperm.slane %v3096_v32, 2  ;;  %v361_v50 = vsel %vm360_vm1, %v359_v5, %v4150_v55  ;;  %v2975_v53 = vshrl.u32 %v2972_v44, 16  ;;  %v3030_v33 = vld [vmem:[%s4805_s3] sm:$0x44]  ;;  %v2848_v36 = vld [vmem:[%s4805_s3] sm:$0x11] }
  0x9d   : > { %v323_v41 = vmul.f32 %v321_v40, %v314_v27  ;;  %v3103_v51 = vperm.slane %v3101_v43, 2  ;;  %v2980_v54 = vshrl.u32 %v2973_v45, 16  ;;  %v2734_v56 = vpack.c.b16 %v2732_v46, %v2732_v46  ;;  %s3872_s17 = smov 125  }
  0x9e   : > { %v3106_v52 = vunpack.c.l.bf16 %v3098_v42  ;;  %v2735_v57 = vpack.c.b16 %v2733_v47, %v2733_v47  ;;  %v411_v62 = vunpack.c.h.bf16 %v4177_v48  ;;  %v420_v63 = vrot.slane %v4170_v37, 4  ;;  %v4186_v1 = vld.sshfl [vmem:[#allocation1 + $0x10] sm:$0xff pattern:$0x75316420]  ;;  %v4191_v16 = vpop.permute.xlu0 %716 }
  0x9f   : > { %325 = vst [vmem:[#allocation1] ss:$2 sm:$0xff] %v323_v41  ;;  %v3107_v60 = vunpack.c.l.bf16 %v3103_v51  ;;  %v3152_v0 = vunpack.c.l.b16 %v3150_v59  ;;  %v2976_v58 = vpack.i.b16 %v2975_v53, %v2975_v53  ;;  %v2981_v55 = vpack.i.b16 %v2980_v54, %v2980_v54 }
  0xa0   : > { %v2737_v2 = vpack.i.b16 %v2734_v56, %v2734_v56  ;;  %v2741_v3 = vpack.i.b16 %v2735_v57, %v2735_v57  ;;  %v364_v4 = vmul.f32 %v361_v50, %v349_v49  ;;  %v426_v6 = vmul.f32 %v420_v63, %v411_v62  ;;  %v4221_v62 = vpop.permute.xlu2 %1018 }
  0xa1   : > { %v3110_v5 = vrot.slane %v3107_v60, 4  ;;  %v3153_v7 = vunpack.c.h.b16 %v3150_v59  ;;  %v2978_v8 = vperm.slane %v2976_v58, 1  ;;  %v2983_v9 = vperm.slane %v2981_v55, 1  ;;  %v539_v54 = vpop.permute.xlu1 %538 }
  0xa2   : > { %v2739_v10 = vperm.slane %v2737_v2, 3  ;;  %v2743_v11 = vperm.slane %v2741_v3, 3  ;;  %vm421_vm2 = vcmask 15360   ;;  %431 = vst [vmem:[#allocation1 + $0x10] ss:$2 sm:$0xff] %v426_v6  ;;  %v3154_v14 = vpack.c.b16 %v3152_v0, %v3152_v0 }
  0xa3   : > { %v3111_v13 = vsel %vm320_vm0, %v3106_v52, %v3110_v5  ;;  %v3155_v15 = vpack.c.b16 %v3153_v7, %v3153_v7  ;;  %v2986_v20 = vunpack.c.l.bf16 %v2978_v8  ;;  %v2987_v21 = vunpack.c.l.bf16 %v2983_v9  ;;  %v515_v9 = vld [vmem:[%s4144_s30] sm:$0x3f] }
  0xa4   : > { %3112 = vrot.lane.b32.xlu2 %v3111_v13, %s3864_s26  ;;  %v2746_v22 = vunpack.c.l.bf16 %v2739_v10  ;;  %v2747_v23 = vunpack.c.l.bf16 %v2743_v11  ;;  %v410_v24 = vunpack.c.l.bf16 %v4177_v48  ;;  %v3157_v25 = vpack.i.b16 %v3154_v14, %v3154_v14  ;;  %s3875_s26 = smov 122  }
  0xa5   : > { %v3161_v26 = vpack.i.b16 %v3155_v15, %v3155_v15  ;;  %v2990_v27 = vrot.slane %v2987_v21, 4  ;;  %v422_v29 = vsel %vm421_vm2, %v420_v63, %v4170_v37  ;;  %v471_v41 = vunpack.c.h.bf16 %v453_v30 }
  0xa6   : > { %v4195_v18 = vld.sshfl [vmem:[#allocation1] sm:$0xff pattern:$0x75316420]  ;;  %v4197_v19 = vld.sshfl [vmem:[#allocation1 + $0x8] sm:$0xff pattern:$0x75316420]  ;;  %v425_v37 = vmul.f32 %v422_v29, %v410_v24  ;;  %v3032_v43 = vunpack.c.l.b16 %v3030_v33  ;;  %v3033_v44 = vunpack.c.h.b16 %v3030_v33  ;;  %v2850_v45 = vunpack.c.l.b16 %v2848_v36  ;;  %v4219_v60 = vpop.permute.xlu0 %898 }
  0xa7   : > { %368 = vst [vmem:[#allocation1] ss:$2 sm:$0xff] %v364_v4  ;;  %v2750_v28 = vrot.slane %v2747_v23, 4  ;;  %v3159_v31 = vperm.slane %v3157_v25, 3  ;;  %v3163_v32 = vperm.slane %v3161_v26, 3  ;;  %v2991_v34 = vsel %vm320_vm0, %v2986_v20, %v2990_v27 }
  0xa8   : > { %2992 = vrot.lane.b32.xlu0 %v2991_v34, %s3865_s9  ;;  %v480_v42 = vrot.slane %v4188_v12, 4  ;;  %v2851_v48 = vunpack.c.h.b16 %v2848_v36  ;;  %v3034_v52 = vpack.c.b16 %v3032_v43, %v3032_v43  ;;  %v3035_v53 = vpack.c.b16 %v3033_v44, %v3033_v44  ;;  %v573_v27 = vld [vmem:[%s4144_s30] sm:$0x3f]  ;;  %v4234_v33 = vpop.permute.xlu2 %1196  ;;  %s3880_s9 = smov 108  }
  0xa9   : > { %v2751_v35 = vsel %vm320_vm0, %v2746_v22, %v2750_v28  ;;  %v3166_v39 = vunpack.c.l.bf16 %v3159_v31  ;;  %v3167_v40 = vunpack.c.l.bf16 %v3163_v32  ;;  %v4212_v46 = vld.sshfl [vmem:[#allocation1 + $0x10] sm:$0xff pattern:$0x75316420]  ;;  %vm481_vm3 = vcmask 23552  }
  0xaa   : > { %2752 = vrot.lane.b32.xlu1 %v2751_v35, %s3866_s10  ;;  %v486_v51 = vmul.f32 %v480_v42, %v471_v41  ;;  %v2852_v57 = vpack.c.b16 %v2850_v45, %v2850_v45  ;;  %v2853_v59 = vpack.c.b16 %v2851_v48, %v2851_v48  ;;  %v3037_v63 = vpack.i.b16 %v3034_v52, %v3034_v52  ;;  %s3881_s10 = smov 107  }
  0xab   : > { %v3170_v47 = vrot.slane %v3167_v40, 4  ;;  %v3041_v0 = vpack.i.b16 %v3035_v53, %v3035_v53  ;;  %v470_v58 = vunpack.c.l.bf16 %v453_v30  ;;  %v378_v3 = vpack.c.bf16 %v4186_v1, %v4186_v1 }
  0xac   : > { %491 = vst [vmem:[#allocation1 + $0x10] ss:$2 sm:$0xff] %v486_v51  ;;  %v2855_v55 = vshrl.u32 %v2852_v57, 16  ;;  %v2860_v2 = vshrl.u32 %v2853_v59, 16  ;;  %v482_v4 = vsel %vm481_vm3, %v480_v42, %v4188_v12  ;;  %v3039_v5 = vperm.slane %v3037_v63, 2 }
  0xad   : > { %v3171_v56 = vsel %vm320_vm0, %v3166_v39, %v3170_v47  ;;  %v3043_v6 = vperm.slane %v3041_v0, 2  ;;  %v382_v11 = vrot.slane %v378_v3, 6  ;;  %v485_v13 = vmul.f32 %v482_v4, %v470_v58  ;;  %v4227_v24 = vpop.permute.xlu1 %778 }
  0xae   : > { %v4214_v49 = vld.sshfl [vmem:[#allocation1] sm:$0xff pattern:$0x75316420]  ;;  %v4216_v50 = vld.sshfl [vmem:[#allocation1 + $0x8] sm:$0xff pattern:$0x75316420]  ;;  %3172 = vrot.lane.b32.xlu2 %v3171_v56, %s3867_s11  ;;  %v2856_v7 = vpack.i.b16 %v2855_v55, %v2855_v55  ;;  %v2861_v8 = vpack.i.b16 %v2860_v2, %v2860_v2  ;;  %v3046_v14 = vunpack.c.l.bf16 %v3039_v5  ;;  %v531_v23 = vunpack.c.h.bf16 %v515_v9  ;;  %v4232_v32 = vpop.permute.xlu0 %1076 }
  0xaf   : > { %429 = vst [vmem:[#allocation1] ss:$2 sm:$0xff] %v425_v37  ;;  %v3047_v10 = vunpack.c.l.bf16 %v3043_v6  ;;  %vm541_vm4 = vcmask 31744   ;;  %v540_v26 = vrot.slane %v539_v54, 4  ;;  %v530_v31 = vunpack.c.l.bf16 %v515_v9  ;;  %v693_v6 = vld [vmem:[%s4144_s30] sm:$0x3f] }
  0xb0   : > { %v2858_v15 = vperm.slane %v2856_v7, 0  ;;  %v2863_v20 = vperm.slane %v2861_v8, 0  ;;  %v591_v37 = vunpack.c.h.bf16 %v573_v27  ;;  %v377_v39 = vpack.c.bf16 %v4216_v50, %v4214_v49  ;;  %v635_v50 = vld [vmem:[%s4144_s30] sm:$0x3f]  ;;  %v4249_v57 = vpop.permute.xlu2 %1376  ;;  %s3882_s11 = smov 106  }
  0xb1   : > { %v3050_v1 = vrot.slane %v3047_v10, 4  ;;  %v542_v34 = vsel %vm541_vm4, %v540_v26, %v539_v54  ;;  %v546_v35 = vmul.f32 %v540_v26, %v531_v23  ;;  %v600_v40 = vrot.slane %v4155_v61, 4 }
  0xb2   : > { %v2866_v12 = vunpack.c.l.bf16 %v2858_v15  ;;  %v2867_v25 = vunpack.c.l.bf16 %v2863_v20  ;;  %v545_v41 = vmul.f32 %v542_v34, %v530_v31  ;;  %v439_v44 = vpack.c.bf16 %v4212_v46, %v4212_v46 }
  0xb3   : > { %v494_v28 = vld.sshfl [vmem:[#allocation1 + $0x10] sm:$0xff pattern:$0x75316420]  ;;  %v3051_v29 = vsel %vm320_vm0, %v3046_v14, %v3050_v1  ;;  %vm601_vm5 = vcmask 39936   ;;  %v606_v45 = vmul.f32 %v600_v40, %v591_v37  ;;  %v381_v47 = vrot.slane %v377_v39, 6 }
  0xb4   : > { %v2870_v30 = vrot.slane %v2867_v25, 4  ;;  %3052 = vrot.lane.b32.xlu0 %v3051_v29, %s3869_s13  ;;  %551 = vst [vmem:[#allocation1 + $0x10] ss:$2 sm:$0xff] %v546_v35  ;;  %v499_v51 = vpack.c.bf16 %v494_v28, %v494_v28  ;;  %v590_v49 = vunpack.c.l.bf16 %v573_v27  ;;  %v602_v53 = vsel %vm601_vm5, %v600_v40, %v4155_v61  ;;  %s3885_s13 = smov 93  }
  0xb5   : > { %v651_v46 = vunpack.c.h.bf16 %v635_v50  ;;  %v660_v58 = vrot.slane %v4172_v38, 4  ;;  %vm661_vm6 = vcmask 48128   ;;  %v650_v5 = vunpack.c.l.bf16 %v635_v50 }
  0xb6   : > { %v432_v21 = vld.sshfl [vmem:[#allocation1] sm:$0xff pattern:$0x75316420]  ;;  %v433_v22 = vld.sshfl [vmem:[#allocation1 + $0x8] sm:$0xff pattern:$0x75316420]  ;;  %385 = vrot.lane.b32.xlu2 %v382_v11, %s3868_s12  ;;  %v2871_v36 = vsel %vm320_vm0, %v2866_v12, %v2870_v30  ;;  %v4242_v52 = vpop.permute.xlu1 %956  ;;  %v4247_v56 = vpop.permute.xlu0 %1256  ;;  %v605_v0 = vmul.f32 %v602_v53, %v590_v49  ;;  %v709_v10 = vunpack.c.h.bf16 %v693_v6  ;;  %v708_v1 = vunpack.c.l.bf16 %v693_v6 }
  0xb7   : > { %489 = vst [vmem:[#allocation1] ss:$2 sm:$0xff] %v485_v13  ;;  %2872 = vrot.lane.b32.xlu1 %v2871_v36, %s3870_s14  ;;  %v438_v48 = vpack.c.bf16 %v433_v22, %v432_v21  ;;  %v503_v59 = vrot.slane %v499_v51, 6  ;;  %v666_v61 = vmul.f32 %v660_v58, %v651_v46  ;;  %v662_v7 = vsel %vm661_vm6, %v660_v58, %v4172_v38  ;;  %v753_v12 = vld [vmem:[%s4144_s30] sm:$0x3f]  ;;  %s3886_s14 = smov 92  }
  0xb8   : > { %v665_v13 = vmul.f32 %v662_v7, %v650_v5  ;;  %v718_v14 = vrot.slane %v4191_v16, 4  ;;  %v4259_v22 = vpop.permute.xlu2 %1554  ;;  %vm719_vm7 = vcmask 130048   ;;  %v771_v28 = vunpack.c.h.bf16 %v753_v12 }
  0xb9   : > { %v780_v35 = vrot.slane %v4227_v24, 4  ;;  %vm781_vm8 = vcmask 138240   ;;  %vm839_vm9 = vcmask 146432   ;;  %v900_v6 = vrot.slane %v4219_v60, 4 }
  0xba   : > { %v724_v23 = vmul.f32 %v718_v14, %v709_v10  ;;  %v720_v25 = vsel %vm719_vm7, %v718_v14, %v4191_v16  ;;  %vm901_vm10 = vcmask 154624   ;;  %vm959_vm11 = vcmask 162816  }
  0xbb   : > { %v554_v54 = vld.sshfl [vmem:[#allocation1 + $0x10] sm:$0xff pattern:$0x75316420]  ;;  %v723_v34 = vmul.f32 %v720_v25, %v708_v1  ;;  %v786_v39 = vmul.f32 %v780_v35, %v771_v28  ;;  %vm1021_vm12 = vcmask 171008   ;;  %vm1079_vm13 = vcmask 179200  }
  0xbc   : > { %383 = vrot.lane.b32.xlu0 %v381_v47, %s3868_s12  ;;  %611 = vst [vmem:[#allocation1 + $0x10] ss:$2 sm:$0xff] %v606_v45  ;;  %v559_v3 = vpack.c.bf16 %v554_v54, %v554_v54  ;;  %vm1139_vm14 = vcmask 261120   ;;  %vm1199_vm15 = vcmask 269312   ;;  %vm1259_vm1 = vcmask 277504   ;;  %s3884_s12 = smov 94  }
  0xbd   : > { %vm1319_vm2 = vcmask 285696   ;;  %vm1379_vm3 = vcmask 293888   ;;  %vm1439_vm4 = vcmask 302080   ;;  %vm391_vm5 = vcmask 1039360  }
  0xbe   : > { %v492_v42 = vld.sshfl [vmem:[#allocation1] sm:$0xff pattern:$0x75316420]  ;;  %v493_v43 = vld.sshfl [vmem:[#allocation1 + $0x8] sm:$0xff pattern:$0x75316420]  ;;  %444 = vrot.lane.b32.xlu2 %v439_v44, %s3871_s15  ;;  %v4257_v15 = vpop.permute.xlu0 %1436  ;;  %v782_v44 = vsel %vm781_vm8, %v780_v35, %v4227_v24 }
  0xbf   : > { %549 = vst [vmem:[#allocation1] ss:$2 sm:$0xff] %v545_v41  ;;  %442 = vrot.lane.b32.xlu1 %v438_v48, %s3871_s15  ;;  %v498_v63 = vpack.c.bf16 %v493_v43, %v492_v42  ;;  %v813_v42 = vld [vmem:[%s4144_s30] sm:$0x3f]  ;;  %v770_v43 = vunpack.c.l.bf16 %v753_v12  ;;  %v838_v48 = vrot.slane %v4193_v17, 4  ;;  %vm449_vm6 = vcmask 1031168  }
  0xc0   : > { %v4254_v8 = vpop.permute.xlu1 %1136  ;;  %v4269_v40 = vpop.permute.xlu2 %1736  ;;  %v829_v47 = vunpack.c.h.bf16 %v813_v42  ;;  %v993_v35 = vld [vmem:[%s4144_s30] sm:$0x3f]  ;;  %vm511_vm7 = vcmask 1022976   ;;  %vm569_vm8 = vcmask 1014784   ;;  %s3887_s15 = smov 91  }
  0xc1   : > { %v502_v4 = vrot.slane %v498_v63, 6  ;;  %v785_v51 = vmul.f32 %v782_v44, %v770_v43  ;;  %v873_v63 = vld [vmem:[%s4144_s30] sm:$0x3f]  ;;  %v840_v58 = vsel %vm839_vm9, %v838_v48, %v4193_v17  ;;  %v1011_v44 = vunpack.c.h.bf16 %v993_v35 }
  0xc2   : > { %v844_v46 = vmul.f32 %v838_v48, %v829_v47  ;;  %v890_v14 = vunpack.c.l.bf16 %v873_v63  ;;  %vm1499_vm9 = vcmask 310272  }
  0xc3   : > { %v614_v9 = vld.sshfl [vmem:[#allocation1 + $0x10] sm:$0xff pattern:$0x75316420] }
  0xc4   : > { %564 = vrot.lane.b32.xlu0 %v559_v3, %s3873_s22  ;;  %671 = vst [vmem:[#allocation1 + $0x10] ss:$2 sm:$0xff] %v666_v61  ;;  %v619_v11 = vpack.c.bf16 %v614_v9, %v614_v9  ;;  %v891_v61 = vunpack.c.h.bf16 %v873_v63 }
  0xc6   : > { %v552_v55 = vld.sshfl [vmem:[#allocation1] sm:$0xff pattern:$0x75316420]  ;;  %v553_v2 = vld.sshfl [vmem:[#allocation1 + $0x8] sm:$0xff pattern:$0x75316420]  ;;  %506 = vrot.lane.b32.xlu2 %v503_v59, %s3872_s17  ;;  %v828_v59 = vunpack.c.l.bf16 %v813_v42  ;;  %v906_v10 = vmul.f32 %v900_v6, %v891_v61 }
  0xc7   : > { %609 = vst [vmem:[#allocation1] ss:$2 sm:$0xff] %v605_v0  ;;  %504 = vrot.lane.b32.xlu1 %v502_v4, %s3872_s17  ;;  %v623_v38 = vrot.slane %v619_v11, 6  ;;  %v558_v26 = vpack.c.bf16 %v553_v2, %v552_v55  ;;  %s3888_s17 = smov 90  }
  0xc8   : > { %v4267_v16 = vpop.permute.xlu0 %1616  ;;  %v4280_v55 = vpop.permute.xlu2 %1914  ;;  %v843_v5 = vmul.f32 %v840_v58, %v828_v59  ;;  %v1053_v59 = vld [vmem:[%s4144_s30] sm:$0x3f] }
  0xcb   : > { %v674_v27 = vld.sshfl [vmem:[#allocation1 + $0x10] sm:$0xff pattern:$0x75316420]  ;;  %v4263_v31 = vpop.permute.xlu1 %1316 }
  0xcc   : > { %626 = vrot.lane.b32.xlu0 %v623_v38, %s3874_s24  ;;  %729 = vst [vmem:[#allocation1 + $0x10] ss:$2 sm:$0xff] %v724_v23  ;;  %v679_v30 = vpack.c.bf16 %v674_v27, %v674_v27  ;;  %v902_v38 = vsel %vm901_vm10, %v900_v6, %v4219_v60  ;;  %v958_v27 = vrot.slane %v4242_v52, 4  ;;  %vm631_vm10 = vcmask 1006592  }
  0xce   : > { %v612_v20 = vld.sshfl [vmem:[#allocation1] sm:$0xff pattern:$0x75316420]  ;;  %v613_v21 = vld.sshfl [vmem:[#allocation1 + $0x8] sm:$0xff pattern:$0x75316420]  ;;  %684 = vrot.lane.b32.xlu2 %v679_v30, %s3875_s26 }
  0xcf   : > { %669 = vst [vmem:[#allocation1] ss:$2 sm:$0xff] %v665_v13  ;;  %562 = vrot.lane.b32.xlu1 %v558_v26, %s3873_s22  ;;  %v618_v29 = vpack.c.bf16 %v613_v21, %v612_v20  ;;  %v933_v20 = vld [vmem:[%s4144_s30] sm:$0x3f]  ;;  %v905_v26 = vmul.f32 %v902_v38, %v890_v14  ;;  %v1068_v14 = vunpack.c.l.bf16 %v1053_v59  ;;  %s3890_s22 = smov 78  }
  0xd0   : > { %v4277_v0 = vpop.permute.xlu0 %1794  ;;  %v949_v12 = vunpack.c.h.bf16 %v933_v20  ;;  %v4290_v25 = vpop.permute.xlu2 %2094 }
  0xd1   : > { %v622_v41 = vrot.slane %v618_v29, 6 }
  0xd2   : > { %v964_v30 = vmul.f32 %v958_v27, %v949_v12 }
  0xd3   : > { %v732_v45 = vld.sshfl [vmem:[#allocation1 + $0x10] sm:$0xff pattern:$0x75316420]  ;;  %v4274_v53 = vpop.permute.xlu1 %1496 }
  0xd4   : > { %791 = vst [vmem:[#allocation1 + $0x10] ss:$2 sm:$0xff] %v786_v39  ;;  %v737_v4 = vpack.c.bf16 %v732_v45, %v732_v45  ;;  %v1020_v45 = vrot.slane %v4221_v62, 4 }
  0xd6   : > { %v672_v36 = vld.sshfl [vmem:[#allocation1] sm:$0xff pattern:$0x75316420]  ;;  %v673_v37 = vld.sshfl [vmem:[#allocation1 + $0x8] sm:$0xff pattern:$0x75316420]  ;;  %v1022_v63 = vsel %vm1021_vm12, %v1020_v45, %v4221_v62 }
  0xd7   : > { %727 = vst [vmem:[#allocation1] ss:$2 sm:$0xff] %v723_v34  ;;  %624 = vrot.lane.b32.xlu1 %v622_v41, %s3874_s24  ;;  %v678_v2 = vpack.c.bf16 %v673_v37, %v672_v36  ;;  %v741_v11 = vrot.slane %v737_v4, 6  ;;  %v948_v36 = vunpack.c.l.bf16 %v933_v20  ;;  %v960_v37 = vsel %vm959_vm11, %v958_v27, %v4242_v52  ;;  %v1113_v20 = vld [vmem:[%s4144_s30] sm:$0x3f]  ;;  %s3891_s24 = smov 77  }
  0xd8   : > { %v1129_v12 = vunpack.c.h.bf16 %v1113_v20  ;;  %v1138_v27 = vrot.slane %v4254_v8, 4  ;;  %vm1557_vm11 = vcmask 392192   ;;  %vm689_vm12 = vcmask 998400  }
  0xd9   : > { %v4288_v1 = vpop.permute.xlu0 %1974  ;;  %v963_v47 = vmul.f32 %v960_v37, %v948_v36  ;;  %v1128_v36 = vunpack.c.l.bf16 %v1113_v20  ;;  %v1318_v20 = vrot.slane %v4263_v31, 4 }
  0xdb   : > { %v794_v3 = vld.sshfl [vmem:[#allocation1 + $0x10] sm:$0xff pattern:$0x75316420]  ;;  %v4284_v13 = vpop.permute.xlu1 %1674 }
  0xdc   : > { %849 = vst [vmem:[#allocation1 + $0x10] ss:$2 sm:$0xff] %v844_v46  ;;  %v799_v21 = vpack.c.bf16 %v794_v3, %v794_v3  ;;  %v1010_v46 = vunpack.c.l.bf16 %v993_v35 }
  0xde   : > { %v730_v49 = vld.sshfl [vmem:[#allocation1] sm:$0xff pattern:$0x75316420]  ;;  %v731_v50 = vld.sshfl [vmem:[#allocation1 + $0x8] sm:$0xff pattern:$0x75316420]  ;;  %v1025_v4 = vmul.f32 %v1022_v63, %v1010_v46 }
  0xdf   : > { %789 = vst [vmem:[#allocation1] ss:$2 sm:$0xff] %v785_v51  ;;  %v736_v54 = vpack.c.bf16 %v731_v50, %v730_v49  ;;  %682 = vrot.lane.b32.xlu1 %v678_v2, %s3875_s26  ;;  %v4300_v50 = vpop.permute.xlu2 %2274  ;;  %v1069_v2 = vunpack.c.h.bf16 %v1053_v59  ;;  %s3892_s26 = smov 76  }
  0xe1   : > { %v740_v24 = vrot.slane %v736_v54, 6  ;;  %v1026_v54 = vmul.f32 %v1020_v45, %v1011_v44 }
  0xe3   : > { %742 = vrot.lane.b32.xlu0 %v740_v24, %s3876_s27  ;;  %v852_v23 = vld.sshfl [vmem:[#allocation1 + $0x10] sm:$0xff pattern:$0x75316420] }
  0xe4   : > { %911 = vst [vmem:[#allocation1 + $0x10] ss:$2 sm:$0xff] %v906_v10  ;;  %v857_v34 = vpack.c.bf16 %v852_v23, %v852_v23  ;;  %v4298_v48 = vpop.permute.xlu0 %2154 }
  0xe6   : > { %v792_v7 = vld.sshfl [vmem:[#allocation1] sm:$0xff pattern:$0x75316420]  ;;  %v793_v9 = vld.sshfl [vmem:[#allocation1 + $0x8] sm:$0xff pattern:$0x75316420] }
  0xe7   : > { %847 = vst [vmem:[#allocation1] ss:$2 sm:$0xff] %v843_v5  ;;  %v798_v17 = vpack.c.bf16 %v793_v9, %v792_v7  ;;  %744 = vrot.lane.b32.xlu1 %v741_v11, %s3876_s27  ;;  %v861_v39 = vrot.slane %v857_v34, 6  ;;  %v4295_v41 = vpop.permute.xlu1 %1856  ;;  %v1078_v5 = vrot.slane %v4232_v32, 4  ;;  %v4309_v62 = vpop.permute.xlu2 %2454  ;;  %v1144_v34 = vmul.f32 %v1138_v27, %v1129_v12  ;;  %s3893_s27 = smov 75  }
  0xe9   : > { %802 = vrot.lane.b32.xlu2 %v798_v17, %s3877_s28  ;;  %v1084_v17 = vmul.f32 %v1078_v5, %v1069_v2 }
  0xeb   : > { %804 = vrot.lane.b32.xlu0 %v799_v21, %s3877_s28  ;;  %v914_v43 = vld.sshfl [vmem:[#allocation1 + $0x10] sm:$0xff pattern:$0x75316420]  ;;  %v1080_v21 = vsel %vm1079_vm13, %v1078_v5, %v4232_v32  ;;  %v1171_v32 = vld [vmem:[%s4144_s30] sm:$0x3f]  ;;  %v1258_v5 = vrot.slane %v4247_v56, 4 }
  0xec   : > { %969 = vst [vmem:[#allocation1 + $0x10] ss:$2 sm:$0xff] %v964_v30  ;;  %v919_v24 = vpack.c.bf16 %v914_v43, %v914_v43  ;;  %v4307_v9 = vpop.permute.xlu0 %2334  ;;  %v1140_v43 = vsel %vm1139_vm14, %v1138_v27, %v4254_v8  ;;  %v1189_v44 = vunpack.c.h.bf16 %v1171_v32  ;;  %v1188_v12 = vunpack.c.l.bf16 %v1171_v32  ;;  %v4356_v32 = vld [vmem:[%s4144_s30] sm:$0x3f]  ;;  %s3894_s28 = smov 74  }
  0xed   : > { %vm1619_vm13 = vcmask 400384  }
  0xee   : > { %v850_v28 = vld.sshfl [vmem:[#allocation1] sm:$0xff pattern:$0x75316420]  ;;  %v851_v29 = vld.sshfl [vmem:[#allocation1 + $0x8] sm:$0xff pattern:$0x75316420] }
  0xef   : > { %909 = vst [vmem:[#allocation1] ss:$2 sm:$0xff] %v905_v26  ;;  %v856_v60 = vpack.c.bf16 %v851_v29, %v850_v28  ;;  %v1083_v26 = vmul.f32 %v1080_v21, %v1068_v14  ;;  %v4319_v37 = vpop.permute.xlu2 %2632 }
  0xf1   : > { %v860_v42 = vrot.slane %v856_v60, 6  ;;  %864 = vrot.lane.b32.xlu2 %v861_v39, %s3878_s29 }
  0xf2   : > { %v4304_v3 = vpop.permute.xlu1 %2034 }
  0xf3   : > { %862 = vrot.lane.b32.xlu1 %v860_v42, %s3878_s29  ;;  %v972_v58 = vld.sshfl [vmem:[#allocation1 + $0x10] sm:$0xff pattern:$0x75316420]  ;;  %s3896_s29 = smov 62  }
  0xf4   : > { %1031 = vst [vmem:[#allocation1 + $0x10] ss:$2 sm:$0xff] %v1026_v54  ;;  %v977_v61 = vpack.c.bf16 %v972_v58, %v972_v58 }
  0xf6   : > { %v912_v51 = vld.sshfl [vmem:[#allocation1] sm:$0xff pattern:$0x75316420]  ;;  %v913_v49 = vld.sshfl [vmem:[#allocation1 + $0x8] sm:$0xff pattern:$0x75316420]  ;;  %v4317_v35 = vpop.permute.xlu0 %2512 }
  0xf7   : > { %967 = vst [vmem:[#allocation1] ss:$2 sm:$0xff] %v963_v47  ;;  %v918_v52 = vpack.c.bf16 %v913_v49, %v912_v51  ;;  %v981_v10 = vrot.slane %v977_v61, 6  ;;  %v1198_v47 = vrot.slane %v4234_v33, 4  ;;  %v1143_v51 = vmul.f32 %v1140_v43, %v1128_v36 }
  0xf9   : > { %922 = vrot.lane.b32.xlu0 %v918_v52, %s3879_s7  ;;  %v1204_v54 = vmul.f32 %v1198_v47, %v1189_v44  ;;  %v1200_v27 = vsel %vm1199_vm15, %v1198_v47, %v4234_v33  ;;  %v1429_v47 = vunpack.c.h.bf16 %v4356_v32  ;;  %vm749_vm15 = vcmask 916480  }
  0xfa   : > { %v4314_v28 = vpop.permute.xlu1 %2214 }
  0xfb   : > { %924 = vrot.lane.b32.xlu1 %v919_v24, %s3879_s7  ;;  %v1034_v23 = vld.sshfl [vmem:[#allocation1 + $0x10] sm:$0xff pattern:$0x75316420]  ;;  %v1233_v24 = vld [vmem:[%s4144_s30] sm:$0x3f]  ;;  %s3897_s7 = smov 61  }
  0xfc   : > { %1089 = vst [vmem:[#allocation1 + $0x10] ss:$2 sm:$0xff] %v1084_v17  ;;  %v1039_v60 = vpack.c.bf16 %v1034_v23, %v1034_v23  ;;  %v1249_v61 = vunpack.c.h.bf16 %v1233_v24  ;;  %v1353_v23 = vld [vmem:[%s4144_s30] sm:$0x3f] }
  0xfe   : > { %v970_v6 = vld.sshfl [vmem:[#allocation1] sm:$0xff pattern:$0x75316420]  ;;  %v971_v7 = vld.sshfl [vmem:[#allocation1 + $0x8] sm:$0xff pattern:$0x75316420] }
  0xff   : > { %1029 = vst [vmem:[#allocation1] ss:$2 sm:$0xff] %v1025_v4  ;;  %v976_v11 = vpack.c.bf16 %v971_v7, %v970_v6  ;;  %v4331_v4 = vpop.permute.xlu2 %2812  ;;  %v1264_v6 = vmul.f32 %v1258_v5, %v1249_v61  ;;  %v1291_v7 = vld [vmem:[%s4144_s30] sm:$0x3f] }
 0x101   : > { %984 = vrot.lane.b32.xlu0 %v981_v10, %s3880_s9  ;;  %v980_v38 = vrot.slane %v976_v11, 6  ;;  %v1309_v11 = vunpack.c.h.bf16 %v1291_v7 }
 0x103   : > { %982 = vrot.lane.b32.xlu2 %v980_v38, %s3880_s9  ;;  %v1092_v42 = vld.sshfl [vmem:[#allocation1 + $0x10] sm:$0xff pattern:$0x75316420]  ;;  %v4324_v46 = vpop.permute.xlu1 %2392  ;;  %v4329_v8 = vpop.permute.xlu0 %2694  ;;  %v1324_v38 = vmul.f32 %v1318_v20, %v1309_v11  ;;  %s3898_s9 = smov 47  }
 0x104   : > { %1149 = vst [vmem:[#allocation1 + $0x10] ss:$2 sm:$0xff] %v1144_v34  ;;  %v1097_v45 = vpack.c.bf16 %v1092_v42, %v1092_v42  ;;  %v1378_v34 = vrot.slane %v4249_v57, 4 }
 0x106   : > { %v1032_v29 = vld.sshfl [vmem:[#allocation1] sm:$0xff pattern:$0x75316420]  ;;  %v1033_v30 = vld.sshfl [vmem:[#allocation1 + $0x8] sm:$0xff pattern:$0x75316420] }
 0x107   : > { %1087 = vst [vmem:[#allocation1] ss:$2 sm:$0xff] %v1083_v26  ;;  %v1038_v39 = vpack.c.bf16 %v1033_v30, %v1032_v29  ;;  %v1101_v59 = vrot.slane %v1097_v45, 6  ;;  %v4342_v21 = vpop.permute.xlu2 %3112  ;;  %v1369_v29 = vunpack.c.h.bf16 %v1353_v23  ;;  %v1248_v45 = vunpack.c.l.bf16 %v1233_v24 }
 0x108   : > { %4816 = vst [vmem:[#allocation4_spill] sm:$0xff] %v4342_v21 }
 0x109   : > { %1044 = vrot.lane.b32.xlu0 %v1039_v60, %s3881_s10  ;;  %v1203_v60 = vmul.f32 %v1200_v27, %v1188_v12  ;;  %v1384_v42 = vmul.f32 %v1378_v34, %v1369_v29  ;;  %v4808_v12 = vrot.slane %v4274_v53, 4 }
 0x10b   : > { %1042 = vrot.lane.b32.xlu2 %v1038_v39, %s3881_s10  ;;  %v4327_v2 = vld.sshfl [vmem:[#allocation1 + $0x10] sm:$0xff pattern:$0x75316420]  ;;  %v4339_v14 = vpop.permute.xlu0 %2932  ;;  %s3899_s10 = smov 46  }
 0x10c   : > { %1209 = vst [vmem:[#allocation1 + $0x10] ss:$2 sm:$0xff] %v1204_v54 }
 0x10d   : > { %4815 = vst [vmem:[#allocation3_spill] sm:$0xff] %v4339_v14 }
 0x10e   : > { %v1090_v49 = vld.sshfl [vmem:[#allocation1] sm:$0xff pattern:$0x75316420]  ;;  %v1091_v52 = vld.sshfl [vmem:[#allocation1 + $0x8] sm:$0xff pattern:$0x75316420]  ;;  %v4335_v17 = vpop.permute.xlu1 %2574 }
 0x10f   : > { %v1096_v63 = vpack.c.bf16 %v1091_v52, %v1090_v49  ;;  %1147 = vst [vmem:[#allocation1] ss:$2 sm:$0xff] %v1143_v51  ;;  %v4353_v43 = vpop.permute.xlu2 %3172  ;;  %v1260_v51 = vsel %vm1259_vm1, %v1258_v5, %v4247_v56  ;;  %v1438_v49 = vrot.slane %v4257_v15, 4  ;;  %v1308_v5 = vunpack.c.l.bf16 %v1291_v7 }
 0x110   : > { %4818 = vst [vmem:[#allocation6_spill] sm:$0xff] %v4353_v43  ;;  %v1263_v54 = vmul.f32 %v1260_v51, %v1248_v45  ;;  %v4382_v45 = vld [vmem:[%s4144_s30] sm:$0x3f]  ;;  %vm809_vm1 = vcmask 908288  }
 0x111   : > { %v1100_v58 = vrot.slane %v1096_v63, 6  ;;  %v1547_v7 = vunpack.c.h.bf16 %v4382_v45 }
 0x113   : > { %1104 = vrot.lane.b32.xlu2 %v1101_v59, %s3882_s11  ;;  %1102 = vrot.lane.b32.xlu1 %v1100_v58, %s3882_s11  ;;  %v4337_v10 = vld.sshfl [vmem:[#allocation1 + $0x10] sm:$0xff pattern:$0x75316420]  ;;  %v1444_v59 = vmul.f32 %v1438_v49, %v1429_v47  ;;  %v4366_v58 = vld [vmem:[%s4144_s30] sm:$0x3f]  ;;  %s3900_s11 = smov 45  }
 0x114   : > { %1269 = vst [vmem:[#allocation1 + $0x10] ss:$2 sm:$0xff] %v1264_v6  ;;  %v1489_v56 = vunpack.c.h.bf16 %v4366_v58 }
 0x116   : > { %v1150_v39 = vld.sshfl [vmem:[#allocation1] sm:$0xff pattern:$0x75316420]  ;;  %v1151_v44 = vld.sshfl [vmem:[#allocation1 + $0x8] sm:$0xff pattern:$0x75316420]  ;;  %v1504_v29 = vmul.f32 %v4808_v12, %v1489_v56  ;;  %v1380_v56 = vsel %vm1379_vm3, %v1378_v34, %v4249_v57  ;;  %v1217_v57 = vpack.c.bf16 %v4337_v10, %v4337_v10  ;;  %v1440_v10 = vsel %vm1439_vm4, %v1438_v49, %v4257_v15 }
 0x117   : > { %1207 = vst [vmem:[#allocation1] ss:$2 sm:$0xff] %v1203_v60  ;;  %v386_v11 = vpop.permute.xlu2 %385  ;;  %vm869_vm3 = vcmask 900096   ;;  %vm1739_vm4 = vcmask 416768  }
 0x11a   : > { %v4351_v36 = vpop.permute.xlu0 %2992 }
 0x11b   : > { %v4345_v26 = vld.sshfl [vmem:[#allocation1 + $0x10] sm:$0xff pattern:$0x75316420]  ;;  %4817 = vst [vmem:[#allocation5_spill] sm:$0xff] %v4351_v36 }
 0x11c   : > { %1329 = vst [vmem:[#allocation1 + $0x10] ss:$2 sm:$0xff] %v1324_v38  ;;  %v4348_v30 = vpop.permute.xlu1 %2752  ;;  %v1320_v38 = vsel %vm1319_vm2, %v1318_v20, %v4263_v31  ;;  %v1368_v20 = vunpack.c.l.bf16 %v1353_v23  ;;  %vm1677_vm2 = vcmask 408576  }
 0x11d   : > { %v1323_v60 = vmul.f32 %v1320_v38, %v1308_v5  ;;  %v4811_v5 = vrot.slane %v4259_v22, 4  ;;  %v1156_v38 = vpack.c.bf16 %v1151_v44, %v1150_v39  ;;  %v4402_v39 = vld [vmem:[%s4144_s30] sm:$0x3f]  ;;  %v1428_v44 = vunpack.c.l.bf16 %v4356_v32 }
 0x11e   : > { %v1210_v63 = vld.sshfl [vmem:[#allocation1] sm:$0xff pattern:$0x75316420]  ;;  %v1211_v6 = vld.sshfl [vmem:[#allocation1 + $0x8] sm:$0xff pattern:$0x75316420] }
 0x11f   : > { %1267 = vst [vmem:[#allocation1] ss:$2 sm:$0xff] %v1263_v54  ;;  %v445_v31 = vpop.permute.xlu2 %444  ;;  %v1562_v12 = vmul.f32 %v4811_v5, %v1547_v7  ;;  %1160 = vrot.lane.b32.xlu0 %v1156_v38, %s3861_s8  ;;  %v388_v38 = vrot.slane %v386_v11, 4 }
 0x123   : > { %v4358_v33 = vld.sshfl [vmem:[#allocation1 + $0x10] sm:$0xff pattern:$0x75316420] }
 0x124   : > { %1389 = vst [vmem:[#allocation1 + $0x10] ss:$2 sm:$0xff] %v1384_v42 }
 0x126   : > { %v4368_v61 = vpop.permute.xlu0 %3052  ;;  %v4379_v42 = vld.sshfl [vmem:[#allocation1] sm:$0xff pattern:$0x75316420]  ;;  %v4384_v47 = vld.sshfl [vmem:[#allocation1 + $0x8] sm:$0xff pattern:$0x75316420] }
 0x127   : > { %4819 = vst [vmem:[#allocation7_spill] sm:$0xff] %v4368_v61  ;;  %v507_v7 = vpop.permute.xlu2 %506  ;;  %v447_v61 = vrot.slane %v445_v31, 4  ;;  %v1443_v31 = vmul.f32 %v1440_v10, %v1428_v44  ;;  %v1488_v10 = vunpack.c.l.bf16 %v4366_v58  ;;  %v4442_v58 = vld [vmem:[%s4144_s30] sm:$0x3f] }
 0x128   : > { %1327 = vst [vmem:[#allocation1] ss:$2 sm:$0xff] %v1323_v60  ;;  %v1157_v60 = vpack.c.bf16 %v4327_v2, %v4327_v2  ;;  %v1221_v2 = vrot.slane %v1217_v57, 6  ;;  %v509_v14 = vrot.slane %v507_v7, 4 }
 0x129   : > { %v4363_v52 = vpop.permute.xlu1 %2872 }
 0x12a   : > { %1162 = vrot.lane.b32.xlu1 %v1157_v60, %s3861_s8  ;;  %v1277_v60 = vpack.c.bf16 %v4345_v26, %v4345_v26  ;;  %s3883_s8 = smov 95  }
 0x12b   : > { %v4370_v24 = vld.sshfl [vmem:[#allocation1 + $0x10] sm:$0xff pattern:$0x75316420]  ;;  %1224 = vrot.lane.b32.xlu0 %v1221_v2, %s3883_s8 }
 0x12c   : > { %1449 = vst [vmem:[#allocation1 + $0x10] ss:$2 sm:$0xff] %v1444_v59 }
 0x12e   : > { %v384_v54 = vpop.permute.xlu0 %383 }
 0x12f   : > { %v1330_v43 = vld.sshfl [vmem:[#allocation1] sm:$0xff pattern:$0x75316420]  ;;  %v1331_v23 = vld.sshfl [vmem:[#allocation1 + $0x8] sm:$0xff pattern:$0x75316420] }
 0x130   : > { %v387_v5 = vrot.slane %v384_v54, 4  ;;  %v1336_v11 = vpack.c.bf16 %v1331_v23, %v1330_v43 }
 0x131   : > { %v4375_v27 = vpop.permute.xlu1 %442 }
 0x132   : > { %v390_v32 = vsel %vm320_vm0, %v387_v5, %v388_v38  ;;  %1282 = vrot.lane.b32.xlu1 %v1277_v60, %s3884_s12  ;;  %v1276_v5 = vpack.c.bf16 %v4384_v47, %v4379_v42  ;;  %v1340_v44 = vrot.slane %v1336_v11, 6  ;;  %v4421_v47 = vld [vmem:[%s4144_s30] sm:$0x3f]  ;;  %v330_v60 = vpack.c.bf16 %v4197_v19, %v4195_v18  ;;  %v685_v11 = vpop.permute.xlu2 %684 }
 0x133   : > { %v4386_v51 = vld.sshfl [vmem:[#allocation1 + $0x10] sm:$0xff pattern:$0x75316420] }
 0x134   : > { %1509 = vst [vmem:[#allocation1 + $0x10] ss:$2 sm:$0xff] %v1504_v29  ;;  %v1383_v29 = vmul.f32 %v1380_v56, %v1368_v20  ;;  %v1216_v20 = vpack.c.bf16 %v1211_v6, %v1210_v63  ;;  %v446_v63 = vrot.slane %v4375_v27, 4  ;;  %v392_v6 = vsel %vm391_vm5, %v384_v54, %v390_v32  ;;  %1280 = vrot.lane.b32.xlu0 %v1276_v5, %s3884_s12  ;;  %s3902_s12 = smov 43  }
 0x135   : > { %394 = vst [vmem:[#allocation2] sm:$0xcc] %v392_v6  ;;  %v1667_v6 = vunpack.c.h.bf16 %v4421_v47  ;;  %v1457_v19 = vpack.c.bf16 %v4386_v51, %v4386_v51  ;;  %vm929_vm5 = vcmask 891904  }
 0x136   : > { %v565_v21 = vpop.permute.xlu0 %564  ;;  %1387 = vst [vmem:[#allocation1] ss:$2 sm:$0xff] %v1383_v29  ;;  %v1609_v29 = vunpack.c.h.bf16 %v4402_v39  ;;  %v1220_v36 = vrot.slane %v1216_v20, 6  ;;  %v448_v15 = vsel %vm320_vm0, %v446_v63, %v447_v61  ;;  %v4820_v63 = vrot.slane %v4274_v53, 4 }
 0x137   : > { %v567_v7 = vrot.slane %v565_v21, 4  ;;  %331 = vst [vmem:[#allocation2] sm:$0x33] %v330_v60 }
 0x138   : > { %1222 = vrot.lane.b32.xlu2 %v1220_v36, %s3883_s8  ;;  %v450_v36 = vsel %vm449_vm6, %v4375_v27, %v448_v15  ;;  %vm989_vm6 = vcmask 883712   ;;  %s3901_s8 = smov 44  }
 0x139   : > { %v505_v59 = vpop.permute.xlu1 %504  ;;  %452 = vst [vmem:[#allocation2 + $0x8] sm:$0x33] %v450_v36 }
 0x13a   : > { %v508_v26 = vrot.slane %v505_v59, 4 }
 0x13b   : > { %v4399_v34 = vld.sshfl [vmem:[#allocation1 + $0x10] sm:$0xff pattern:$0x75316420] }
 0x13c   : > { %1567 = vst [vmem:[#allocation1 + $0x10] ss:$2 sm:$0xff] %v1562_v12  ;;  %v1618_v12 = vrot.slane %v4267_v16, 4  ;;  %v510_v43 = vsel %vm320_vm0, %v508_v26, %v509_v14 }
 0x13d   : > { %v1390_v54 = vld.sshfl [vmem:[#allocation1] sm:$0xff pattern:$0x75316420]  ;;  %v1391_v23 = vld.sshfl [vmem:[#allocation1 + $0x8] sm:$0xff pattern:$0x75316420]  ;;  %v512_v57 = vsel %vm511_vm7, %v505_v59, %v510_v43 }
 0x13e   : > { %v627_v49 = vpop.permute.xlu0 %626  ;;  %v1624_v61 = vmul.f32 %v1618_v12, %v1609_v29  ;;  %514 = vst [vmem:[#allocation2 + $0x8] sm:$0xcc] %v512_v57  ;;  %v1396_v27 = vpack.c.bf16 %v1391_v23, %v1390_v54  ;;  %v1337_v29 = vpack.c.bf16 %v4358_v33, %v4358_v33  ;;  %v1676_v33 = vrot.slane %v4284_v13, 4 }
 0x13f   : > { %v629_v20 = vrot.slane %v627_v49, 4  ;;  %1447 = vst [vmem:[#allocation1] ss:$2 sm:$0xff] %v1443_v31  ;;  %v687_v43 = vrot.slane %v685_v11, 4  ;;  %v1461_v54 = vrot.slane %v1457_v19, 6  ;;  %v1546_v23 = vunpack.c.l.bf16 %v4382_v45 }
 0x140   : > { %1342 = vrot.lane.b32.xlu2 %v1340_v44, %s3885_s13  ;;  %1400 = vrot.lane.b32.xlu1 %v1396_v27, %s3886_s14  ;;  %v1341_v26 = vrot.slane %v1337_v29, 6  ;;  %v1682_v49 = vmul.f32 %v1676_v33, %v1667_v6  ;;  %v1397_v57 = vpack.c.bf16 %v4370_v24, %v4370_v24  ;;  %v1608_v19 = vunpack.c.l.bf16 %v4402_v39 }
 0x141   : > { %v563_v56 = vpop.permute.xlu1 %562  ;;  %vm1797_vm7 = vcmask 424960  }
 0x142   : > { %v566_v2 = vrot.slane %v563_v56, 4  ;;  %1344 = vrot.lane.b32.xlu0 %v1341_v26, %s3885_s13  ;;  %s3903_s13 = smov 42  }
 0x143   : > { %v4424_v21 = vld.sshfl [vmem:[#allocation1 + $0x10] sm:$0xff pattern:$0x75316420]  ;;  %v803_v27 = vpop.permute.xlu2 %802 }
 0x144   : > { %v568_v14 = vsel %vm320_vm0, %v566_v2, %v567_v7  ;;  %1629 = vst [vmem:[#allocation1 + $0x10] ss:$2 sm:$0xff] %v1624_v61  ;;  %v4821_v7 = vrot.slane %v4259_v22, 4 }
 0x145   : > { %v570_v59 = vsel %vm569_vm8, %v563_v56, %v568_v14  ;;  %v1500_v56 = vsel %vm1499_vm9, %v4820_v63, %v4274_v53  ;;  %v1738_v14 = vrot.slane %v4269_v40, 4  ;;  %vm1049_vm8 = vcmask 875520  }
 0x146   : > { %572 = vst [vmem:[#allocation2 + $0x10] sm:$0x33] %v570_v59  ;;  %v1503_v53 = vmul.f32 %v1500_v56, %v1488_v10  ;;  %v1450_v31 = vld.sshfl [vmem:[#allocation1] sm:$0xff pattern:$0x75316420]  ;;  %v1558_v2 = vsel %vm1557_vm11, %v4821_v7, %v4259_v22  ;;  %vm1859_vm9 = vcmask 433152  }
 0x147   : > { %v1451_v5 = vld.sshfl [vmem:[#allocation1 + $0x8] sm:$0xff pattern:$0x75316420]  ;;  %v1561_v24 = vmul.f32 %v1558_v2, %v1546_v23  ;;  %v4459_v22 = vld [vmem:[%s4144_s30] sm:$0x3f] }
 0x148   : > { %1507 = vst [vmem:[#allocation1] ss:$2 sm:$0xff] %v1503_v53  ;;  %v1456_v61 = vpack.c.bf16 %v1451_v5, %v1450_v31  ;;  %1402 = vrot.lane.b32.xlu2 %v1397_v57, %s3886_s14  ;;  %1464 = vrot.lane.b32.xlu1 %v1461_v54, %s3887_s15  ;;  %v1575_v53 = vpack.c.bf16 %v4424_v21, %v4424_v21  ;;  %v1796_v21 = vrot.slane %v4277_v0, 4  ;;  %v4478_v23 = vld [vmem:[%s4144_s30] sm:$0x3f]  ;;  %s3905_s14 = smov 30  }
 0x149   : > { %v625_v42 = vpop.permute.xlu1 %624  ;;  %v1620_v5 = vsel %vm1619_vm13, %v1618_v12, %v4267_v16  ;;  %v1517_v12 = vpack.c.bf16 %v4399_v34, %v4399_v34  ;;  %v1678_v34 = vsel %vm1677_vm2, %v1676_v33, %v4284_v13  ;;  %vm1977_vm13 = vcmask 523264  }
 0x14a   : > { %v628_v38 = vrot.slane %v625_v42, 4  ;;  %v1460_v59 = vrot.slane %v1456_v61, 6  ;;  %v1579_v57 = vrot.slane %v1575_v53, 6  ;;  %vm2157_vm2 = vcmask 547840  }
 0x14b   : > { %v865_v54 = vpop.permute.xlu2 %864 }
 0x14c   : > { %v630_v32 = vsel %vm320_vm0, %v628_v38, %v629_v20  ;;  %v4454_v20 = vld.sshfl [vmem:[#allocation1 + $0x10] sm:$0xff pattern:$0x75316420]  ;;  %v806_v38 = vrot.slane %v803_v27, 4  ;;  %1462 = vrot.lane.b32.xlu0 %v1460_v59, %s3887_s15  ;;  %v867_v61 = vrot.slane %v865_v54, 4  ;;  %v1849_v59 = vunpack.c.h.bf16 %v4478_v23  ;;  %s3907_s15 = smov 28  }
 0x14d   : > { %v632_v18 = vsel %vm631_vm10, %v625_v42, %v630_v32  ;;  %v1729_v42 = vunpack.c.h.bf16 %v4442_v58  ;;  %1687 = vst [vmem:[#allocation1 + $0x10] ss:$2 sm:$0xff] %v1682_v49  ;;  %vm1917_vm10 = vcmask 441344  }
 0x14e   : > { %634 = vst [vmem:[#allocation2 + $0x10] sm:$0xcc] %v632_v18 }
 0x14f   : > { %v1744_v29 = vmul.f32 %v1738_v14, %v1729_v42  ;;  %v1510_v32 = vld.sshfl [vmem:[#allocation1] sm:$0xff pattern:$0x75316420]  ;;  %v1511_v63 = vld.sshfl [vmem:[#allocation1 + $0x8] sm:$0xff pattern:$0x75316420] }
 0x150   : > { %v1516_v6 = vpack.c.bf16 %v1511_v63, %v1510_v32  ;;  %1565 = vst [vmem:[#allocation1] ss:$2 sm:$0xff] %v1561_v24 }
 0x151   : > { %v683_v36 = vpop.permute.xlu1 %682 }
 0x152   : > { %v686_v51 = vrot.slane %v683_v36, 4  ;;  %1520 = vrot.lane.b32.xlu2 %v1516_v6, %s3888_s17 }
 0x154   : > { %v688_v44 = vsel %vm320_vm0, %v686_v51, %v687_v43  ;;  %v4468_v31 = vld.sshfl [vmem:[#allocation1 + $0x10] sm:$0xff pattern:$0x75316420]  ;;  %v1623_v51 = vmul.f32 %v1620_v5, %v1608_v19  ;;  %1522 = vrot.lane.b32.xlu0 %v1517_v12, %s3888_s17  ;;  %v1728_v19 = vunpack.c.l.bf16 %v4442_v58  ;;  %s3908_s17 = smov 27  }
 0x155   : > { %v743_v15 = vpop.permute.xlu0 %742  ;;  %v690_v45 = vsel %vm689_vm12, %v683_v36, %v688_v44  ;;  %v1787_v36 = vunpack.c.h.bf16 %v4459_v22  ;;  %1749 = vst [vmem:[#allocation1 + $0x10] ss:$2 sm:$0xff] %v1744_v29  ;;  %v4497_v29 = vld [vmem:[%s4144_s30] sm:$0x3f]  ;;  %v1695_v5 = vpack.c.bf16 %v4468_v31, %v4468_v31  ;;  %vm1109_vm12 = vcmask 867328  }
 0x156   : > { %692 = vst [vmem:[#allocation2 + $0x18] sm:$0x33] %v690_v45  ;;  %v746_v60 = vrot.slane %v743_v15, 4 }
 0x157   : > { %v1802_v16 = vmul.f32 %v1796_v21, %v1787_v36  ;;  %v1568_v7 = vld.sshfl [vmem:[#allocation1] sm:$0xff pattern:$0x75316420] }
 0x159   : > { %v745_v56 = vpop.permute.xlu1 %744 }
 0x15a   : > { %v747_v11 = vrot.slane %v745_v56, 4  ;;  %1582 = vrot.lane.b32.xlu2 %v1579_v57, %s3859_s6  ;;  %v1699_v57 = vrot.slane %v1695_v5, 6 }
 0x15c   : > { %v748_v26 = vsel %vm320_vm0, %v746_v60, %v747_v11 }
 0x15d   : > { %v805_v10 = vpop.permute.xlu0 %804  ;;  %v750_v39 = vsel %vm749_vm15, %v743_v15, %v748_v26  ;;  %v1569_v15 = vld.sshfl [vmem:[#allocation1 + $0x8] sm:$0xff pattern:$0x75316420]  ;;  %v983_v53 = vpop.permute.xlu2 %982  ;;  %v1740_v26 = vsel %vm1739_vm4, %v1738_v14, %v4269_v40  ;;  %v1916_v40 = vrot.slane %v4280_v55, 4  ;;  %vm2037_vm15 = vcmask 531456  }
 0x15e   : > { %v807_v18 = vrot.slane %v805_v10, 4  ;;  %752 = vst [vmem:[#allocation2 + $0x18] sm:$0xcc] %v750_v39  ;;  %v1574_v44 = vpack.c.bf16 %v1569_v15, %v1568_v7  ;;  %v1858_v10 = vrot.slane %v4295_v41, 4  ;;  %v1743_v58 = vmul.f32 %v1740_v26, %v1728_v19  ;;  %v4534_v26 = vld [vmem:[%s4144_s30] sm:$0x3f] }
 0x15f   : > { %1627 = vst [vmem:[#allocation1] ss:$2 sm:$0xff] %v1623_v51  ;;  %v986_v51 = vrot.slane %v983_v53, 4  ;;  %vm1167_vm4 = vcmask 785408  }
 0x160   : > { %v808_v49 = vsel %vm320_vm0, %v806_v38, %v807_v18  ;;  %v1578_v45 = vrot.slane %v1574_v44, 6  ;;  %v4486_v38 = vld.sshfl [vmem:[#allocation1 + $0x10] sm:$0xff pattern:$0x75316420]  ;;  %v1864_v63 = vmul.f32 %v1858_v10, %v1849_v59  ;;  %v1786_v44 = vunpack.c.l.bf16 %v4459_v22  ;;  %v4524_v59 = vld [vmem:[%s4144_s30] sm:$0x3f] }
 0x161   : > { %v810_v43 = vsel %vm809_vm1, %v803_v27, %v808_v49  ;;  %v1666_v27 = vunpack.c.l.bf16 %v4421_v47  ;;  %1807 = vst [vmem:[#allocation1 + $0x10] ss:$2 sm:$0xff] %v1802_v16  ;;  %v1637_v49 = vpack.c.bf16 %v4454_v20, %v4454_v20  ;;  %v1757_v15 = vpack.c.bf16 %v4486_v38, %v4486_v38 }
 0x162   : > { %812 = vst [vmem:[#allocation2 + $0x20] sm:$0x33] %v810_v43  ;;  %1580 = vrot.lane.b32.xlu1 %v1578_v45, %s3859_s6  ;;  %s3889_s6 = smov 79   ;;  %v1907_v43 = vunpack.c.h.bf16 %v4497_v29  ;;  %v1798_v45 = vsel %vm1797_vm7, %v1796_v21, %v4277_v0  ;;  %v1967_v21 = vunpack.c.h.bf16 %v4524_v59  ;;  %vm2097_vm1 = vcmask 539648  }
 0x163   : > { %v1681_v32 = vmul.f32 %v1678_v34, %v1666_v27  ;;  %v1801_v34 = vmul.f32 %v1798_v45, %v1786_v44  ;;  %v1966_v44 = vunpack.c.l.bf16 %v4524_v59  ;;  %vm2337_vm7 = vcmask 572416  }
 0x164   : > { %v1922_v31 = vmul.f32 %v1916_v40, %v1907_v43 }
 0x165   : > { %v863_v2 = vpop.permute.xlu1 %862 }
 0x166   : > { %v866_v42 = vrot.slane %v863_v2, 4  ;;  %v1630_v13 = vld.sshfl [vmem:[#allocation1] sm:$0xff pattern:$0x75316420] }
 0x167   : > { %v1631_v33 = vld.sshfl [vmem:[#allocation1 + $0x8] sm:$0xff pattern:$0x75316420] }
 0x168   : > { %v868_v24 = vsel %vm320_vm0, %v866_v42, %v867_v61  ;;  %v1636_v6 = vpack.c.bf16 %v1631_v33, %v1630_v13  ;;  %1685 = vst [vmem:[#allocation1] ss:$2 sm:$0xff] %v1681_v32  ;;  %v1810_v39 = vld.sshfl [vmem:[#allocation1 + $0x10] sm:$0xff pattern:$0x75316420]  ;;  %v1848_v33 = vunpack.c.l.bf16 %v4478_v23 }
 0x169   : > { %v870_v60 = vsel %vm869_vm3, %v863_v2, %v868_v24  ;;  %1869 = vst [vmem:[#allocation1 + $0x10] ss:$2 sm:$0xff] %v1864_v63  ;;  %v1043_v24 = vpop.permute.xlu2 %1042  ;;  %vm2217_vm3 = vcmask 556032  }
 0x16a   : > { %872 = vst [vmem:[#allocation2 + $0x20] sm:$0xcc] %v870_v60  ;;  %1640 = vrot.lane.b32.xlu0 %v1636_v6, %s3889_s6  ;;  %1642 = vrot.lane.b32.xlu1 %v1637_v49, %s3889_s6  ;;  %v1046_v22 = vrot.slane %v1043_v24, 4  ;;  %v1976_v6 = vrot.slane %v4288_v1, 4  ;;  %s3909_s6 = smov 59  }
 0x16b   : > { %v923_v47 = vpop.permute.xlu0 %922 }
 0x16c   : > { %v926_v11 = vrot.slane %v923_v47, 4 }
 0x16d   : > { %v925_v56 = vpop.permute.xlu1 %924 }
 0x16e   : > { %v927_v18 = vrot.slane %v925_v56, 4  ;;  %v1815_v56 = vpack.c.bf16 %v1810_v39, %v1810_v39 }
 0x16f   : > { %v1688_v16 = vld.sshfl [vmem:[#allocation1] sm:$0xff pattern:$0x75316420]  ;;  %v1689_v12 = vld.sshfl [vmem:[#allocation1 + $0x8] sm:$0xff pattern:$0x75316420] }
 0x170   : > { %v928_v36 = vsel %vm320_vm0, %v926_v11, %v927_v18  ;;  %v1694_v7 = vpack.c.bf16 %v1689_v12, %v1688_v16  ;;  %1747 = vst [vmem:[#allocation1] ss:$2 sm:$0xff] %v1743_v58  ;;  %v4518_v27 = vld.sshfl [vmem:[#allocation1 + $0x10] sm:$0xff pattern:$0x75316420]  ;;  %v1860_v11 = vsel %vm1859_vm9, %v1858_v10, %v4295_v41  ;;  %v1982_v18 = vmul.f32 %v1976_v6, %v1967_v21 }
 0x171   : > { %v930_v54 = vsel %vm929_vm5, %v923_v47, %v928_v36  ;;  %1927 = vst [vmem:[#allocation1 + $0x10] ss:$2 sm:$0xff] %v1922_v31  ;;  %v1105_v19 = vpop.permute.xlu2 %1104  ;;  %v1819_v49 = vrot.slane %v1815_v56, 6  ;;  %v1906_v41 = vunpack.c.l.bf16 %v4497_v29  ;;  %vm2277_vm5 = vcmask 564224  }
 0x172   : > { %932 = vst [vmem:[#allocation2 + $0x28] sm:$0x33] %v930_v54  ;;  %1702 = vrot.lane.b32.xlu0 %v1699_v57, %s3890_s22  ;;  %v1698_v42 = vrot.slane %v1694_v7, 6  ;;  %1762 = vrot.lane.b32.xlu1 %v1757_v15, %s3891_s24  ;;  %v1107_v54 = vrot.slane %v1105_v19, 4  ;;  %v1918_v57 = vsel %vm1917_vm10, %v1916_v40, %v4280_v55  ;;  %v1877_v55 = vpack.c.bf16 %v4518_v27, %v4518_v27 }
 0x173   : > { %v985_v14 = vpop.permute.xlu0 %984  ;;  %v1921_v12 = vmul.f32 %v1918_v57, %v1906_v41  ;;  %v2026_v27 = vunpack.c.l.bf16 %v4534_v26  ;;  %vm1407_vm9 = vcmask 752640   ;;  %vm1587_vm10 = vcmask 654336  }
 0x174   : > { %v987_v20 = vrot.slane %v985_v14, 4  ;;  %1700 = vrot.lane.b32.xlu2 %v1698_v42, %s3890_s22  ;;  %v2027_v14 = vunpack.c.h.bf16 %v4534_v26  ;;  %v1978_v42 = vsel %vm1977_vm13, %v1976_v6, %v4288_v1 }
 0x176   : > { %v988_v2 = vsel %vm320_vm0, %v986_v51, %v987_v20  ;;  %v2036_v20 = vrot.slane %v4304_v3, 4 }
 0x177   : > { %v990_v61 = vsel %vm989_vm6, %v983_v53, %v988_v2  ;;  %v1750_v47 = vld.sshfl [vmem:[#allocation1] sm:$0xff pattern:$0x75316420]  ;;  %v1751_v32 = vld.sshfl [vmem:[#allocation1 + $0x8] sm:$0xff pattern:$0x75316420]  ;;  %v1863_v53 = vmul.f32 %v1860_v11, %v1848_v33 }
 0x178   : > { %992 = vst [vmem:[#allocation2 + $0x28] sm:$0xcc] %v990_v61  ;;  %v1756_v63 = vpack.c.bf16 %v1751_v32, %v1750_v47  ;;  %v1930_v5 = vld.sshfl [vmem:[#allocation1 + $0x10] sm:$0xff pattern:$0x75316420]  ;;  %v2042_v16 = vmul.f32 %v2036_v20, %v2027_v14  ;;  %v2038_v21 = vsel %vm2037_vm15, %v2036_v20, %v4304_v3  ;;  %v2156_v33 = vrot.slane %v4298_v48, 4 }
 0x179   : > { %1805 = vst [vmem:[#allocation1] ss:$2 sm:$0xff] %v1801_v34  ;;  %v2071_v61 = vld [vmem:[%s4144_s30] sm:$0x3f]  ;;  %v1935_v40 = vpack.c.bf16 %v1930_v5, %v1930_v5  ;;  %v2041_v56 = vmul.f32 %v2038_v21, %v2026_v27  ;;  %vm1229_vm6 = vcmask 777216   ;;  %vm2457_vm15 = vcmask 662528  }
 0x17a   : > { %1760 = vrot.lane.b32.xlu0 %v1756_v63, %s3891_s24  ;;  %1987 = vst [vmem:[#allocation1 + $0x10] ss:$2 sm:$0xff] %v1982_v18  ;;  %v2087_v45 = vunpack.c.h.bf16 %v2071_v61  ;;  %v2129_v63 = vld [vmem:[%s4144_s30] sm:$0x3f] }
 0x17b   : > { %v1045_v38 = vpop.permute.xlu0 %1044  ;;  %v1939_v34 = vrot.slane %v1935_v40, 6  ;;  %v2146_v57 = vunpack.c.l.bf16 %v2129_v63  ;;  %v4576_v27 = vld [vmem:[%s4144_s30] sm:$0x3f] }
 0x17c   : > { %v1047_v60 = vrot.slane %v1045_v38, 4  ;;  %v1981_v38 = vmul.f32 %v1978_v42, %v1966_v44 }
 0x17e   : > { %v1048_v0 = vsel %vm320_vm0, %v1046_v22, %v1047_v60 }
 0x17f   : > { %v1050_v13 = vsel %vm1049_vm8, %v1043_v24, %v1048_v0  ;;  %v2096_v24 = vrot.slane %v4290_v25, 4  ;;  %vm1287_vm8 = vcmask 769024  }
 0x180   : > { %1052 = vst [vmem:[#allocation2 + $0x30] sm:$0x33] %v1050_v13  ;;  %v1808_v36 = vld.sshfl [vmem:[#allocation1] sm:$0xff pattern:$0x75316420]  ;;  %v2147_v13 = vunpack.c.h.bf16 %v2129_v63 }
 0x181   : > { %v1809_v43 = vld.sshfl [vmem:[#allocation1 + $0x8] sm:$0xff pattern:$0x75316420]  ;;  %v1990_v2 = vld.sshfl [vmem:[#allocation1 + $0x10] sm:$0xff pattern:$0x75316420]  ;;  %v2102_v47 = vmul.f32 %v2096_v24, %v2087_v45  ;;  %v2098_v5 = vsel %vm2097_vm1, %v2096_v24, %v4290_v25  ;;  %v2158_v25 = vsel %vm2157_vm2, %v2156_v33, %v4298_v48 }
 0x182   : > { %v1814_v39 = vpack.c.bf16 %v1809_v43, %v1808_v36  ;;  %1867 = vst [vmem:[#allocation1] ss:$2 sm:$0xff] %v1863_v53  ;;  %1822 = vrot.lane.b32.xlu0 %v1819_v49, %s3892_s26  ;;  %v1995_v32 = vpack.c.bf16 %v1990_v2, %v1990_v2  ;;  %v2162_v18 = vmul.f32 %v2156_v33, %v2147_v13  ;;  %v2191_v53 = vld [vmem:[%s4144_s30] sm:$0x3f]  ;;  %v2086_v49 = vunpack.c.l.bf16 %v2071_v61 }
 0x183   : > { %2047 = vst [vmem:[#allocation1 + $0x10] ss:$2 sm:$0xff] %v2042_v16  ;;  %v2207_v36 = vunpack.c.h.bf16 %v2191_v53  ;;  %v2276_v16 = vrot.slane %v4300_v50, 4  ;;  %v4567_v61 = vld [vmem:[%s4144_s30] sm:$0x3f]  ;;  %v2206_v42 = vunpack.c.l.bf16 %v2191_v53  ;;  %vm1469_vm1 = vcmask 744448  }
 0x184   : > { %v1818_v10 = vrot.slane %v1814_v39, 6  ;;  %v2101_v43 = vmul.f32 %v2098_v5, %v2086_v49  ;;  %v2327_v45 = vunpack.c.h.bf16 %v4567_v61  ;;  %vm2515_vm2 = vcmask 670720  }
 0x185   : > { %v1103_v23 = vpop.permute.xlu1 %1102  ;;  %v2278_v49 = vsel %vm2277_vm5, %v2276_v16, %v4300_v50  ;;  %vm1527_vm5 = vcmask 736256  }
 0x186   : > { %v1106_v58 = vrot.slane %v1103_v23, 4  ;;  %1820 = vrot.lane.b32.xlu2 %v1818_v10, %s3892_s26  ;;  %v4561_v10 = vld [vmem:[%s4144_s30] sm:$0x3f]  ;;  %s3910_s26 = smov 26  }
 0x188   : > { %v1108_v51 = vsel %vm320_vm0, %v1106_v58, %v1107_v54 }
 0x189   : > { %v1110_v31 = vsel %vm1109_vm12, %v1103_v23, %v1108_v51  ;;  %v1870_v7 = vld.sshfl [vmem:[#allocation1] sm:$0xff pattern:$0x75316420]  ;;  %v1871_v29 = vld.sshfl [vmem:[#allocation1 + $0x8] sm:$0xff pattern:$0x75316420] }
 0x18a   : > { %1112 = vst [vmem:[#allocation2 + $0x30] sm:$0xcc] %v1110_v31  ;;  %v1876_v15 = vpack.c.bf16 %v1871_v29, %v1870_v7  ;;  %v2050_v0 = vld.sshfl [vmem:[#allocation1 + $0x10] sm:$0xff pattern:$0x75316420]  ;;  %v2216_v23 = vrot.slane %v4314_v28, 4  ;;  %v2267_v31 = vunpack.c.h.bf16 %v4561_v10 }
 0x18b   : > { %1925 = vst [vmem:[#allocation1] ss:$2 sm:$0xff] %v1921_v12  ;;  %v2055_v3 = vpack.c.bf16 %v2050_v0, %v2050_v0  ;;  %v2161_v12 = vmul.f32 %v2158_v25, %v2146_v57  ;;  %vm1349_vm12 = vcmask 760832  }
 0x18c   : > { %1880 = vrot.lane.b32.xlu1 %v1876_v15, %s3893_s27  ;;  %2107 = vst [vmem:[#allocation1 + $0x10] ss:$2 sm:$0xff] %v2102_v47  ;;  %v2222_v14 = vmul.f32 %v2216_v23, %v2207_v36  ;;  %v2282_v15 = vmul.f32 %v2276_v16, %v2267_v31  ;;  %v2218_v24 = vsel %vm2217_vm3, %v2216_v23, %v4314_v28 }
 0x18d   : > { %v2059_v54 = vrot.slane %v2055_v3, 6  ;;  %v2221_v47 = vmul.f32 %v2218_v24, %v2206_v42  ;;  %v2394_v3 = vrot.slane %v4324_v46, 4  ;;  %v4611_v24 = vld [vmem:[%s4144_s30] sm:$0x3f] }
 0x18e   : > { %1882 = vrot.lane.b32.xlu2 %v1877_v55, %s3893_s27  ;;  %s3911_s27 = smov 58  }
 0x192   : > { %v1928_v22 = vld.sshfl [vmem:[#allocation1] sm:$0xff pattern:$0x75316420]  ;;  %v1929_v60 = vld.sshfl [vmem:[#allocation1 + $0x8] sm:$0xff pattern:$0x75316420]  ;;  %v1223_v55 = vpop.permute.xlu2 %1222 }
 0x193   : > { %v1934_v59 = vpack.c.bf16 %v1929_v60, %v1928_v22  ;;  %1985 = vst [vmem:[#allocation1] ss:$2 sm:$0xff] %v1981_v38  ;;  %v2110_v26 = vld.sshfl [vmem:[#allocation1 + $0x10] sm:$0xff pattern:$0x75316420]  ;;  %v1161_v38 = vpop.permute.xlu0 %1160  ;;  %v1226_v53 = vrot.slane %v1223_v55, 4 }
 0x194   : > { %1942 = vrot.lane.b32.xlu1 %v1939_v34, %s3894_s28  ;;  %2167 = vst [vmem:[#allocation1 + $0x10] ss:$2 sm:$0xff] %v2162_v18  ;;  %v2115_v48 = vpack.c.bf16 %v2110_v26, %v2110_v26  ;;  %v2336_v34 = vrot.slane %v4307_v9, 4 }
 0x195   : > { %v1938_v1 = vrot.slane %v1934_v59, 6  ;;  %v1164_v59 = vrot.slane %v1161_v38, 4 }
 0x196   : > { %2000 = vrot.lane.b32.xlu2 %v1995_v32, %s3847_s25  ;;  %v2342_v0 = vmul.f32 %v2336_v34, %v2327_v45  ;;  %v2338_v31 = vsel %vm2337_vm7, %v2336_v34, %v4307_v9  ;;  %v2384_v34 = vunpack.c.l.bf16 %v4576_v27  ;;  %vm1647_vm7 = vcmask 646144  }
 0x197   : > { %1940 = vrot.lane.b32.xlu0 %v1938_v1, %s3894_s28  ;;  %s3913_s28 = smov 60  }
 0x19a   : > { %v1988_v6 = vld.sshfl [vmem:[#allocation1] sm:$0xff pattern:$0x75316420]  ;;  %v1989_v11 = vld.sshfl [vmem:[#allocation1 + $0x8] sm:$0xff pattern:$0x75316420]  ;;  %v4581_v33 = vpop.permute.xlu2 %1342 }
 0x19b   : > { %v1994_v19 = vpack.c.bf16 %v1989_v11, %v1988_v6  ;;  %2045 = vst [vmem:[#allocation1] ss:$2 sm:$0xff] %v2041_v56  ;;  %v2170_v51 = vld.sshfl [vmem:[#allocation1 + $0x10] sm:$0xff pattern:$0x75316420]  ;;  %v2385_v11 = vunpack.c.h.bf16 %v4576_v27 }
 0x19c   : > { %2227 = vst [vmem:[#allocation1 + $0x10] ss:$2 sm:$0xff] %v2222_v14  ;;  %v2175_v40 = vpack.c.bf16 %v2170_v51, %v2170_v51  ;;  %v1163_v22 = vpop.permute.xlu1 %1162  ;;  %v2326_v51 = vunpack.c.l.bf16 %v4567_v61 }
 0x19d   : > { %1998 = vrot.lane.b32.xlu1 %v1994_v19, %s3847_s25  ;;  %s3895_s25 = smov 63   ;;  %v1165_v32 = vrot.slane %v1163_v22, 4  ;;  %v1225_v18 = vpop.permute.xlu0 %1224  ;;  %v2266_v19 = vunpack.c.l.bf16 %v4561_v10  ;;  %v1346_v22 = vrot.slane %v4581_v33, 4 }
 0x19e   : > { %v2179_v60 = vrot.slane %v2175_v40, 6  ;;  %v1227_v26 = vrot.slane %v1225_v18, 4 }
 0x19f   : > { %v1166_v21 = vsel %vm320_vm0, %v1164_v59, %v1165_v32  ;;  %v2505_v59 = vunpack.c.h.bf16 %v4611_v24 }
 0x1a0   : > { %v1168_v56 = vsel %vm1167_vm4, %v1161_v38, %v1166_v21  ;;  %v1228_v36 = vsel %vm320_vm0, %v1226_v53, %v1227_v26 }
 0x1a1   : > { %1170 = vst [vmem:[#allocation2 + $0x38] sm:$0x33] %v1168_v56  ;;  %v1230_v23 = vsel %vm1229_vm6, %v1223_v55, %v1228_v36  ;;  %v2341_v55 = vmul.f32 %v2338_v31, %v2326_v51  ;;  %vm2577_vm6 = vcmask 678912  }
 0x1a2   : > { %v2048_v39 = vld.sshfl [vmem:[#allocation1] sm:$0xff pattern:$0x75316420]  ;;  %v2049_v58 = vld.sshfl [vmem:[#allocation1 + $0x8] sm:$0xff pattern:$0x75316420]  ;;  %v1403_v50 = vpop.permute.xlu2 %1402 }
 0x1a3   : > { %v2054_v41 = vpack.c.bf16 %v2049_v58, %v2048_v39  ;;  %2105 = vst [vmem:[#allocation1] ss:$2 sm:$0xff] %v2101_v43  ;;  %v4569_v44 = vld.sshfl [vmem:[#allocation1 + $0x10] sm:$0xff pattern:$0x75316420]  ;;  %v2400_v43 = vmul.f32 %v2394_v3, %v2385_v11  ;;  %v2281_v58 = vmul.f32 %v2278_v49, %v2266_v19 }
 0x1a4   : > { %2287 = vst [vmem:[#allocation1 + $0x10] ss:$2 sm:$0xff] %v2282_v15  ;;  %v1283_v5 = vpop.permute.xlu1 %1282  ;;  %v4626_v11 = vld [vmem:[%s4144_s30] sm:$0x3f] }
 0x1a5   : > { %2062 = vrot.lane.b32.xlu1 %v2059_v54, %s3895_s25  ;;  %v2058_v20 = vrot.slane %v2054_v41, 6  ;;  %1232 = vst [vmem:[#allocation2 + $0x38] sm:$0xcc] %v1230_v23  ;;  %v4596_v41 = vld [vmem:[%s4144_s30] sm:$0x3f]  ;;  %v1285_v57 = vrot.slane %v1283_v5, 4 }
 0x1a6   : > { %v1281_v10 = vpop.permute.xlu0 %1280  ;;  %v2447_v25 = vunpack.c.h.bf16 %v4596_v41  ;;  %v2576_v23 = vrot.slane %v4335_v17, 4 }
 0x1a7   : > { %2060 = vrot.lane.b32.xlu0 %v2058_v20, %s3895_s25  ;;  %v1284_v20 = vrot.slane %v1281_v10, 4 }
 0x1aa   : > { %v2108_v7 = vld.sshfl [vmem:[#allocation1] sm:$0xff pattern:$0x75316420]  ;;  %v2109_v29 = vld.sshfl [vmem:[#allocation1 + $0x8] sm:$0xff pattern:$0x75316420] }
 0x1ab   : > { %v2114_v2 = vpack.c.bf16 %v2109_v29, %v2108_v7  ;;  %2165 = vst [vmem:[#allocation1] ss:$2 sm:$0xff] %v2161_v12  ;;  %v4579_v13 = vld.sshfl [vmem:[#allocation1 + $0x10] sm:$0xff pattern:$0x75316420]  ;;  %v1405_v12 = vrot.slane %v1403_v50, 4  ;;  %v1286_v7 = vsel %vm320_vm0, %v1284_v20, %v1285_v57 }
 0x1ac   : > { %2347 = vst [vmem:[#allocation1 + $0x10] ss:$2 sm:$0xff] %v2342_v0  ;;  %v1288_v15 = vsel %vm1287_vm8, %v1281_v10, %v1286_v7  ;;  %v1521_v27 = vpop.permute.xlu2 %1520  ;;  %v4639_v50 = vld [vmem:[%s4144_s30] sm:$0x3f]  ;;  %vm2635_vm8 = vcmask 687104  }
 0x1ad   : > { %2118 = vrot.lane.b32.xlu2 %v2114_v2, %s3896_s29  ;;  %v2456_v2 = vrot.slane %v4309_v62, 4  ;;  %1290 = vst [vmem:[#allocation2 + $0x40] sm:$0x33] %v1288_v15  ;;  %v1524_v20 = vrot.slane %v1521_v27, 4  ;;  %v2625_v31 = vunpack.c.h.bf16 %v4639_v50 }
 0x1af   : > { %2120 = vrot.lane.b32.xlu0 %v2115_v48, %s3896_s29  ;;  %v2462_v45 = vmul.f32 %v2456_v2, %v2447_v25  ;;  %v2458_v49 = vsel %vm2457_vm15, %v2456_v2, %v4309_v62  ;;  %vm2755_vm15 = vcmask 703488  }
 0x1b2   : > { %v2168_v63 = vld.sshfl [vmem:[#allocation1] sm:$0xff pattern:$0x75316420]  ;;  %v2169_v1 = vld.sshfl [vmem:[#allocation1 + $0x8] sm:$0xff pattern:$0x75316420]  ;;  %v1401_v16 = vpop.permute.xlu1 %1400 }
 0x1b3   : > { %v2174_v28 = vpack.c.bf16 %v2169_v1, %v2168_v63  ;;  %2225 = vst [vmem:[#allocation1] ss:$2 sm:$0xff] %v2221_v47  ;;  %v4593_v14 = vld.sshfl [vmem:[#allocation1 + $0x10] sm:$0xff pattern:$0x75316420]  ;;  %v1404_v29 = vrot.slane %v1401_v16, 4  ;;  %v2396_v47 = vsel %vm1587_vm10, %v2394_v3, %v4324_v46  ;;  %v2567_v3 = vunpack.c.h.bf16 %v4626_v11 }
 0x1b4   : > { %2405 = vst [vmem:[#allocation1 + $0x10] ss:$2 sm:$0xff] %v2400_v43  ;;  %v1345_v38 = vpop.permute.xlu0 %1344  ;;  %v2514_v1 = vrot.slane %v4317_v35, 4  ;;  %v2399_v21 = vmul.f32 %v2396_v47, %v2384_v34  ;;  %v1583_v62 = vpop.permute.xlu2 %1582 }
 0x1b5   : > { %2182 = vrot.lane.b32.xlu2 %v2179_v60, %s3897_s7  ;;  %v2178_v6 = vrot.slane %v2174_v28, 6  ;;  %v1406_v61 = vsel %vm320_vm0, %v1404_v29, %v1405_v12  ;;  %v1347_v60 = vrot.slane %v1345_v38, 4  ;;  %v2582_v10 = vmul.f32 %v2576_v23, %v2567_v3 }
 0x1b6   : > { %v1408_v9 = vsel %vm1407_vm9, %v1401_v16, %v1406_v61  ;;  %v2504_v16 = vunpack.c.l.bf16 %v4611_v24  ;;  %v2516_v7 = vsel %vm2515_vm2, %v2514_v1, %v4317_v35  ;;  %v1585_v29 = vrot.slane %v1583_v62, 4 }
 0x1b7   : > { %2180 = vrot.lane.b32.xlu1 %v2178_v6, %s3897_s7  ;;  %1410 = vst [vmem:[#allocation2 + $0x48] sm:$0x33] %v1408_v9  ;;  %v1348_v32 = vsel %vm320_vm0, %v1346_v22, %v1347_v60  ;;  %v2520_v6 = vmul.f32 %v2514_v1, %v2505_v59  ;;  %v2634_v61 = vrot.slane %v4319_v37, 4  ;;  %v4651_v59 = vld [vmem:[%s4144_s30] sm:$0x3f]  ;;  %vm1707_vm9 = vcmask 637952  }
 0x1b8   : > { %v1350_v63 = vsel %vm1349_vm12, %v4581_v33, %v1348_v32  ;;  %v2446_v33 = vunpack.c.l.bf16 %v4596_v41  ;;  %v2624_v62 = vunpack.c.l.bf16 %v4639_v50  ;;  %vm1767_vm12 = vcmask 629760  }
 0x1b9   : > { %1352 = vst [vmem:[#allocation2 + $0x40] sm:$0xcc] %v1350_v63  ;;  %v2640_v24 = vmul.f32 %v2634_v61, %v2625_v31  ;;  %vm1887_vm2 = vcmask 613376  }
 0x1ba   : > { %v4589_v54 = vld.sshfl [vmem:[#allocation1] sm:$0xff pattern:$0x75316420]  ;;  %v4591_v39 = vld.sshfl [vmem:[#allocation1 + $0x8] sm:$0xff pattern:$0x75316420]  ;;  %v1465_v0 = vpop.permute.xlu1 %1464  ;;  %v2461_v43 = vmul.f32 %v2458_v49, %v2446_v33 }
 0x1bb   : > { %2285 = vst [vmem:[#allocation1] ss:$2 sm:$0xff] %v2281_v58  ;;  %v4604_v48 = vld.sshfl [vmem:[#allocation1 + $0x10] sm:$0xff pattern:$0x75316420]  ;;  %v1467_v46 = vrot.slane %v1465_v0, 4  ;;  %v2566_v0 = vunpack.c.l.bf16 %v4626_v11 }
 0x1bc   : > { %2467 = vst [vmem:[#allocation1 + $0x10] ss:$2 sm:$0xff] %v2462_v45  ;;  %v2519_v45 = vmul.f32 %v2516_v7, %v2504_v16  ;;  %v4660_v49 = vld [vmem:[%s4144_s30] sm:$0x3f] }
 0x1be   : > { %v1463_v18 = vpop.permute.xlu0 %1462 }
 0x1bf   : > { %v1466_v53 = vrot.slane %v1463_v18, 4 }
 0x1c1   : > { %v1468_v5 = vsel %vm320_vm0, %v1466_v53, %v1467_v46 }
 0x1c2   : > { %v4606_v40 = vld.sshfl [vmem:[#allocation1] sm:$0xff pattern:$0x75316420]  ;;  %v4608_v42 = vld.sshfl [vmem:[#allocation1 + $0x8] sm:$0xff pattern:$0x75316420]  ;;  %v1470_v36 = vsel %vm1469_vm1, %v1463_v18, %v1468_v5 }
 0x1c3   : > { %2345 = vst [vmem:[#allocation1] ss:$2 sm:$0xff] %v2341_v55  ;;  %v2470_v19 = vld.sshfl [vmem:[#allocation1 + $0x10] sm:$0xff pattern:$0x75316420]  ;;  %vm1827_vm1 = vcmask 621568  }
 0x1c4   : > { %v2475_v26 = vpack.c.bf16 %v2470_v19, %v2470_v19  ;;  %2525 = vst [vmem:[#allocation1 + $0x10] ss:$2 sm:$0xff] %v2520_v6  ;;  %v2578_v6 = vsel %vm2577_vm6, %v2576_v23, %v4335_v17  ;;  %v2696_v19 = vrot.slane %v4329_v8, 4  ;;  %vm2935_vm6 = vcmask 801792  }
 0x1c5   : > { %1472 = vst [vmem:[#allocation2 + $0x48] sm:$0xcc] %v1470_v36 }
 0x1c6   : > { %2480 = vrot.lane.b32.xlu0 %v2475_v26, %s3898_s9  ;;  %v1523_v51 = vpop.permute.xlu0 %1522  ;;  %v2581_v26 = vmul.f32 %v2578_v6, %v2566_v0 }
 0x1c7   : > { %v1525_v25 = vrot.slane %v1523_v51, 4 }
 0x1c9   : > { %v1526_v15 = vsel %vm320_vm0, %v1524_v20, %v1525_v25  ;;  %v2636_v20 = vsel %vm2635_vm8, %v2634_v61, %v4319_v37  ;;  %v2745_v25 = vunpack.c.h.bf16 %v4660_v49  ;;  %vm3055_vm8 = vcmask 818176  }
 0x1ca   : > { %v4621_v28 = vld.sshfl [vmem:[#allocation1] sm:$0xff pattern:$0x75316420]  ;;  %v4623_v56 = vld.sshfl [vmem:[#allocation1 + $0x8] sm:$0xff pattern:$0x75316420]  ;;  %v1528_v55 = vsel %vm1527_vm5, %v1521_v27, %v1526_v15  ;;  %v2687_v27 = vunpack.c.h.bf16 %v4651_v59  ;;  %v2639_v7 = vmul.f32 %v2636_v20, %v2624_v62 }
 0x1cb   : > { %2403 = vst [vmem:[#allocation1] ss:$2 sm:$0xff] %v2399_v21  ;;  %v2528_v57 = vld.sshfl [vmem:[#allocation1 + $0x10] sm:$0xff pattern:$0x75316420]  ;;  %vm2875_vm5 = vcmask 793600  }
 0x1cc   : > { %2587 = vst [vmem:[#allocation1 + $0x10] ss:$2 sm:$0xff] %v2582_v10  ;;  %v2533_v32 = vpack.c.bf16 %v2528_v57, %v2528_v57  ;;  %v2702_v3 = vmul.f32 %v2696_v19, %v2687_v27 }
 0x1cd   : > { %1530 = vst [vmem:[#allocation2 + $0x50] sm:$0x33] %v1528_v55 }
 0x1ce   : > { %v2537_v18 = vrot.slane %v2533_v32, 6  ;;  %v1701_v33 = vpop.permute.xlu2 %1700 }
 0x1cf   : > { %v1704_v10 = vrot.slane %v1701_v33, 4 }
 0x1d2   : > { %v4634_v58 = vld.sshfl [vmem:[#allocation1] sm:$0xff pattern:$0x75316420]  ;;  %v4636_v41 = vld.sshfl [vmem:[#allocation1 + $0x8] sm:$0xff pattern:$0x75316420] }
 0x1d3   : > { %2465 = vst [vmem:[#allocation1] ss:$2 sm:$0xff] %v2461_v43  ;;  %v4648_v47 = vld.sshfl [vmem:[#allocation1 + $0x10] sm:$0xff pattern:$0x75316420] }
 0x1d4   : > { %v1581_v12 = vpop.permute.xlu1 %1580  ;;  %2645 = vst [vmem:[#allocation1 + $0x10] ss:$2 sm:$0xff] %v2640_v24  ;;  %v2595_v24 = vpack.c.bf16 %v4648_v47, %v4648_v47 }
 0x1d5   : > { %v1584_v2 = vrot.slane %v1581_v12, 4 }
 0x1d7   : > { %v1586_v9 = vsel %vm320_vm0, %v1584_v2, %v1585_v29  ;;  %v4669_v29 = vld [vmem:[%s4144_s30] sm:$0x3f] }
 0x1d8   : > { %v1588_v38 = vsel %vm1587_vm10, %v1581_v12, %v1586_v9  ;;  %v2754_v12 = vrot.slane %v4348_v30, 4  ;;  %vm2697_vm10 = vcmask 695296   ;;  %v2805_v32 = vunpack.c.h.bf16 %v4669_v29 }
 0x1d9   : > { %1590 = vst [vmem:[#allocation2 + $0x50] sm:$0xcc] %v1588_v38  ;;  %v2686_v38 = vunpack.c.l.bf16 %v4651_v59  ;;  %v2814_v59 = vrot.slane %v4331_v4, 4 }
 0x1da   : > { %v2468_v34 = vld.sshfl [vmem:[#allocation1] sm:$0xff pattern:$0x75316420]  ;;  %v2469_v22 = vld.sshfl [vmem:[#allocation1 + $0x8] sm:$0xff pattern:$0x75316420]  ;;  %v2760_v50 = vmul.f32 %v2754_v12, %v2745_v25 }
 0x1db   : > { %v2474_v60 = vpack.c.bf16 %v2469_v22, %v2468_v34  ;;  %2523 = vst [vmem:[#allocation1] ss:$2 sm:$0xff] %v2519_v45  ;;  %v2648_v43 = vld.sshfl [vmem:[#allocation1 + $0x10] sm:$0xff pattern:$0x75316420]  ;;  %v2698_v22 = vsel %vm2697_vm10, %v2696_v19, %v4329_v8  ;;  %v2820_v27 = vmul.f32 %v2814_v59, %v2805_v32  ;;  %vm3115_vm10 = vcmask 826368  }
 0x1dc   : > { %v1641_v35 = vpop.permute.xlu0 %1640  ;;  %v1643_v63 = vpop.permute.xlu1 %1642  ;;  %2707 = vst [vmem:[#allocation1 + $0x10] ss:$2 sm:$0xff] %v2702_v3  ;;  %v2701_v0 = vmul.f32 %v2698_v22, %v2686_v38 }
 0x1dd   : > { %2478 = vrot.lane.b32.xlu2 %v2474_v60, %s3898_s9  ;;  %v1644_v1 = vrot.slane %v1641_v35, 4  ;;  %v1645_v21 = vrot.slane %v1643_v63, 4 }
 0x1df   : > { %v1646_v46 = vsel %vm320_vm0, %v1644_v1, %v1645_v21  ;;  %v4680_v1 = vld [vmem:[%s4144_s30] sm:$0x3f] }
 0x1e0   : > { %v1648_v53 = vsel %vm1647_vm7, %v1641_v35, %v1646_v46  ;;  %v1821_v34 = vpop.permute.xlu2 %1820  ;;  %v2653_v35 = vpack.c.bf16 %v2648_v43, %v2648_v43  ;;  %vm2995_vm7 = vcmask 809984  }
 0x1e1   : > { %1650 = vst [vmem:[#allocation2 + $0x58] sm:$0x33] %v1648_v53  ;;  %v1824_v8 = vrot.slane %v1821_v34, 4 }
 0x1e2   : > { %v2526_v11 = vld.sshfl [vmem:[#allocation1] sm:$0xff pattern:$0x75316420]  ;;  %v2527_v5 = vld.sshfl [vmem:[#allocation1 + $0x8] sm:$0xff pattern:$0x75316420] }
 0x1e3   : > { %v2532_v17 = vpack.c.bf16 %v2527_v5, %v2526_v11  ;;  %2585 = vst [vmem:[#allocation1] ss:$2 sm:$0xff] %v2581_v26  ;;  %v2710_v61 = vld.sshfl [vmem:[#allocation1 + $0x10] sm:$0xff pattern:$0x75316420]  ;;  %v2657_v21 = vrot.slane %v2653_v35, 6  ;;  %v2744_v26 = vunpack.c.l.bf16 %v4660_v49  ;;  %v2756_v5 = vsel %vm2755_vm15, %v2754_v12, %v4348_v30 }
 0x1e4   : > { %v1703_v36 = vpop.permute.xlu0 %1702  ;;  %v1763_v16 = vpop.permute.xlu1 %1762  ;;  %2765 = vst [vmem:[#allocation1 + $0x10] ss:$2 sm:$0xff] %v2760_v50  ;;  %v2874_v49 = vrot.slane %v4363_v52, 4  ;;  %v2804_v12 = vunpack.c.l.bf16 %v4669_v29  ;;  %v2816_v50 = vsel %vm1167_vm4, %v2814_v59, %v4331_v4  ;;  %v4700_v35 = vld [vmem:[%s4144_s30] sm:$0x3f]  ;;  %vm1947_vm4 = vcmask 605184  }
 0x1e5   : > { %2540 = vrot.lane.b32.xlu2 %v2537_v18, %s3899_s10  ;;  %v1705_v23 = vrot.slane %v1703_v36, 4  ;;  %v2536_v51 = vrot.slane %v2532_v17, 6  ;;  %v1765_v15 = vrot.slane %v1763_v16, 4  ;;  %v2865_v36 = vunpack.c.h.bf16 %v4680_v1  ;;  %v4690_v16 = vld [vmem:[%s4144_s30] sm:$0x3f] }
 0x1e6   : > { %v2759_v17 = vmul.f32 %v2756_v5, %v2744_v26  ;;  %v4708_v5 = vld [vmem:[%s4144_s30] sm:$0x3f]  ;;  %vm3175_vm15 = vcmask 834560  }
 0x1e7   : > { %v1706_v57 = vsel %vm320_vm0, %v1704_v10, %v1705_v23  ;;  %2538 = vrot.lane.b32.xlu1 %v2536_v51, %s3899_s10  ;;  %v2880_v62 = vmul.f32 %v2874_v49, %v2865_v36 }
 0x1e8   : > { %v1708_v31 = vsel %vm1707_vm9, %v1701_v33, %v1706_v57  ;;  %v2715_v33 = vpack.c.bf16 %v2710_v61, %v2710_v61  ;;  %v1883_v43 = vpop.permute.xlu2 %1882  ;;  %vm2125_vm9 = vcmask 506880  }
 0x1e9   : > { %1710 = vst [vmem:[#allocation2 + $0x58] sm:$0xcc] %v1708_v31  ;;  %v1885_v23 = vrot.slane %v1883_v43, 4  ;;  %v2924_v43 = vunpack.c.l.bf16 %v4690_v16 }
 0x1ea   : > { %v2588_v2 = vld.sshfl [vmem:[#allocation1] sm:$0xff pattern:$0x75316420]  ;;  %v2589_v55 = vld.sshfl [vmem:[#allocation1 + $0x8] sm:$0xff pattern:$0x75316420] }
 0x1eb   : > { %v2594_v45 = vpack.c.bf16 %v2589_v55, %v2588_v2  ;;  %2643 = vst [vmem:[#allocation1] ss:$2 sm:$0xff] %v2639_v7  ;;  %v2768_v53 = vld.sshfl [vmem:[#allocation1 + $0x10] sm:$0xff pattern:$0x75316420]  ;;  %v2925_v55 = vunpack.c.h.bf16 %v4690_v16 }
 0x1ec   : > { %v1761_v9 = vpop.permute.xlu0 %1760  ;;  %2825 = vst [vmem:[#allocation1 + $0x10] ss:$2 sm:$0xff] %v2820_v27 }
 0x1ed   : > { %v1764_v37 = vrot.slane %v1761_v9, 4  ;;  %2598 = vrot.lane.b32.xlu0 %v2594_v45, %s3900_s11  ;;  %v4822_v45 = vld [vmem:[#allocation3_spill] sm:$0xff] }
 0x1ef   : > { %v1766_v60 = vsel %vm320_vm0, %v1764_v37, %v1765_v15  ;;  %2600 = vrot.lane.b32.xlu1 %v2595_v24, %s3900_s11  ;;  %v2773_v15 = vpack.c.bf16 %v2768_v53, %v2768_v53  ;;  %v2934_v37 = vrot.slane %v4822_v45, 4 }
 0x1f0   : > { %v1768_v63 = vsel %vm1767_vm12, %v1761_v9, %v1766_v60  ;;  %v2819_v9 = vmul.f32 %v2816_v50, %v2804_v12  ;;  %vm2187_vm12 = vcmask 498688  }
 0x1f1   : > { %1770 = vst [vmem:[#allocation2 + $0x60] sm:$0x33] %v1768_v63  ;;  %v2777_v61 = vrot.slane %v2773_v15, 6  ;;  %v2940_v22 = vmul.f32 %v2934_v37, %v2925_v55  ;;  %v2864_v63 = vunpack.c.l.bf16 %v4680_v1  ;;  %v4720_v55 = vld [vmem:[%s4144_s30] sm:$0x3f] }
 0x1f2   : > { %v2646_v47 = vld.sshfl [vmem:[#allocation1] sm:$0xff pattern:$0x75316420]  ;;  %v2647_v6 = vld.sshfl [vmem:[#allocation1 + $0x8] sm:$0xff pattern:$0x75316420] }
 0x1f3   : > { %v2652_v18 = vpack.c.bf16 %v2647_v6, %v2646_v47  ;;  %2705 = vst [vmem:[#allocation1] ss:$2 sm:$0xff] %v2701_v0  ;;  %v2828_v31 = vld.sshfl [vmem:[#allocation1 + $0x10] sm:$0xff pattern:$0x75316420]  ;;  %v2001_v47 = vpop.permute.xlu2 %2000 }
 0x1f4   : > { %v1823_v46 = vpop.permute.xlu0 %1822  ;;  %2885 = vst [vmem:[#allocation1 + $0x10] ss:$2 sm:$0xff] %v2880_v62 }
 0x1f5   : > { %v1825_v19 = vrot.slane %v1823_v46, 4  ;;  %2660 = vrot.lane.b32.xlu0 %v2657_v21, %s3901_s8  ;;  %v2656_v11 = vrot.slane %v2652_v18, 6  ;;  %v2985_v21 = vunpack.c.h.bf16 %v4700_v35  ;;  %v4823_v46 = vld [vmem:[#allocation5_spill] sm:$0xff] }
 0x1f6   : > { %v2994_v18 = vrot.slane %v4823_v46, 4 }
 0x1f7   : > { %v1826_v3 = vsel %vm320_vm0, %v1824_v8, %v1825_v19  ;;  %2658 = vrot.lane.b32.xlu2 %v2656_v11, %s3901_s8  ;;  %2720 = vrot.lane.b32.xlu1 %v2715_v33, %s3902_s12  ;;  %v2876_v8 = vsel %vm2875_vm5, %v2874_v49, %v4363_v52  ;;  %v2003_v11 = vrot.slane %v2001_v47, 4  ;;  %vm2605_vm5 = vcmask 367616  }
 0x1f8   : > { %v1828_v10 = vsel %vm1827_vm1, %v1821_v34, %v1826_v3  ;;  %v2879_v1 = vmul.f32 %v2876_v8, %v2864_v63  ;;  %v3000_v26 = vmul.f32 %v2994_v18, %v2985_v21  ;;  %v3149_v21 = vld [vmem:[%s4144_s30] sm:$0x3f]  ;;  %s3906_s30 = smov 29   ;;  %vm2485_vm1 = vcmask 384000  }
 0x1f9   : > { %1830 = vst [vmem:[#allocation2 + $0x60] sm:$0xcc] %v1828_v10  ;;  %v2833_v10 = vpack.c.bf16 %v2828_v31, %v2828_v31 }
 0x1fa   : > { %v2708_v51 = vld.sshfl [vmem:[#allocation1] sm:$0xff pattern:$0x75316420]  ;;  %v2709_v57 = vld.sshfl [vmem:[#allocation1 + $0x8] sm:$0xff pattern:$0x75316420] }
 0x1fb   : > { %v2714_v30 = vpack.c.bf16 %v2709_v57, %v2708_v51  ;;  %2763 = vst [vmem:[#allocation1] ss:$2 sm:$0xff] %v2759_v17  ;;  %v2888_v32 = vld.sshfl [vmem:[#allocation1 + $0x10] sm:$0xff pattern:$0x75316420]  ;;  %v3045_v51 = vunpack.c.h.bf16 %v4708_v5 }
 0x1fc   : > { %2945 = vst [vmem:[#allocation1 + $0x10] ss:$2 sm:$0xff] %v2940_v22  ;;  %v2893_v17 = vpack.c.bf16 %v2888_v32, %v2888_v32 }
 0x1fd   : > { %2718 = vrot.lane.b32.xlu0 %v2714_v30, %s3902_s12 }
 0x1fe   : > { %v1881_v20 = vpop.permute.xlu1 %1880 }
 0x1ff   : > { %v1884_v25 = vrot.slane %v1881_v20, 4 }
 0x201   : > { %v1886_v7 = vsel %vm320_vm0, %v1884_v25, %v1885_v23  ;;  %v2936_v23 = vsel %vm2935_vm6, %v2934_v37, %v4822_v45  ;;  %v2897_v25 = vrot.slane %v2893_v17, 6  ;;  %v2984_v37 = vunpack.c.l.bf16 %v4700_v35 }
 0x202   : > { %v1888_v2 = vsel %vm1887_vm2, %v1881_v20, %v1886_v7  ;;  %v2766_v38 = vld.sshfl [vmem:[#allocation1] sm:$0xff pattern:$0x75316420]  ;;  %v2767_v34 = vld.sshfl [vmem:[#allocation1 + $0x8] sm:$0xff pattern:$0x75316420]  ;;  %v2939_v57 = vmul.f32 %v2936_v23, %v2924_v43 }
 0x203   : > { %1890 = vst [vmem:[#allocation2 + $0x68] sm:$0x33] %v1888_v2  ;;  %v2772_v24 = vpack.c.bf16 %v2767_v34, %v2766_v38  ;;  %v2948_v36 = vld.sshfl [vmem:[#allocation1 + $0x10] sm:$0xff pattern:$0x75316420]  ;;  %v2996_v34 = vsel %vm2995_vm7, %v2994_v18, %v4823_v46  ;;  %vm2545_vm2 = vcmask 375808  }
 0x204   : > { %2823 = vst [vmem:[#allocation1] ss:$2 sm:$0xff] %v2819_v9  ;;  %v4824_v20 = vld [vmem:[#allocation7_spill] sm:$0xff]  ;;  %v2953_v2 = vpack.c.bf16 %v2948_v36, %v2948_v36  ;;  %vm2725_vm6 = vcmask 351232   ;;  %vm2785_vm7 = vcmask 343040  }
 0x205   : > { %2780 = vrot.lane.b32.xlu0 %v2777_v61, %s3903_s13  ;;  %v2776_v59 = vrot.slane %v2772_v24, 6  ;;  %3005 = vst [vmem:[#allocation1 + $0x10] ss:$2 sm:$0xff] %v3000_v26  ;;  %v3054_v30 = vrot.slane %v4824_v20, 4 }
 0x206   : > { %v1943_v29 = vpop.permute.xlu1 %1942 }
 0x207   : > { %v1945_v60 = vrot.slane %v1943_v29, 4  ;;  %2778 = vrot.lane.b32.xlu2 %v2776_v59, %s3903_s13  ;;  %v3060_v7 = vmul.f32 %v3054_v30, %v3045_v51  ;;  %v3105_v29 = vunpack.c.h.bf16 %v4720_v55  ;;  %v2119_v32 = vpop.permute.xlu2 %2118 }
 0x208   : > { %v2122_v46 = vrot.slane %v2119_v32, 4 }
 0x209   : > { %v1941_v4 = vpop.permute.xlu0 %1940 }
 0x20a   : > { %v1944_v0 = vrot.slane %v1941_v4, 4 }
 0x20b   : > { %v2826_v19 = vld.sshfl [vmem:[#allocation1] sm:$0xff pattern:$0x75316420]  ;;  %v2827_v33 = vld.sshfl [vmem:[#allocation1 + $0x8] sm:$0xff pattern:$0x75316420] }
 0x20c   : > { %v1946_v27 = vsel %vm320_vm0, %v1944_v0, %v1945_v60  ;;  %v2832_v3 = vpack.c.bf16 %v2827_v33, %v2826_v19  ;;  %2883 = vst [vmem:[#allocation1] ss:$2 sm:$0xff] %v2879_v1  ;;  %v3008_v45 = vld.sshfl [vmem:[#allocation1 + $0x10] sm:$0xff pattern:$0x75316420]  ;;  %v4825_v60 = vld [vmem:[#allocation4_spill] sm:$0xff]  ;;  %v3056_v19 = vsel %vm3055_vm8, %v3054_v30, %v4824_v20  ;;  %v3165_v33 = vunpack.c.h.bf16 %v3149_v21 }
 0x20d   : > { %v1948_v6 = vsel %vm1947_vm4, %v1941_v4, %v1946_v27  ;;  %3065 = vst [vmem:[#allocation1 + $0x10] ss:$2 sm:$0xff] %v3060_v7  ;;  %v3114_v35 = vrot.slane %v4825_v60, 4  ;;  %v2999_v4 = vmul.f32 %v2996_v34, %v2984_v37  ;;  %v3044_v27 = vunpack.c.l.bf16 %v4708_v5 }
 0x20e   : > { %1950 = vst [vmem:[#allocation2 + $0x68] sm:$0xcc] %v1948_v6  ;;  %2836 = vrot.lane.b32.xlu1 %v2832_v3, %s3839_s16  ;;  %v3013_v1 = vpack.c.bf16 %v3008_v45, %v3008_v45  ;;  %vm2665_vm4 = vcmask 359424   ;;  %vm2963_vm8 = vcmask 244736  }
 0x20f   : > { %v1999_v53 = vpop.permute.xlu1 %1998  ;;  %2838 = vrot.lane.b32.xlu2 %v2833_v10, %s3839_s16  ;;  %s3904_s16 = smov 31   ;;  %v3120_v0 = vmul.f32 %v3114_v35, %v3105_v29 }
 0x210   : > { %v2002_v52 = vrot.slane %v1999_v53, 4  ;;  %v3017_v36 = vrot.slane %v3013_v1, 6 }
 0x212   : > { %v2004_v49 = vsel %vm320_vm0, %v2002_v52, %v2003_v11  ;;  %v4826_v11 = vld [vmem:[#allocation6_spill] sm:$0xff]  ;;  %v3059_v52 = vmul.f32 %v3056_v19, %v3044_v27  ;;  %v3207_v19 = vld [vmem:[%s4803_s1] sm:$0xf] }
 0x213   : > { %v2006_v62 = vsel %vm1977_vm13, %v1999_v53, %v2004_v49  ;;  %v2886_v31 = vld.sshfl [vmem:[#allocation1] sm:$0xff pattern:$0x75316420]  ;;  %v2887_v16 = vld.sshfl [vmem:[#allocation1 + $0x8] sm:$0xff pattern:$0x75316420]  ;;  %v2183_v49 = vpop.permute.xlu2 %2182 }
 0x214   : > { %2008 = vst [vmem:[#allocation2 + $0x70] sm:$0x33] %v2006_v62  ;;  %v2892_v15 = vpack.c.bf16 %v2887_v16, %v2886_v31  ;;  %vm2067_vm13 = vcmask 515072   ;;  %v3068_v6 = vld.sshfl [vmem:[#allocation1 + $0x10] sm:$0xff pattern:$0x75316420] }
 0x215   : > { %2943 = vst [vmem:[#allocation1] ss:$2 sm:$0xff] %v2939_v57  ;;  %v3174_v3 = vrot.slane %v4826_v11, 4  ;;  %v3104_v57 = vunpack.c.l.bf16 %v4720_v55  ;;  %v2185_v20 = vrot.slane %v2183_v49, 4  ;;  %v3668_v27 = vld [vmem:[#allocation2 + $0x64] sm:$0xf] }
 0x216   : > { %2900 = vrot.lane.b32.xlu1 %v2897_v25, %s3904_s16  ;;  %v2896_v61 = vrot.slane %v2892_v15, 6  ;;  %3125 = vst [vmem:[#allocation1 + $0x10] ss:$2 sm:$0xff] %v3120_v0  ;;  %v3116_v25 = vsel %vm3115_vm10, %v3114_v35, %v4825_v60  ;;  %v3606_v0 = vld [vmem:[#allocation2 + $0x68] sm:$0xf0]  ;;  %vm3145_vm10 = vcmask 220160  }
 0x217   : > { %v2063_v12 = vpop.permute.xlu1 %2062  ;;  %2958 = vrot.lane.b32.xlu2 %v2953_v2, %s3905_s14  ;;  %v3180_v10 = vmul.f32 %v3174_v3, %v3165_v33  ;;  %v3073_v2 = vpack.c.bf16 %v3068_v6, %v3068_v6  ;;  %v3176_v45 = vsel %vm3175_vm15, %v3174_v3, %v4826_v11  ;;  %v3667_v6 = vld [vmem:[#allocation2 + $0x54] sm:$0xf0]  ;;  %v3588_v49 = vld [vmem:[#allocation2 + $0x40] sm:$0xf]  ;;  %vm3203_vm15 = vcmask 211968  }
 0x218   : > { %v2065_v50 = vrot.slane %v2063_v12, 4  ;;  %2898 = vrot.lane.b32.xlu0 %v2896_v61, %s3904_s16  ;;  %v3119_v12 = vmul.f32 %v3116_v25, %v3104_v57  ;;  %v2294_v61 = vpack.c.bf16 %v4608_v42, %v4606_v40  ;;  %v3663_v57 = vld [vmem:[#allocation2 + $0x34] sm:$0xf0]  ;;  %v3582_v25 = vld [vmem:[#allocation2 + $0x38] sm:$0xf0] }
 0x219   : > { %v2061_v9 = vpop.permute.xlu0 %2060 }
 0x21a   : > { %v2064_v38 = vrot.slane %v2061_v9, 4 }
 0x21c   : > { %v2066_v22 = vsel %vm320_vm0, %v2064_v38, %v2065_v50  ;;  %v2946_v63 = vld.sshfl [vmem:[#allocation1] sm:$0xff pattern:$0x75316420]  ;;  %v2947_v59 = vld.sshfl [vmem:[#allocation1 + $0x8] sm:$0xff pattern:$0x75316420] }
 0x21d   : > { %v2068_v24 = vsel %vm2067_vm13, %v2061_v9, %v2066_v22  ;;  %v2952_v8 = vpack.c.bf16 %v2947_v59, %v2946_v63  ;;  %3003 = vst [vmem:[#allocation1] ss:$2 sm:$0xff] %v2999_v4  ;;  %v3128_v23 = vld.sshfl [vmem:[#allocation1 + $0x10] sm:$0xff pattern:$0x75316420]  ;;  %v3164_v9 = vunpack.c.l.bf16 %v3149_v21  ;;  %vm2905_vm13 = vcmask 252928  }
 0x21e   : > { %2070 = vst [vmem:[#allocation2 + $0x70] sm:$0xcc] %v2068_v24  ;;  %v3133_v55 = vpack.c.bf16 %v3128_v23, %v3128_v23  ;;  %v3669_v4 = vld [vmem:[#allocation2 + $0x64] sm:$0xf0]  ;;  %v3604_v21 = vld [vmem:[#allocation2 + $0x60] sm:$0xf] }
 0x21f   : > { %2956 = vrot.lane.b32.xlu1 %v2952_v8, %s3905_s14  ;;  %3185 = vst [vmem:[#allocation1 + $0x10] ss:$2 sm:$0xff] %v3180_v10  ;;  %v3179_v22 = vmul.f32 %v3176_v45, %v3164_v9  ;;  %v2298_v8 = vrot.slane %v2294_v61, 6  ;;  %v3605_v42 = vor.u32 %v3669_v4, %v3604_v21  ;;  %v2355_v10 = vpack.c.bf16 %v4593_v14, %v4593_v14  ;;  %v3580_v14 = vld [vmem:[#allocation2 + $0x30] sm:$0xf] }
 0x220   : > { %v3137_v24 = vrot.slane %v3133_v55, 6  ;;  %v2235_v55 = vpack.c.bf16 %v4569_v44, %v4569_v44  ;;  %v3574_v45 = vld [vmem:[#allocation2 + $0x28] sm:$0xf0]  ;;  %v2234_v61 = vpack.c.bf16 %v4591_v39, %v4589_v54  ;;  %v3566_v44 = vld [vmem:[#allocation2 + $0x18] sm:$0xf0] }
 0x221   : > { %v2121_v47 = vpop.permute.xlu0 %2120  ;;  %v3657_v39 = vld [vmem:[#allocation2 + $0x4] sm:$0xf0] }
 0x222   : > { %v2123_v18 = vrot.slane %v2121_v47, 4  ;;  %v3609_v47 = vor.u32 %v3668_v27, %v3606_v0  ;;  %v3556_v0 = vld [vmem:[#allocation2] sm:$0xf] }
 0x223   : > { %v3557_v21 = vor.u32 %v3657_v39, %v3556_v0 }
 0x224   : > { %v2124_v53 = vsel %vm320_vm0, %v2122_v46, %v2123_v18  ;;  %v3006_v5 = vld.sshfl [vmem:[#allocation1] sm:$0xff pattern:$0x75316420]  ;;  %v3007_v43 = vld.sshfl [vmem:[#allocation1 + $0x8] sm:$0xff pattern:$0x75316420] }
 0x225   : > { %v2126_v26 = vsel %vm2125_vm9, %v2119_v32, %v2124_v53  ;;  %v3012_v17 = vpack.c.bf16 %v3007_v43, %v3006_v5  ;;  %3063 = vst [vmem:[#allocation1] ss:$2 sm:$0xff] %v3059_v52  ;;  %v3612_v37 = vld [vmem:[#allocation2 + $0x70] sm:$0xf]  ;;  %v3670_v34 = vld [vmem:[#allocation2 + $0x74] sm:$0xf] }
 0x226   : > { %2128 = vst [vmem:[#allocation2 + $0x78] sm:$0x33] %v2126_v26  ;;  %v3596_v46 = vld [vmem:[#allocation2 + $0x50] sm:$0xf]  ;;  %v3598_v18 = vld [vmem:[#allocation2 + $0x58] sm:$0xf0] }
 0x227   : > { %3020 = vrot.lane.b32.xlu1 %v3017_v36, %s3906_s30  ;;  %v3016_v62 = vrot.slane %v3012_v17, 6  ;;  %v3188_v1 = vld.sshfl [vmem:[#allocation1 + $0x10] sm:$0xff pattern:$0x75316420]  ;;  %v3597_v33 = vor.u32 %v3667_v6, %v3596_v46  ;;  %v3666_v53 = vld [vmem:[#allocation2 + $0x54] sm:$0xf] }
 0x228   : > { %v3665_v26 = vld [vmem:[#allocation2 + $0x44] sm:$0xf0]  ;;  %v3601_v52 = vor.u32 %v3666_v53, %v3598_v18  ;;  %v3193_v36 = vpack.c.bf16 %v3188_v1, %v3188_v1  ;;  %v3590_v5 = vld [vmem:[#allocation2 + $0x48] sm:$0xf0]  ;;  %vm3083_vm9 = vcmask 228352  }
 0x229   : > { %v2181_v51 = vpop.permute.xlu1 %2180  ;;  %3018 = vrot.lane.b32.xlu0 %v3016_v62, %s3906_s30  ;;  %v3589_v23 = vor.u32 %v3665_v26, %v3588_v49  ;;  %v3664_v62 = vld [vmem:[#allocation2 + $0x44] sm:$0xf] }
 0x22a   : > { %v2184_v30 = vrot.slane %v2181_v51, 4 }
 0x22c   : > { %v2186_v31 = vsel %vm320_vm0, %v2184_v30, %v2185_v20  ;;  %v3066_v7 = vld.sshfl [vmem:[#allocation1] sm:$0xff pattern:$0x75316420]  ;;  %v3067_v15 = vld.sshfl [vmem:[#allocation1 + $0x8] sm:$0xff pattern:$0x75316420] }
 0x22d   : > { %v2188_v16 = vsel %vm2187_vm12, %v2181_v51, %v2186_v31  ;;  %v3072_v50 = vpack.c.bf16 %v3067_v15, %v3066_v7  ;;  %3123 = vst [vmem:[#allocation1] ss:$2 sm:$0xff] %v3119_v12  ;;  %v3593_v51 = vor.u32 %v3664_v62, %v3590_v5  ;;  %v3581_v12 = vor.u32 %v3663_v57, %v3580_v14  ;;  %v3662_v7 = vld [vmem:[#allocation2 + $0x34] sm:$0xf] }
 0x22e   : > { %2190 = vst [vmem:[#allocation2 + $0x78] sm:$0xcc] %v2188_v16  ;;  %v3912_v16 = vmov 0   ;;  %vm2365_vm12 = vcmask 474112  }
 0x22f   : > { %3076 = vrot.lane.b32.xlu2 %v3072_v50, %s3907_s15  ;;  %3797 = vset.pattern.permute.xlu0 %v3912_v16  ;;  %v3585_v50 = vor.u32 %v3662_v7, %v3582_v25 }
 0x231   : > { %3078 = vrot.lane.b32.xlu0 %v3073_v2, %s3907_s15  ;;  %v3661_v2 = vld [vmem:[#allocation2 + $0x24] sm:$0xf0] }
 0x234   : > { %v3126_v32 = vld.sshfl [vmem:[#allocation1] sm:$0xff pattern:$0x75316420]  ;;  %v3127_v63 = vld.sshfl [vmem:[#allocation1 + $0x8] sm:$0xff pattern:$0x75316420] }
 0x235   : > { %v3671_v38 = vld [vmem:[#allocation2 + $0x74] sm:$0xf0]  ;;  %v3614_v29 = vld [vmem:[#allocation2 + $0x78] sm:$0xf0]  ;;  %v3132_v59 = vpack.c.bf16 %v3127_v63, %v3126_v32  ;;  %3183 = vst [vmem:[#allocation1] ss:$2 sm:$0xff] %v3179_v22  ;;  %v2354_v63 = vpack.c.bf16 %v4623_v56, %v4621_v28  ;;  %v2412_v28 = vpack.c.bf16 %v4636_v41, %v4634_v58 }
 0x236   : > { %v3613_v60 = vor.u32 %v3671_v38, %v3612_v37  ;;  %v3617_v35 = vor.u32 %v3670_v34, %v3614_v29  ;;  %v3572_v37 = vld [vmem:[#allocation2 + $0x20] sm:$0xf]  ;;  %v3660_v34 = vld [vmem:[#allocation2 + $0x24] sm:$0xf]  ;;  %v3233_v29 = vld [vmem:[%s4804_s2] sm:$0xf] }
 0x237   : > { %3140 = vrot.lane.b32.xlu2 %v3137_v24, %s3908_s17  ;;  %v3136_v40 = vrot.slane %v3132_v59, 6  ;;  %v2479_v43 = vpop.permute.xlu2 %2478  ;;  %v3573_v38 = vor.u32 %v3661_v2, %v3572_v37  ;;  %v3577_v22 = vor.u32 %v3660_v34, %v3574_v45  ;;  %v3659_v24 = vld [vmem:[#allocation2 + $0x14] sm:$0xf0]  ;;  %v3658_v32 = vld [vmem:[#allocation2 + $0x14] sm:$0xf] }
 0x238   : > { %3378 = vmatpush.bf16.msra.mxu0 %v3613_v60  ;;  %3404 = vmatpush.bf16.msra.mxu2 %v3617_v35  ;;  %v2481_v20 = vpop.permute.xlu0 %2480  ;;  %v2482_v30 = vrot.slane %v2479_v43, 4  ;;  %v3564_v60 = vld [vmem:[#allocation2 + $0x10] sm:$0xf]  ;;  %v2295_v35 = vpack.c.bf16 %v4579_v13, %v4579_v13  ;;  %v3569_v54 = vor.u32 %v3658_v32, %v3566_v44  ;;  %v3558_v59 = vld [vmem:[#allocation2 + $0x8] sm:$0xf0]  ;;  %v2413_v13 = vpack.c.bf16 %v4604_v48, %v4604_v48 }
 0x239   : > { %2300 = vrot.lane.b32.xlu0 %v2298_v8, %s3909_s6  ;;  %3138 = vrot.lane.b32.xlu1 %v3136_v40, %s3908_s17  ;;  %v2483_v31 = vrot.slane %v2481_v20, 4  ;;  %v3565_v4 = vor.u32 %v3659_v24, %v3564_v60  ;;  %v3656_v40 = vld [vmem:[#allocation2 + $0x4] sm:$0xf] }
 0x23a   : > { %v2299_v8 = vrot.slane %v2295_v35, 6  ;;  %v2417_v27 = vrot.slane %v2413_v13, 6 }
 0x23b   : > { %v2484_v15 = vsel %vm320_vm0, %v2482_v30, %v2483_v31 }
 0x23c   : > { %3379 = vmatpush.bf16.msra.mxu0 %v3605_v42  ;;  %3405 = vmatpush.bf16.msra.mxu2 %v3609_v47  ;;  %v3186_v11 = vld.sshfl [vmem:[#allocation1] sm:$0xff pattern:$0x75316420]  ;;  %v3187_v3 = vld.sshfl [vmem:[#allocation1 + $0x8] sm:$0xff pattern:$0x75316420]  ;;  %v2486_v9 = vsel %vm2485_vm1, %v2479_v43, %v2484_v15  ;;  %v3561_v42 = vor.u32 %v3656_v40, %v3558_v59 }
 0x23d   : > { %3240 = vst [vmem:[#allocation1] ss:$4 sm:$0xff] %v3207_v19  ;;  %v3192_v17 = vpack.c.bf16 %v3187_v3, %v3186_v11  ;;  %v2416_v47 = vrot.slane %v2412_v28, 6  ;;  %vm2245_vm1 = vcmask 490496  }
 0x23e   : > { %2488 = vst [vmem:[#allocation2 + $0x90] sm:$0x33] %v2486_v9 }
 0x23f   : > { %3198 = vrot.lane.b32.xlu2 %v3193_v36, %s3910_s26  ;;  %v2541_v6 = vpop.permute.xlu2 %2540 }
 0x240   : > { %3380 = vmatpush.bf16.msra.mxu0 %v3597_v33  ;;  %3406 = vmatpush.bf16.msra.mxu2 %v3601_v52  ;;  %v2543_v18 = vrot.slane %v2541_v6, 4 }
 0x241   : > { %2360 = vrot.lane.b32.xlu0 %v2355_v10, %s3911_s27  ;;  %3196 = vrot.lane.b32.xlu1 %v3192_v17, %s3910_s26 }
 0x244   : > { %3381 = vmatpush.bf16.msra.mxu0 %v3589_v23  ;;  %3407 = vmatpush.bf16.msra.mxu2 %v3593_v51  ;;  %v3241_v56 = vld.sshfl [vmem:[#allocation1] sm:$0xff pattern:$0x73625140] }
 0x247   : > { %2240 = vrot.lane.b32.xlu2 %v2235_v55, %s3913_s28 }
 0x248   : > { %3382 = vmatpush.bf16.msra.mxu0 %v3581_v12  ;;  %3408 = vmatpush.bf16.msra.mxu2 %v3585_v50 }
 0x249   : > { %3236 = vperm.xlu0 %3797, %v3233_v29   ;;  %2238 = vrot.lane.b32.xlu1 %v2234_v61, %s3913_s28 }
 0x24c   : > { %3383 = vmatpush.bf16.msra.mxu0 %v3573_v38  ;;  %3409 = vmatpush.bf16.msra.mxu2 %v3577_v22 }
 0x24f   : > { %2358 = vrot.lane.b32.xlu2 %v2354_v63, %s3911_s27 }
 0x250   : > { %3384 = vmatpush.bf16.msra.mxu0 %v3565_v4  ;;  %3410 = vmatpush.bf16.msra.mxu2 %v3569_v54 }
 0x251   : > { %2302 = vrot.lane.b32.xlu1 %v2299_v8, %s3909_s6  ;;  %v2659_v11 = vpop.permute.xlu2 %2658 }
 0x252   : > { %v2662_v36 = vrot.slane %v2659_v11, 4 }
 0x254   : > { %3385 = vmatpush.bf16.msra.mxu0 %v3557_v21  ;;  %3411 = vmatpush.bf16.msra.mxu2 %v3561_v42 }
 0x257   : > { %3386 = vmatmul.bf16.vlgmr.msra.gmra.mxu0 %v3241_v56  ;;  %3412 = vmatmul.bf16.vlgmr.msra.gmra.mxu2 %v3241_v56 }
 0x258   : > { %2420 = vrot.lane.b32.xlu2 %v2417_v27, %s3840_s23 }
 0x259   : > { %2418 = vrot.lane.b32.xlu1 %v2416_v47, %s3840_s23  ;;  %v2539_v46 = vpop.permute.xlu1 %2538  ;;  %s3654_s23 = sshll.u32 %s4832_s18, 5 }
 0x25a   : > { %v2542_v1 = vrot.slane %v2539_v46, 4  ;;  %s296_s10 = scalar_lea.vmem %s4807_s5, %s3654_s23  ;;  %s286_s12 = scalar_lea.vmem %s4806_s4, %s3654_s23 }
 0x25c   : > { %v2544_v48 = vsel %vm320_vm0, %v2542_v1, %v2543_v18 }
 0x25d   : > { %v2546_v19 = vsel %vm2545_vm2, %v2539_v46, %v2544_v48  ;;  %vm3371_vm2 = vcmask 1041408  }
 0x25e   : > { %2548 = vst [vmem:[#allocation2 + $0x90] sm:$0xcc] %v2546_v19 }
 0x25f   : > { %v2599_v33 = vpop.permute.xlu0 %2598 }
 0x260   : > { %v2602_v41 = vrot.slane %v2599_v33, 4 }
 0x261   : > { %v2601_v58 = vpop.permute.xlu1 %2600  ;;  %v2779_v17 = vpop.permute.xlu2 %2778 }
 0x262   : > { %v2603_v53 = vrot.slane %v2601_v58, 4  ;;  %v2782_v25 = vrot.slane %v2779_v17, 4 }
 0x264   : > { %v2604_v26 = vsel %vm320_vm0, %v2602_v41, %v2603_v53 }
 0x265   : > { %v2606_v3 = vsel %vm2605_vm5, %v2599_v33, %v2604_v26  ;;  %vm2307_vm5 = vcmask 482304  }
 0x266   : > { %2608 = vst [vmem:[#allocation2 + $0x98] sm:$0x33] %v2606_v3 }
 0x267   : > { %v2661_v52 = vpop.permute.xlu0 %2660 }
 0x268   : > { %v2663_v5 = vrot.slane %v2661_v52, 4 }
 0x269   : > { %v2721_v49 = vpop.permute.xlu1 %2720  ;;  %v2839_v31 = vpop.permute.xlu2 %2838 }
 0x26a   : > { %v2664_v43 = vsel %vm320_vm0, %v2662_v36, %v2663_v5  ;;  %v2723_v62 = vrot.slane %v2721_v49, 4  ;;  %v2841_v15 = vrot.slane %v2839_v31, 4 }
 0x26b   : > { %v2666_v10 = vsel %vm2665_vm4, %v2659_v11, %v2664_v43 }
 0x26c   : > { %2668 = vst [vmem:[#allocation2 + $0x98] sm:$0xcc] %v2666_v10 }
 0x26f   : > { %v2719_v23 = vpop.permute.xlu0 %2718 }
 0x270   : > { %v2722_v51 = vrot.slane %v2719_v23, 4 }
 0x271   : > { %v2959_v50 = vpop.permute.xlu2 %2958 }
 0x272   : > { %v2724_v57 = vsel %vm320_vm0, %v2722_v51, %v2723_v62  ;;  %v2961_v44 = vrot.slane %v2959_v50, 4 }
 0x273   : > { %v2726_v20 = vsel %vm2725_vm6, %v2719_v23, %v2724_v57 }
 0x274   : > { %2728 = vst [vmem:[#allocation2 + $0xa0] sm:$0x33] %v2726_v20 }
 0x277   : > { %v2781_v30 = vpop.permute.xlu0 %2780 }
 0x278   : > { %v2783_v14 = vrot.slane %v2781_v30, 4 }
 0x27a   : > { %v2784_v16 = vsel %vm320_vm0, %v2782_v25, %v2783_v14 }
 0x27b   : > { %v2786_v12 = vsel %vm2785_vm7, %v2779_v17, %v2784_v16 }
 0x27c   : > { %2788 = vst [vmem:[#allocation2 + $0xa0] sm:$0xcc] %v2786_v12 }
 0x280   : > { %v2837_v7 = vpop.permute.xlu1 %2836 }
 0x281   : > { %v2840_v2 = vrot.slane %v2837_v7, 4 }
 0x283   : > { %v2842_v9 = vsel %vm320_vm0, %v2840_v2, %v2841_v15 }
 0x284   : > { %v2844_v55 = vsel %vm1139_vm14, %v2837_v7, %v2842_v9  ;;  %vm3025_vm14 = vcmask 236544  }
 0x285   : > { %2846 = vst [vmem:[#allocation2 + $0xa8] sm:$0x33] %v2844_v55 }
 0x288   : > { %v2901_v45 = vpop.permute.xlu1 %2900 }
 0x289   : > { %v3077_v37 = vpop.permute.xlu2 %3076  ;;  %v2903_v61 = vrot.slane %v2901_v45, 4 }
 0x28a   : > { %v2899_v38 = vpop.permute.xlu0 %2898  ;;  %v3080_v42 = vrot.slane %v3077_v37, 4 }
 0x28b   : > { %v2902_v34 = vrot.slane %v2899_v38, 4 }
 0x28d   : > { %v2904_v29 = vsel %vm320_vm0, %v2902_v34, %v2903_v61 }
 0x28e   : > { %v2906_v22 = vsel %vm2905_vm13, %v2899_v38, %v2904_v29  ;;  %v3636_v29 = vld [vmem:[#allocation2 + $0xa0] sm:$0xf] }
 0x28f   : > { %2908 = vst [vmem:[#allocation2 + $0xa8] sm:$0xcc] %v2906_v22  ;;  %v3676_v22 = vld [vmem:[#allocation2 + $0xa4] sm:$0xf] }
 0x291   : > { %v2957_v24 = vpop.permute.xlu1 %2956  ;;  %v3141_v35 = vpop.permute.xlu2 %3140 }
 0x292   : > { %v2960_v60 = vrot.slane %v2957_v24, 4  ;;  %v3143_v46 = vrot.slane %v3141_v35, 4 }
 0x294   : > { %v2962_v4 = vsel %vm320_vm0, %v2960_v60, %v2961_v44 }
 0x295   : > { %v2964_v32 = vsel %vm2963_vm8, %v2957_v24, %v2962_v4 }
 0x296   : > { %2966 = vst [vmem:[#allocation2 + $0xb0] sm:$0x33] %v2964_v32  ;;  %v3677_v61 = vld [vmem:[#allocation2 + $0xa4] sm:$0xf0]  ;;  %v3638_v38 = vld [vmem:[#allocation2 + $0xa8] sm:$0xf0] }
 0x297   : > { %v3637_v44 = vor.u32 %v3677_v61, %v3636_v29  ;;  %v3641_v60 = vor.u32 %v3676_v22, %v3638_v38  ;;  %v3675_v32 = vld [vmem:[#allocation2 + $0x94] sm:$0xf0] }
 0x299   : > { %v3021_v54 = vpop.permute.xlu1 %3020  ;;  %v3199_v0 = vpop.permute.xlu2 %3198 }
 0x29a   : > { %v3023_v39 = vrot.slane %v3021_v54, 4  ;;  %v3201_v26 = vrot.slane %v3199_v0, 4  ;;  %v3630_v54 = vld [vmem:[#allocation2 + $0x98] sm:$0xf0] }
 0x29b   : > { %v3019_v63 = vpop.permute.xlu0 %3018 }
 0x29c   : > { %v3022_v59 = vrot.slane %v3019_v63, 4 }
 0x29e   : > { %v3024_v8 = vsel %vm320_vm0, %v3022_v59, %v3023_v39  ;;  %v3674_v59 = vld [vmem:[#allocation2 + $0x94] sm:$0xf] }
 0x29f   : > { %v3026_v21 = vsel %vm3025_vm14, %v3019_v63, %v3024_v8  ;;  %v3628_v63 = vld [vmem:[#allocation2 + $0x90] sm:$0xf] }
 0x2a0   : > { %3028 = vst [vmem:[#allocation2 + $0xb0] sm:$0xcc] %v3026_v21  ;;  %v3629_v8 = vor.u32 %v3675_v32, %v3628_v63  ;;  %v3633_v21 = vor.u32 %v3674_v59, %v3630_v54 }
 0x2a1   : > { %v2241_v56 = vpop.permute.xlu2 %2240 }
 0x2a2   : > { %v2243_v10 = vrot.slane %v2241_v56, 4 }
 0x2a3   : > { %v3079_v40 = vpop.permute.xlu0 %3078 }
 0x2a4   : > { %v3081_v13 = vrot.slane %v3079_v40, 4 }
 0x2a6   : > { %v3082_v28 = vsel %vm320_vm0, %v3080_v42, %v3081_v13 }
 0x2a7   : > { %v3084_v27 = vsel %vm3083_vm9, %v3077_v37, %v3082_v28  ;;  %v3644_v2 = vld [vmem:[#allocation2 + $0xb0] sm:$0xf]  ;;  %v3678_v9 = vld [vmem:[#allocation2 + $0xb4] sm:$0xf] }
 0x2a8   : > { %3086 = vst [vmem:[#allocation2 + $0xb8] sm:$0x33] %v3084_v27 }
 0x2a9   : > { %v2359_v19 = vpop.permute.xlu2 %2358 }
 0x2aa   : > { %v2362_v58 = vrot.slane %v2359_v19, 4 }
 0x2ab   : > { %v2301_v47 = vpop.permute.xlu0 %2300  ;;  %v3139_v6 = vpop.permute.xlu1 %3138 }
 0x2ac   : > { %v3142_v18 = vrot.slane %v3139_v6, 4  ;;  %v2304_v14 = vrot.slane %v2301_v47, 4 }
 0x2ae   : > { %v3144_v1 = vsel %vm320_vm0, %v3142_v18, %v3143_v46  ;;  %v3242_v18 = vld.sshfl [vmem:[#allocation1 + $0x8] sm:$0xff pattern:$0x73625140] }
 0x2af   : > { %v3146_v48 = vsel %vm3145_vm10, %v3139_v6, %v3144_v1 }
 0x2b0   : > { %3148 = vst [vmem:[#allocation2 + $0xb8] sm:$0xcc] %v3146_v48 }
 0x2b2   : > { %v2421_v34 = vpop.permute.xlu2 %2420 }
 0x2b3   : > { %v2361_v33 = vpop.permute.xlu0 %2360  ;;  %v3197_v41 = vpop.permute.xlu1 %3196  ;;  %v2423_v35 = vrot.slane %v2421_v34, 4 }
 0x2b4   : > { %v2363_v53 = vrot.slane %v2361_v33, 4  ;;  %v3200_v11 = vrot.slane %v3197_v41, 4 }
 0x2b6   : > { %v2364_v3 = vsel %vm320_vm0, %v2362_v58, %v2363_v53  ;;  %v3202_v52 = vsel %vm320_vm0, %v3200_v11, %v3201_v26 }
 0x2b7   : > { %v2366_v36 = vsel %vm2365_vm12, %v2359_v19, %v2364_v3  ;;  %v3204_v5 = vsel %vm3203_vm15, %v3197_v41, %v3202_v52  ;;  %v3679_v31 = vld [vmem:[#allocation2 + $0xb4] sm:$0xf0]  ;;  %v3646_v15 = vld [vmem:[#allocation2 + $0xb8] sm:$0xf0] }
 0x2b8   : > { %2368 = vst [vmem:[#allocation2 + $0x88] sm:$0x33] %v2366_v36  ;;  %v3645_v45 = vor.u32 %v3679_v31, %v3644_v2  ;;  %v3649_v37 = vor.u32 %v3678_v9, %v3646_v15 }
 0x2b9   : > { %3206 = vst [vmem:[#allocation2 + $0xc0] sm:$0x33] %v3204_v5 }
 0x2bb   : > { %v2239_v43 = vpop.permute.xlu1 %2238  ;;  %v3237_v48 = vpop.permute.xlu0 %3236 }
 0x2bc   : > { %v2242_v49 = vrot.slane %v2239_v43, 4 }
 0x2be   : > { %v2244_v17 = vsel %vm320_vm0, %v2242_v49, %v2243_v10 }
 0x2bf   : > { %v2246_v23 = vsel %vm2245_vm1, %v2239_v43, %v2244_v17 }
 0x2c0   : > { %v3232_v62 = vld [vmem:[#allocation2 + $0xc0] sm:$0x33]  ;;  %2248 = vst [vmem:[#allocation2 + $0x80] sm:$0x33] %v2246_v23 }
 0x2c1   : > { %v3317_v51 = vunpack.c.l.b16 %v3232_v62  ;;  %v3318_v57 = vunpack.c.h.b16 %v3232_v62 }
 0x2c3   : > { %v3343_v20 = vpack.c.b16 %v3317_v51, %v3317_v51  ;;  %v3344_v30 = vpack.c.b16 %v3318_v57, %v3318_v57  ;;  %v2303_v25 = vpop.permute.xlu1 %2302 }
 0x2c4   : > { %v2305_v16 = vrot.slane %v2303_v25, 4 }
 0x2c5   : > { %v3373_v12 = vsel %vm3371_vm2, %v3343_v20, 0  ;;  %v3376_v7 = vsel %vm3371_vm2, %v3344_v30, 0 }
 0x2c6   : > { %3394 = vmatpush.bf16.msra.mxu1 %v3373_v12  ;;  %3420 = vmatpush.bf16.msra.mxu3 %v3376_v7  ;;  %v2306_v50 = vsel %vm320_vm0, %v2304_v14, %v2305_v16 }
 0x2c7   : > { %v2308_v55 = vsel %vm2307_vm5, %v2301_v47, %v2306_v50 }
 0x2c8   : > { %2310 = vst [vmem:[#allocation2 + $0x80] sm:$0xcc] %v2308_v55 }
 0x2ca   : > { %3395 = vmatpush.bf16.msra.mxu1 %v3645_v45  ;;  %3421 = vmatpush.bf16.msra.mxu3 %v3649_v37 }
 0x2cb   : > { %v2419_v24 = vpop.permute.xlu1 %2418 }
 0x2cc   : > { %v2422_v4 = vrot.slane %v2419_v24, 4 }
 0x2ce   : > { %3396 = vmatpush.bf16.msra.mxu1 %v3637_v44  ;;  %3422 = vmatpush.bf16.msra.mxu3 %v3641_v60  ;;  %v2424_v39 = vsel %vm320_vm0, %v2422_v4, %v2423_v35 }
 0x2cf   : > { %v2426_v0 = vsel %vm1557_vm11, %v2419_v24, %v2424_v39  ;;  %v3620_v42 = vld [vmem:[#allocation2 + $0x80] sm:$0xf]  ;;  %v3672_v28 = vld [vmem:[#allocation2 + $0x84] sm:$0xf] }
 0x2d0   : > { %2428 = vst [vmem:[#allocation2 + $0x88] sm:$0xcc] %v2426_v0 }
 0x2d2   : > { %3397 = vmatpush.bf16.msra.mxu1 %v3629_v8  ;;  %3423 = vmatpush.bf16.msra.mxu3 %v3633_v21 }
 0x2d4   : > { %v3387_v40 = vpop.f32.mrf.mxu0 }
 0x2d5   : > { %v3388_v19 = vadd.f32 %v3387_v40, %v3237_v48 }
 0x2d7   : > { %v3673_v13 = vld [vmem:[#allocation2 + $0x84] sm:$0xf0]  ;;  %v3622_v56 = vld [vmem:[#allocation2 + $0x88] sm:$0xf0] }
 0x2d8   : > { %v3621_v27 = vor.u32 %v3673_v13, %v3620_v42  ;;  %v3625_v47 = vor.u32 %v3672_v28, %v3622_v56 }
 0x2da   : > { %v3413_v6 = vpop.f32.mrf.mxu2  ;;  %3398 = vmatpush.bf16.msra.mxu1 %v3621_v27  ;;  %3424 = vmatpush.bf16.msra.mxu3 %v3625_v47 }
 0x2db   : > { %v3414_v41 = vadd.f32 %v3413_v6, %v3237_v48 }
 0x2dc   : > { %v3389_v46 = vpop.f32.mrf.mxu0 }
 0x2dd   : > { %3650 = vmatmul.msk.bf16.vlgmr.msra.gmra.mxu1 %vm2217_vm3, %v3242_v18  ;;  %3651 = vmatmul.msk.bf16.vlgmr.msra.gmra.mxu3 %vm2217_vm3, %v3242_v18 }
 0x2e2   : > { %v3415_v1 = vpop.f32.mrf.mxu2 }
 0x35a   : > { %v3400_v33 = vpop.f32.mrf.mxu1 }
 0x35b   : > { %v3401_v58 = vadd.f32 %v3400_v33, %v3388_v19 }
 0x35d   : > { %3430 = vst [vmem:[%s296_s10] sm:$0xf] %v3401_v58 }
 0x360   : > { %v3426_v53 = vpop.f32.mrf.mxu3 }
 0x361   : > { %v3427_v26 = vadd.f32 %v3426_v53, %v3414_v41 }
 0x362   : > { %v3402_v11 = vpop.f32.mrf.mxu1 }
 0x363   : > { %3431 = vst [vmem:[%s296_s10 + $0x8] sm:$0xf] %v3427_v26 }
 0x368   : > { %v3428_v3 = vpop.f32.mrf.mxu3 }
 0x36a   : > { %v3432_v52 = vld [vmem:[%s286_s12] sm:$0xf0]  ;;  %v3433_v36 = vld [vmem:[%s286_s12 + $0x8] sm:$0xf0] }
 0x36b   : > { %3434 = vst [vmem:[%s296_s10] sm:$0xf0] %v3432_v52 }
 0x36c   : > { %3435 = vst [vmem:[%s296_s10 + $0x8] sm:$0xf0] %v3433_v36 }
 0x36d PF: > { %s15_s20 = sadd.s32 1, %s3820_s20   ;;  %s4827_s18 = smov %s3816_s19 }
 0x36e   : > { %p12_p5 = scmp.ge.s32.totalorder %s15_s20, 4   ;;  %s4828_s19 = smov %s4830_s21 }
 0x370   :  { %14 = sbr.rel (!%p12_p5) target bundleno = 2 (0x2), region = 121 }

</bundles_post_ra>
